<compile_context>
chip_gen: v5e
topology: v5e:2x2
jax: 0.10.0
libtpu: 0.0.40
codegen_flags: <defaults>
</compile_context>

<pallas_src>
import functools

import jax
import jax.numpy as jnp
from jax.experimental import pallas as pl
from jax.experimental.pallas import tpu as pltpu

_BN_EPS = 1e-5


# ----------------------------------------------------------------------------
# Fused kernel (Bt batch elements per grid step)
# ----------------------------------------------------------------------------

def _residual_block_kernel(*refs, K, pad, use_se, has_shortcut):
    it = iter(refs)
    x_ref = next(it)                                            # (Bt, L, Cin)   f32
    w1_ref, s1_ref, b1_ref = next(it), next(it), next(it)       # (K,Cin,Cout) bf16, (1,Cout) f32 x2
    w2_ref, s2_ref, b2_ref = next(it), next(it), next(it)       # (K,Cout,Cout) bf16, (1,Cout) f32 x2
    if use_se:
        sew1_ref, seb1_ref = next(it), next(it)                 # (Cout,Cred) bf16, (1,Cred) f32
        sew2_ref, seb2_ref = next(it), next(it)                 # (Cred,Cout) bf16, (1,Cout) f32
    if has_shortcut:
        scw_ref, scs_ref, scb_ref = next(it), next(it), next(it)  # (Cin,Cout) bf16, (1,Cout) f32 x2
    o_ref = next(it)                                            # (Bt, L, Cout)  f32
    xpad_ref = next(it)                                         # (Bt, L+2p, Cin)  bf16 scratch
    hpad_ref = next(it)                                         # (Bt, L+2p, Cout) bf16 scratch
    acc_ref = next(it)                                          # (Bt*L, Cout)     f32  scratch

    Bt, L, Cin = x_ref.shape
    Cout = o_ref.shape[2]
    M = Bt * L
    cdt = xpad_ref.dtype                                        # bf16 compute dtype

    # Zero only the 2*pad halo rows ('same' padding); interior is fully overwritten below.
    if pad > 0:
        xpad_ref[:, :pad, :] = jnp.zeros((Bt, pad, Cin), cdt)
        xpad_ref[:, pad + L:, :] = jnp.zeros((Bt, pad, Cin), cdt)
        hpad_ref[:, :pad, :] = jnp.zeros((Bt, pad, Cout), cdt)
        hpad_ref[:, pad + L:, :] = jnp.zeros((Bt, pad, Cout), cdt)

    # ---- conv1 + bn1 + relu : K-tap matmul accumulation (no im2col) ----------
    xpad_ref[:, pad:pad + L, :] = x_ref[...].astype(cdt)
    for k in range(K):                                          # static unroll, K MXU pushes
        part = jnp.dot(xpad_ref[:, k:k + L, :].reshape(M, Cin), w1_ref[k],
                       preferred_element_type=jnp.float32)
        if k == 0:
            acc_ref[...] = part
        else:
            acc_ref[...] += part
    h1 = jnp.maximum(acc_ref[...] * s1_ref[...] + b1_ref[...], 0.0)   # (M, Cout) f32

    # ---- conv2 + bn2 ----------------------------------------------------------
    hpad_ref[:, pad:pad + L, :] = h1.reshape(Bt, L, Cout).astype(cdt)
    for k in range(K):
        part = jnp.dot(hpad_ref[:, k:k + L, :].reshape(M, Cout), w2_ref[k],
                       preferred_element_type=jnp.float32)
        if k == 0:
            acc_ref[...] = part
        else:
            acc_ref[...] += part
    h2 = (acc_ref[...] * s2_ref[...] + b2_ref[...]).reshape(Bt, L, Cout)

    # ---- squeeze & excitation -------------------------------------------------
    if use_se:
        m = jnp.mean(h2, axis=1)                                # (Bt, Cout) global avg pool
        z = jnp.dot(m.astype(cdt), sew1_ref[...], preferred_element_type=jnp.float32)
        z = jnp.maximum(z + seb1_ref[...], 0.0)
        g = jnp.dot(z.astype(cdt), sew2_ref[...], preferred_element_type=jnp.float32)
        g = g + seb2_ref[...]
        gate = pl.reciprocal(1.0 + jnp.exp(-g), approx=True)    # sigmoid: exp + rcp on EUP
        h2 = h2 * gate[:, None, :]

    # ---- shortcut + final relu (re-read x_ref here; don't hold it live) -------
    if has_shortcut:
        sc = jnp.dot(x_ref[...].astype(cdt).reshape(M, Cin), scw_ref[...],
                     preferred_element_type=jnp.float32)
        sc = (sc * scs_ref[...] + scb_ref[...]).reshape(Bt, L, Cout)
    else:
        sc = x_ref[...].astype(jnp.float32)

    o_ref[...] = jnp.maximum(h2 + sc, 0.0).astype(o_ref.dtype)


# ----------------------------------------------------------------------------
# Wrapper
# ----------------------------------------------------------------------------

def _fold_conv_bn(conv_bias, bn, eps=_BN_EPS):
    """Fold eval-mode BatchNorm (+ conv bias) into per-channel f32 scale/shift."""
    scale = bn["gamma"] / jnp.sqrt(bn["var"] + eps)
    shift = (conv_bias - bn["mean"]) * scale + bn["beta"]
    return scale[None, :].astype(jnp.float32), shift[None, :].astype(jnp.float32)


def residual_block(x, p, *, kernel_size=7, stride=1, use_se=True, eps=_BN_EPS,
                   batch_tile=None):
    """x: (B, L, Cin) channels-last.  Returns (B, L, Cout)."""
    # TODO(synk): stride != 1 (strided conv1 + strided 1x1 shortcut) not implemented.
    assert stride == 1
    assert kernel_size % 2 == 1, "odd kernel_size required for 'same' padding"
    B, L, Cin = x.shape
    K = kernel_size
    pad = K // 2
    Cout = p["conv1_w"].shape[2]
    has_shortcut = (stride != 1) or (Cin != Cout)

    # Batch tile: biggest divisor of B that still leaves >= 2 grid steps (keeps both
    # v7x TensorCores busy) while amortizing per-step overhead and filling MXU rows.
    if batch_tile is None:
        batch_tile = next(bt for bt in range(max(B // 2, 1), 0, -1) if B % bt == 0)
    Bt = batch_tile
    assert B % Bt == 0
    grid = (B // Bt,)

    cdt = jnp.bfloat16   # MXU operand dtype (f32 accumulation, f32 BN scale/shift)

    args = [
        x,
        p["conv1_w"].astype(cdt), *_fold_conv_bn(p["conv1_b"], p["bn1"], eps),
        p["conv2_w"].astype(cdt), *_fold_conv_bn(p["conv2_b"], p["bn2"], eps),
    ]
    if use_se:
        args += [p["se_w1"].astype(cdt), p["se_b1"][None, :].astype(jnp.float32),
                 p["se_w2"].astype(cdt), p["se_b2"][None, :].astype(jnp.float32)]
    if has_shortcut:
        args += [p["sc_w"].astype(cdt), *_fold_conv_bn(p["sc_b"], p["sc_bn"], eps)]

    in_specs = [pl.BlockSpec((Bt, L, Cin), lambda b: (b, 0, 0))]
    in_specs += [pl.BlockSpec(a.shape, (lambda nd: (lambda b: (0,) * nd))(a.ndim))
                 for a in args[1:]]

    # TODO(synk): for production L (multi-K sequence lengths) add an L-tiling grid axis
    # with a K-1 halo so the per-step footprint stays inside v7x's 64 MiB VMEM per TC.
    scratch_shapes = [
        pltpu.VMEM((Bt, L + 2 * pad, Cin), cdt),     # zero-halo padded input
        pltpu.VMEM((Bt, L + 2 * pad, Cout), cdt),    # zero-halo padded conv1 output
        pltpu.VMEM((Bt * L, Cout), jnp.float32),     # f32 conv accumulator (reused)
    ]

    grid_spec = pltpu.PrefetchScalarGridSpec(
        num_scalar_prefetch=0,
        grid=grid,                                   # batch axis; sharded across TCs on v7x
        in_specs=in_specs,
        out_specs=pl.BlockSpec((Bt, L, Cout), lambda b: (b, 0, 0)),
        scratch_shapes=scratch_shapes,
    )

    # Explicit VMEM budget: double-buffered I/O blocks + constants + scratch + headroom,
    # clamped to 64 MiB so the limit is valid on every chip generation (v5e/v6e/v7x).
    io_bytes = Bt * L * (Cin + Cout) * x.dtype.itemsize
    const_bytes = sum(a.size * a.dtype.itemsize for a in args[1:])
    scratch_bytes = Bt * (L + 2 * pad) * (Cin + Cout) * 2 + Bt * L * Cout * 4
    vmem_limit = min(2 * io_bytes + 2 * const_bytes + scratch_bytes + (8 << 20), 64 << 20)

    # Advisory cost hint so XLA schedules neighbouring HLO around the custom call.
    c_red = p["se_w1"].shape[1] if use_se else 0
    flops = 2 * B * L * K * Cout * (Cin + Cout)
    if has_shortcut:
        flops += 2 * B * L * Cin * Cout
    if use_se:
        flops += 4 * B * Cout * c_red
    cost = pl.CostEstimate(flops=int(flops),
                           transcendentals=int(B * Cout if use_se else 0),
                           bytes_accessed=int(io_bytes * (B // Bt) + const_bytes))

    kern = functools.partial(_residual_block_kernel, K=K, pad=pad,
                             use_se=use_se, has_shortcut=has_shortcut)
    return pl.pallas_call(
        kern,
        out_shape=jax.ShapeDtypeStruct((B, L, Cout), x.dtype),
        grid_spec=grid_spec,
        compiler_params=pltpu.CompilerParams(
            dimension_semantics=("parallel",),
            vmem_limit_bytes=int(vmem_limit)),
        cost_estimate=cost,
    )(*args)


# ----------------------------------------------------------------------------
# Pure-JAX f32 reference (same eval-mode semantics) for a correctness check
# ----------------------------------------------------------------------------

def residual_block_reference(x, p, *, kernel_size=7, use_se=True, eps=_BN_EPS):
    K = kernel_size
    pad = K // 2
    B, L, Cin = x.shape
    Cout = p["conv1_w"].shape[2]

    def conv_bn(inp, w, b, bn):
        Bq, Lq, Cq = inp.shape
        Co = w.shape[2]
        xp = jnp.pad(inp, ((0, 0), (pad, pad), (0, 0)))
        cols = jnp.concatenate([xp[:, k:k + Lq, :] for k in range(K)], axis=-1)
        y = cols.reshape(Bq * Lq, K * Cq) @ w.reshape(K * Cq, Co) + b
        y = y.reshape(Bq, Lq, Co)
        scale = bn["gamma"] / jnp.sqrt(bn["var"] + eps)
        return (y - bn["mean"]) * scale + bn["beta"]

    h1 = jax.nn.relu(conv_bn(x, p["conv1_w"], p["conv1_b"], p["bn1"]))
    h2 = conv_bn(h1, p["conv2_w"], p["conv2_b"], p["bn2"])
    if use_se:
        m = jnp.mean(h2, axis=1)
        z = jax.nn.relu(m @ p["se_w1"] + p["se_b1"])
        g = 1.0 / (1.0 + jnp.exp(-(z @ p["se_w2"] + p["se_b2"])))
        h2 = h2 * g[:, None, :]
    if Cin != Cout:
        scale = p["sc_bn"]["gamma"] / jnp.sqrt(p["sc_bn"]["var"] + eps)
        sc = (x @ p["sc_w"] + p["sc_b"] - p["sc_bn"]["mean"]) * scale + p["sc_bn"]["beta"]
    else:
        sc = x
    return jax.nn.relu(h2 + sc)


# ----------------------------------------------------------------------------
# Parameter init + driver
# ----------------------------------------------------------------------------

def init_residual_block_params(key, in_channels, out_channels, kernel_size=7, reduction=16):
    K = kernel_size
    c_red = max(out_channels // reduction, 1)
    ks = jax.random.split(key, 13)

    def bn(k):
        k1, k2, k3, k4 = jax.random.split(k, 4)
        return {"gamma": 1.0 + 0.1 * jax.random.normal(k1, (out_channels,), jnp.float32),
                "beta": 0.1 * jax.random.normal(k2, (out_channels,), jnp.float32),
                "mean": 0.1 * jax.random.normal(k3, (out_channels,), jnp.float32),
                "var": 0.5 + jax.random.uniform(k4, (out_channels,), dtype=jnp.float32)}

    def he(k, shape, fan_in):
        return (2.0 / fan_in) ** 0.5 * jax.random.normal(k, shape, jnp.float32)

    return {
        "conv1_w": he(ks[0], (K, in_channels, out_channels), K * in_channels),
        "conv1_b": 0.05 * jax.random.normal(ks[1], (out_channels,), jnp.float32),
        "bn1": bn(ks[2]),
        "conv2_w": he(ks[3], (K, out_channels, out_channels), K * out_channels),
        "conv2_b": 0.05 * jax.random.normal(ks[4], (out_channels,), jnp.float32),
        "bn2": bn(ks[5]),
        "se_w1": he(ks[6], (out_channels, c_red), out_channels),
        "se_b1": 0.05 * jax.random.normal(ks[7], (c_red,), jnp.float32),
        "se_w2": he(ks[8], (c_red, out_channels), c_red),
        "se_b2": 0.05 * jax.random.normal(ks[9], (out_channels,), jnp.float32),
        "sc_w": he(ks[10], (in_channels, out_channels), in_channels),
        "sc_b": 0.05 * jax.random.normal(ks[11], (out_channels,), jnp.float32),
        "sc_bn": bn(ks[12]),
    }


if __name__ == "__main__":
    # Small but lane-friendly demo shapes: Cout=128 keeps output stores lane-dense.
    B, L = 4, 64
    IN_CH, OUT_CH, K, REDUCTION = 64, 128, 7, 16

    key = jax.random.PRNGKey(0)
    k_x, k_p = jax.random.split(key)
    x = jax.random.normal(k_x, (B, L, IN_CH), jnp.float32)        # channels-last (NLC)
    params = init_residual_block_params(k_p, IN_CH, OUT_CH, K, REDUCTION)

    fwd = jax.jit(functools.partial(residual_block, kernel_size=K))
    out = fwd(x, params)
    jax.block_until_ready(out)

    ref = residual_block_reference(x, params, kernel_size=K)
    assert out.shape == (B, L, OUT_CH), out.shape
    err = float(jnp.max(jnp.abs(out - ref)))
    # bf16 MXU operands (f32 accumulation) vs the pure-f32 reference -> loosened tolerance.
    assert jnp.allclose(out, ref, rtol=3e-2, atol=3e-2), f"max abs error {err}"
    print("KERNEL_OK")
</pallas_src>

<mosaic_0001>
module attributes {stable_mosaic.version = 11 : i64} {
  func.func @_residual_block_kernel(%arg0: i32, %arg1: memref<2x64x64xf32, #tpu.memory_space<vmem>>, %arg2: memref<7x64x128xbf16, #tpu.memory_space<vmem>>, %arg3: memref<1x128xf32, #tpu.memory_space<vmem>>, %arg4: memref<1x128xf32, #tpu.memory_space<vmem>>, %arg5: memref<7x128x128xbf16, #tpu.memory_space<vmem>>, %arg6: memref<1x128xf32, #tpu.memory_space<vmem>>, %arg7: memref<1x128xf32, #tpu.memory_space<vmem>>, %arg8: memref<128x8xbf16, #tpu.memory_space<vmem>>, %arg9: memref<1x8xf32, #tpu.memory_space<vmem>>, %arg10: memref<8x128xbf16, #tpu.memory_space<vmem>>, %arg11: memref<1x128xf32, #tpu.memory_space<vmem>>, %arg12: memref<64x128xbf16, #tpu.memory_space<vmem>>, %arg13: memref<1x128xf32, #tpu.memory_space<vmem>>, %arg14: memref<1x128xf32, #tpu.memory_space<vmem>>, %arg15: memref<2x64x128xf32, #tpu.memory_space<vmem>>, %arg16: memref<2x70x64xbf16, #tpu.memory_space<vmem>>, %arg17: memref<2x70x128xbf16, #tpu.memory_space<vmem>>, %arg18: memref<128x128xf32, #tpu.memory_space<vmem>>) attributes {dimension_semantics = [#tpu.dimension_semantics<parallel>], iteration_bounds = array<i64: 2>, scalar_prefetch = 0 : i64, scratch_operands = 3 : i64, tpu.core_type = #tpu.core_type<tc>, window_params = [{transform_indices = @transform_0, window_bounds = array<i64: 2, 64, 64>}, {pipeline_mode = #tpu.pipeline_mode<synchronous>, transform_indices = @transform_1, window_bounds = array<i64: 7, 64, 128>}, {pipeline_mode = #tpu.pipeline_mode<synchronous>, transform_indices = @transform_2, window_bounds = array<i64: 1, 128>}, {pipeline_mode = #tpu.pipeline_mode<synchronous>, transform_indices = @transform_3, window_bounds = array<i64: 1, 128>}, {pipeline_mode = #tpu.pipeline_mode<synchronous>, transform_indices = @transform_4, window_bounds = array<i64: 7, 128, 128>}, {pipeline_mode = #tpu.pipeline_mode<synchronous>, transform_indices = @transform_5, window_bounds = array<i64: 1, 128>}, {pipeline_mode = #tpu.pipeline_mode<synchronous>, transform_indices = @transform_6, window_bounds = array<i64: 1, 128>}, {pipeline_mode = #tpu.pipeline_mode<synchronous>, transform_indices = @transform_7, window_bounds = array<i64: 128, 8>}, {pipeline_mode = #tpu.pipeline_mode<synchronous>, transform_indices = @transform_8, window_bounds = array<i64: 1, 8>}, {pipeline_mode = #tpu.pipeline_mode<synchronous>, transform_indices = @transform_9, window_bounds = array<i64: 8, 128>}, {pipeline_mode = #tpu.pipeline_mode<synchronous>, transform_indices = @transform_10, window_bounds = array<i64: 1, 128>}, {pipeline_mode = #tpu.pipeline_mode<synchronous>, transform_indices = @transform_11, window_bounds = array<i64: 64, 128>}, {pipeline_mode = #tpu.pipeline_mode<synchronous>, transform_indices = @transform_12, window_bounds = array<i64: 1, 128>}, {pipeline_mode = #tpu.pipeline_mode<synchronous>, transform_indices = @transform_13, window_bounds = array<i64: 1, 128>}, {transform_indices = @transform_14, window_bounds = array<i64: 2, 64, 128>}]} {
    %cst = arith.constant 0.000000e+00 : bf16
    %0 = vector.broadcast %cst : bf16 to vector<2x3x64xbf16>
    %c0 = arith.constant 0 : index
    %c0_0 = arith.constant 0 : index
    %c0_1 = arith.constant 0 : index
    %1 = vector.load %arg16[%c0, %c0_0, %c0_1] : memref<2x70x64xbf16, #tpu.memory_space<vmem>>, vector<2x3x64xbf16>
    tpu.vector_store %arg16[%c0, %c0_0, %c0_1], %0 {strides = array<i32>} : memref<2x70x64xbf16, #tpu.memory_space<vmem>>, vector<2x3x64xbf16>,
    %cst_2 = arith.constant 0.000000e+00 : bf16
    %2 = vector.broadcast %cst_2 : bf16 to vector<2x3x64xbf16>
    %c0_3 = arith.constant 0 : index
    %c67 = arith.constant 67 : index
    %c0_4 = arith.constant 0 : index
    %3 = vector.load %arg16[%c0_3, %c67, %c0_4] : memref<2x70x64xbf16, #tpu.memory_space<vmem>>, vector<2x3x64xbf16>
    tpu.vector_store %arg16[%c0_3, %c67, %c0_4], %2 {strides = array<i32>} : memref<2x70x64xbf16, #tpu.memory_space<vmem>>, vector<2x3x64xbf16>,
    %cst_5 = arith.constant 0.000000e+00 : bf16
    %4 = vector.broadcast %cst_5 : bf16 to vector<2x3x128xbf16>
    %c0_6 = arith.constant 0 : index
    %c0_7 = arith.constant 0 : index
    %c0_8 = arith.constant 0 : index
    %5 = vector.load %arg17[%c0_6, %c0_7, %c0_8] : memref<2x70x128xbf16, #tpu.memory_space<vmem>>, vector<2x3x128xbf16>
    tpu.vector_store %arg17[%c0_6, %c0_7, %c0_8], %4 {strides = array<i32>} : memref<2x70x128xbf16, #tpu.memory_space<vmem>>, vector<2x3x128xbf16>,
    %cst_9 = arith.constant 0.000000e+00 : bf16
    %6 = vector.broadcast %cst_9 : bf16 to vector<2x3x128xbf16>
    %c0_10 = arith.constant 0 : index
    %c67_11 = arith.constant 67 : index
    %c0_12 = arith.constant 0 : index
    %7 = vector.load %arg17[%c0_10, %c67_11, %c0_12] : memref<2x70x128xbf16, #tpu.memory_space<vmem>>, vector<2x3x128xbf16>
    tpu.vector_store %arg17[%c0_10, %c67_11, %c0_12], %6 {strides = array<i32>} : memref<2x70x128xbf16, #tpu.memory_space<vmem>>, vector<2x3x128xbf16>,
    %c0_13 = arith.constant 0 : index
    %c0_14 = arith.constant 0 : index
    %c0_15 = arith.constant 0 : index
    %8 = vector.load %arg1[%c0_13, %c0_14, %c0_15] : memref<2x64x64xf32, #tpu.memory_space<vmem>>, vector<2x64x64xf32>
    %9 = arith.truncf %8 : vector<2x64x64xf32> to vector<2x64x64xbf16>
    %c0_16 = arith.constant 0 : index
    %c3 = arith.constant 3 : index
    %c0_17 = arith.constant 0 : index
    %10 = vector.load %arg16[%c0_16, %c3, %c0_17] : memref<2x70x64xbf16, #tpu.memory_space<vmem>>, vector<2x64x64xbf16>
    tpu.vector_store %arg16[%c0_16, %c3, %c0_17], %9 {strides = array<i32>} : memref<2x70x64xbf16, #tpu.memory_space<vmem>>, vector<2x64x64xbf16>,
    %c0_18 = arith.constant 0 : index
    %c0_19 = arith.constant 0 : index
    %c0_20 = arith.constant 0 : index
    %11 = vector.load %arg16[%c0_18, %c0_19, %c0_20] : memref<2x70x64xbf16, #tpu.memory_space<vmem>>, vector<2x64x64xbf16>
    %12 = vector.shape_cast %11 : vector<2x64x64xbf16> to vector<128x64xbf16>
    %c0_21 = arith.constant 0 : index
    %c0_22 = arith.constant 0 : index
    %c0_23 = arith.constant 0 : index
    %13 = vector.load %arg2[%c0_21, %c0_22, %c0_23] : memref<7x64x128xbf16, #tpu.memory_space<vmem>>, vector<1x64x128xbf16>
    %14 = vector.shape_cast %13 : vector<1x64x128xbf16> to vector<64x128xbf16>
    %cst_24 = arith.constant dense<0.000000e+00> : vector<128x128xf32>
    %15 = tpu.matmul %12, %14, %cst_24 {dimension_numbers = #tpu.dot_dimension_numbers<[1], [0], [0], [1], [0, 0, 1, 1], [], []>} : vector<128x64xbf16>, vector<64x128xbf16>, vector<128x128xf32> -> vector<128x128xf32>
    %c0_25 = arith.constant 0 : index
    %c0_26 = arith.constant 0 : index
    %16 = vector.load %arg18[%c0_25, %c0_26] : memref<128x128xf32, #tpu.memory_space<vmem>>, vector<128x128xf32>
    tpu.vector_store %arg18[%c0_25, %c0_26], %15 {strides = array<i32>} : memref<128x128xf32, #tpu.memory_space<vmem>>, vector<128x128xf32>,
    %c0_27 = arith.constant 0 : index
    %c1 = arith.constant 1 : index
    %c0_28 = arith.constant 0 : index
    %17 = vector.load %arg16[%c0_27, %c1, %c0_28] : memref<2x70x64xbf16, #tpu.memory_space<vmem>>, vector<2x64x64xbf16>
    %18 = vector.shape_cast %17 : vector<2x64x64xbf16> to vector<128x64xbf16>
    %c1_29 = arith.constant 1 : index
    %c0_30 = arith.constant 0 : index
    %c0_31 = arith.constant 0 : index
    %19 = vector.load %arg2[%c1_29, %c0_30, %c0_31] : memref<7x64x128xbf16, #tpu.memory_space<vmem>>, vector<1x64x128xbf16>
    %20 = vector.shape_cast %19 : vector<1x64x128xbf16> to vector<64x128xbf16>
    %cst_32 = arith.constant dense<0.000000e+00> : vector<128x128xf32>
    %21 = tpu.matmul %18, %20, %cst_32 {dimension_numbers = #tpu.dot_dimension_numbers<[1], [0], [0], [1], [0, 0, 1, 1], [], []>} : vector<128x64xbf16>, vector<64x128xbf16>, vector<128x128xf32> -> vector<128x128xf32>
    %c0_33 = arith.constant 0 : index
    %c0_34 = arith.constant 0 : index
    %22 = vector.load %arg18[%c0_33, %c0_34] : memref<128x128xf32, #tpu.memory_space<vmem>>, vector<128x128xf32>
    %23 = arith.addf %22, %21 : vector<128x128xf32>
    %c0_35 = arith.constant 0 : index
    %c0_36 = arith.constant 0 : index
    %24 = vector.load %arg18[%c0_35, %c0_36] : memref<128x128xf32, #tpu.memory_space<vmem>>, vector<128x128xf32>
    tpu.vector_store %arg18[%c0_35, %c0_36], %23 {strides = array<i32>} : memref<128x128xf32, #tpu.memory_space<vmem>>, vector<128x128xf32>,
    %c0_37 = arith.constant 0 : index
    %c2 = arith.constant 2 : index
    %c0_38 = arith.constant 0 : index
    %25 = vector.load %arg16[%c0_37, %c2, %c0_38] : memref<2x70x64xbf16, #tpu.memory_space<vmem>>, vector<2x64x64xbf16>
    %26 = vector.shape_cast %25 : vector<2x64x64xbf16> to vector<128x64xbf16>
    %c2_39 = arith.constant 2 : index
    %c0_40 = arith.constant 0 : index
    %c0_41 = arith.constant 0 : index
    %27 = vector.load %arg2[%c2_39, %c0_40, %c0_41] : memref<7x64x128xbf16, #tpu.memory_space<vmem>>, vector<1x64x128xbf16>
    %28 = vector.shape_cast %27 : vector<1x64x128xbf16> to vector<64x128xbf16>
    %cst_42 = arith.constant dense<0.000000e+00> : vector<128x128xf32>
    %29 = tpu.matmul %26, %28, %cst_42 {dimension_numbers = #tpu.dot_dimension_numbers<[1], [0], [0], [1], [0, 0, 1, 1], [], []>} : vector<128x64xbf16>, vector<64x128xbf16>, vector<128x128xf32> -> vector<128x128xf32>
    %c0_43 = arith.constant 0 : index
    %c0_44 = arith.constant 0 : index
    %30 = vector.load %arg18[%c0_43, %c0_44] : memref<128x128xf32, #tpu.memory_space<vmem>>, vector<128x128xf32>
    %31 = arith.addf %30, %29 : vector<128x128xf32>
    %c0_45 = arith.constant 0 : index
    %c0_46 = arith.constant 0 : index
    %32 = vector.load %arg18[%c0_45, %c0_46] : memref<128x128xf32, #tpu.memory_space<vmem>>, vector<128x128xf32>
    tpu.vector_store %arg18[%c0_45, %c0_46], %31 {strides = array<i32>} : memref<128x128xf32, #tpu.memory_space<vmem>>, vector<128x128xf32>,
    %c0_47 = arith.constant 0 : index
    %c3_48 = arith.constant 3 : index
    %c0_49 = arith.constant 0 : index
    %33 = vector.load %arg16[%c0_47, %c3_48, %c0_49] : memref<2x70x64xbf16, #tpu.memory_space<vmem>>, vector<2x64x64xbf16>
    %34 = vector.shape_cast %33 : vector<2x64x64xbf16> to vector<128x64xbf16>
    %c3_50 = arith.constant 3 : index
    %c0_51 = arith.constant 0 : index
    %c0_52 = arith.constant 0 : index
    %35 = vector.load %arg2[%c3_50, %c0_51, %c0_52] : memref<7x64x128xbf16, #tpu.memory_space<vmem>>, vector<1x64x128xbf16>
    %36 = vector.shape_cast %35 : vector<1x64x128xbf16> to vector<64x128xbf16>
    %cst_53 = arith.constant dense<0.000000e+00> : vector<128x128xf32>
    %37 = tpu.matmul %34, %36, %cst_53 {dimension_numbers = #tpu.dot_dimension_numbers<[1], [0], [0], [1], [0, 0, 1, 1], [], []>} : vector<128x64xbf16>, vector<64x128xbf16>, vector<128x128xf32> -> vector<128x128xf32>
    %c0_54 = arith.constant 0 : index
    %c0_55 = arith.constant 0 : index
    %38 = vector.load %arg18[%c0_54, %c0_55] : memref<128x128xf32, #tpu.memory_space<vmem>>, vector<128x128xf32>
    %39 = arith.addf %38, %37 : vector<128x128xf32>
    %c0_56 = arith.constant 0 : index
    %c0_57 = arith.constant 0 : index
    %40 = vector.load %arg18[%c0_56, %c0_57] : memref<128x128xf32, #tpu.memory_space<vmem>>, vector<128x128xf32>
    tpu.vector_store %arg18[%c0_56, %c0_57], %39 {strides = array<i32>} : memref<128x128xf32, #tpu.memory_space<vmem>>, vector<128x128xf32>,
    %c0_58 = arith.constant 0 : index
    %c4 = arith.constant 4 : index
    %c0_59 = arith.constant 0 : index
    %41 = vector.load %arg16[%c0_58, %c4, %c0_59] : memref<2x70x64xbf16, #tpu.memory_space<vmem>>, vector<2x64x64xbf16>
    %42 = vector.shape_cast %41 : vector<2x64x64xbf16> to vector<128x64xbf16>
    %c4_60 = arith.constant 4 : index
    %c0_61 = arith.constant 0 : index
    %c0_62 = arith.constant 0 : index
    %43 = vector.load %arg2[%c4_60, %c0_61, %c0_62] : memref<7x64x128xbf16, #tpu.memory_space<vmem>>, vector<1x64x128xbf16>
    %44 = vector.shape_cast %43 : vector<1x64x128xbf16> to vector<64x128xbf16>
    %cst_63 = arith.constant dense<0.000000e+00> : vector<128x128xf32>
    %45 = tpu.matmul %42, %44, %cst_63 {dimension_numbers = #tpu.dot_dimension_numbers<[1], [0], [0], [1], [0, 0, 1, 1], [], []>} : vector<128x64xbf16>, vector<64x128xbf16>, vector<128x128xf32> -> vector<128x128xf32>
    %c0_64 = arith.constant 0 : index
    %c0_65 = arith.constant 0 : index
    %46 = vector.load %arg18[%c0_64, %c0_65] : memref<128x128xf32, #tpu.memory_space<vmem>>, vector<128x128xf32>
    %47 = arith.addf %46, %45 : vector<128x128xf32>
    %c0_66 = arith.constant 0 : index
    %c0_67 = arith.constant 0 : index
    %48 = vector.load %arg18[%c0_66, %c0_67] : memref<128x128xf32, #tpu.memory_space<vmem>>, vector<128x128xf32>
    tpu.vector_store %arg18[%c0_66, %c0_67], %47 {strides = array<i32>} : memref<128x128xf32, #tpu.memory_space<vmem>>, vector<128x128xf32>,
    %c0_68 = arith.constant 0 : index
    %c5 = arith.constant 5 : index
    %c0_69 = arith.constant 0 : index
    %49 = vector.load %arg16[%c0_68, %c5, %c0_69] : memref<2x70x64xbf16, #tpu.memory_space<vmem>>, vector<2x64x64xbf16>
    %50 = vector.shape_cast %49 : vector<2x64x64xbf16> to vector<128x64xbf16>
    %c5_70 = arith.constant 5 : index
    %c0_71 = arith.constant 0 : index
    %c0_72 = arith.constant 0 : index
    %51 = vector.load %arg2[%c5_70, %c0_71, %c0_72] : memref<7x64x128xbf16, #tpu.memory_space<vmem>>, vector<1x64x128xbf16>
    %52 = vector.shape_cast %51 : vector<1x64x128xbf16> to vector<64x128xbf16>
    %cst_73 = arith.constant dense<0.000000e+00> : vector<128x128xf32>
    %53 = tpu.matmul %50, %52, %cst_73 {dimension_numbers = #tpu.dot_dimension_numbers<[1], [0], [0], [1], [0, 0, 1, 1], [], []>} : vector<128x64xbf16>, vector<64x128xbf16>, vector<128x128xf32> -> vector<128x128xf32>
    %c0_74 = arith.constant 0 : index
    %c0_75 = arith.constant 0 : index
    %54 = vector.load %arg18[%c0_74, %c0_75] : memref<128x128xf32, #tpu.memory_space<vmem>>, vector<128x128xf32>
    %55 = arith.addf %54, %53 : vector<128x128xf32>
    %c0_76 = arith.constant 0 : index
    %c0_77 = arith.constant 0 : index
    %56 = vector.load %arg18[%c0_76, %c0_77] : memref<128x128xf32, #tpu.memory_space<vmem>>, vector<128x128xf32>
    tpu.vector_store %arg18[%c0_76, %c0_77], %55 {strides = array<i32>} : memref<128x128xf32, #tpu.memory_space<vmem>>, vector<128x128xf32>,
    %c0_78 = arith.constant 0 : index
    %c6 = arith.constant 6 : index
    %c0_79 = arith.constant 0 : index
    %57 = vector.load %arg16[%c0_78, %c6, %c0_79] : memref<2x70x64xbf16, #tpu.memory_space<vmem>>, vector<2x64x64xbf16>
    %58 = vector.shape_cast %57 : vector<2x64x64xbf16> to vector<128x64xbf16>
    %c6_80 = arith.constant 6 : index
    %c0_81 = arith.constant 0 : index
    %c0_82 = arith.constant 0 : index
    %59 = vector.load %arg2[%c6_80, %c0_81, %c0_82] : memref<7x64x128xbf16, #tpu.memory_space<vmem>>, vector<1x64x128xbf16>
    %60 = vector.shape_cast %59 : vector<1x64x128xbf16> to vector<64x128xbf16>
    %cst_83 = arith.constant dense<0.000000e+00> : vector<128x128xf32>
    %61 = tpu.matmul %58, %60, %cst_83 {dimension_numbers = #tpu.dot_dimension_numbers<[1], [0], [0], [1], [0, 0, 1, 1], [], []>} : vector<128x64xbf16>, vector<64x128xbf16>, vector<128x128xf32> -> vector<128x128xf32>
    %c0_84 = arith.constant 0 : index
    %c0_85 = arith.constant 0 : index
    %62 = vector.load %arg18[%c0_84, %c0_85] : memref<128x128xf32, #tpu.memory_space<vmem>>, vector<128x128xf32>
    %63 = arith.addf %62, %61 : vector<128x128xf32>
    %c0_86 = arith.constant 0 : index
    %c0_87 = arith.constant 0 : index
    %64 = vector.load %arg18[%c0_86, %c0_87] : memref<128x128xf32, #tpu.memory_space<vmem>>, vector<128x128xf32>
    tpu.vector_store %arg18[%c0_86, %c0_87], %63 {strides = array<i32>} : memref<128x128xf32, #tpu.memory_space<vmem>>, vector<128x128xf32>,
    %c0_88 = arith.constant 0 : index
    %c0_89 = arith.constant 0 : index
    %65 = vector.load %arg18[%c0_88, %c0_89] : memref<128x128xf32, #tpu.memory_space<vmem>>, vector<128x128xf32>
    %c0_90 = arith.constant 0 : index
    %c0_91 = arith.constant 0 : index
    %66 = vector.load %arg3[%c0_90, %c0_91] : memref<1x128xf32, #tpu.memory_space<vmem>>, vector<1x128xf32>
    %67 = vector.broadcast %66 : vector<1x128xf32> to vector<128x128xf32>
    %68 = arith.mulf %65, %67 : vector<128x128xf32>
    %c0_92 = arith.constant 0 : index
    %c0_93 = arith.constant 0 : index
    %69 = vector.load %arg4[%c0_92, %c0_93] : memref<1x128xf32, #tpu.memory_space<vmem>>, vector<1x128xf32>
    %70 = vector.broadcast %69 : vector<1x128xf32> to vector<128x128xf32>
    %71 = arith.addf %68, %70 : vector<128x128xf32>
    %cst_94 = arith.constant 0.000000e+00 : f32
    %72 = vector.broadcast %cst_94 : f32 to vector<128x128xf32>
    %73 = arith.maximumf %71, %72 : vector<128x128xf32>
    %74 = vector.shape_cast %73 : vector<128x128xf32> to vector<2x64x128xf32>
    %75 = arith.truncf %74 : vector<2x64x128xf32> to vector<2x64x128xbf16>
    %c0_95 = arith.constant 0 : index
    %c3_96 = arith.constant 3 : index
    %c0_97 = arith.constant 0 : index
    %76 = vector.load %arg17[%c0_95, %c3_96, %c0_97] : memref<2x70x128xbf16, #tpu.memory_space<vmem>>, vector<2x64x128xbf16>
    tpu.vector_store %arg17[%c0_95, %c3_96, %c0_97], %75 {strides = array<i32>} : memref<2x70x128xbf16, #tpu.memory_space<vmem>>, vector<2x64x128xbf16>,
    %c0_98 = arith.constant 0 : index
    %c0_99 = arith.constant 0 : index
    %c0_100 = arith.constant 0 : index
    %77 = vector.load %arg17[%c0_98, %c0_99, %c0_100] : memref<2x70x128xbf16, #tpu.memory_space<vmem>>, vector<2x64x128xbf16>
    %78 = vector.shape_cast %77 : vector<2x64x128xbf16> to vector<128x128xbf16>
    %c0_101 = arith.constant 0 : index
    %c0_102 = arith.constant 0 : index
    %c0_103 = arith.constant 0 : index
    %79 = vector.load %arg5[%c0_101, %c0_102, %c0_103] : memref<7x128x128xbf16, #tpu.memory_space<vmem>>, vector<1x128x128xbf16>
    %80 = vector.shape_cast %79 : vector<1x128x128xbf16> to vector<128x128xbf16>
    %cst_104 = arith.constant dense<0.000000e+00> : vector<128x128xf32>
    %81 = tpu.matmul %78, %80, %cst_104 {dimension_numbers = #tpu.dot_dimension_numbers<[1], [0], [0], [1], [0, 0, 1, 1], [], []>} : vector<128x128xbf16>, vector<128x128xbf16>, vector<128x128xf32> -> vector<128x128xf32>
    %c0_105 = arith.constant 0 : index
    %c0_106 = arith.constant 0 : index
    %82 = vector.load %arg18[%c0_105, %c0_106] : memref<128x128xf32, #tpu.memory_space<vmem>>, vector<128x128xf32>
    tpu.vector_store %arg18[%c0_105, %c0_106], %81 {strides = array<i32>} : memref<128x128xf32, #tpu.memory_space<vmem>>, vector<128x128xf32>,
    %c0_107 = arith.constant 0 : index
    %c1_108 = arith.constant 1 : index
    %c0_109 = arith.constant 0 : index
    %83 = vector.load %arg17[%c0_107, %c1_108, %c0_109] : memref<2x70x128xbf16, #tpu.memory_space<vmem>>, vector<2x64x128xbf16>
    %84 = vector.shape_cast %83 : vector<2x64x128xbf16> to vector<128x128xbf16>
    %c1_110 = arith.constant 1 : index
    %c0_111 = arith.constant 0 : index
    %c0_112 = arith.constant 0 : index
    %85 = vector.load %arg5[%c1_110, %c0_111, %c0_112] : memref<7x128x128xbf16, #tpu.memory_space<vmem>>, vector<1x128x128xbf16>
    %86 = vector.shape_cast %85 : vector<1x128x128xbf16> to vector<128x128xbf16>
    %cst_113 = arith.constant dense<0.000000e+00> : vector<128x128xf32>
    %87 = tpu.matmul %84, %86, %cst_113 {dimension_numbers = #tpu.dot_dimension_numbers<[1], [0], [0], [1], [0, 0, 1, 1], [], []>} : vector<128x128xbf16>, vector<128x128xbf16>, vector<128x128xf32> -> vector<128x128xf32>
    %c0_114 = arith.constant 0 : index
    %c0_115 = arith.constant 0 : index
    %88 = vector.load %arg18[%c0_114, %c0_115] : memref<128x128xf32, #tpu.memory_space<vmem>>, vector<128x128xf32>
    %89 = arith.addf %88, %87 : vector<128x128xf32>
    %c0_116 = arith.constant 0 : index
    %c0_117 = arith.constant 0 : index
    %90 = vector.load %arg18[%c0_116, %c0_117] : memref<128x128xf32, #tpu.memory_space<vmem>>, vector<128x128xf32>
    tpu.vector_store %arg18[%c0_116, %c0_117], %89 {strides = array<i32>} : memref<128x128xf32, #tpu.memory_space<vmem>>, vector<128x128xf32>,
    %c0_118 = arith.constant 0 : index
    %c2_119 = arith.constant 2 : index
    %c0_120 = arith.constant 0 : index
    %91 = vector.load %arg17[%c0_118, %c2_119, %c0_120] : memref<2x70x128xbf16, #tpu.memory_space<vmem>>, vector<2x64x128xbf16>
    %92 = vector.shape_cast %91 : vector<2x64x128xbf16> to vector<128x128xbf16>
    %c2_121 = arith.constant 2 : index
    %c0_122 = arith.constant 0 : index
    %c0_123 = arith.constant 0 : index
    %93 = vector.load %arg5[%c2_121, %c0_122, %c0_123] : memref<7x128x128xbf16, #tpu.memory_space<vmem>>, vector<1x128x128xbf16>
    %94 = vector.shape_cast %93 : vector<1x128x128xbf16> to vector<128x128xbf16>
    %cst_124 = arith.constant dense<0.000000e+00> : vector<128x128xf32>
    %95 = tpu.matmul %92, %94, %cst_124 {dimension_numbers = #tpu.dot_dimension_numbers<[1], [0], [0], [1], [0, 0, 1, 1], [], []>} : vector<128x128xbf16>, vector<128x128xbf16>, vector<128x128xf32> -> vector<128x128xf32>
    %c0_125 = arith.constant 0 : index
    %c0_126 = arith.constant 0 : index
    %96 = vector.load %arg18[%c0_125, %c0_126] : memref<128x128xf32, #tpu.memory_space<vmem>>, vector<128x128xf32>
    %97 = arith.addf %96, %95 : vector<128x128xf32>
    %c0_127 = arith.constant 0 : index
    %c0_128 = arith.constant 0 : index
    %98 = vector.load %arg18[%c0_127, %c0_128] : memref<128x128xf32, #tpu.memory_space<vmem>>, vector<128x128xf32>
    tpu.vector_store %arg18[%c0_127, %c0_128], %97 {strides = array<i32>} : memref<128x128xf32, #tpu.memory_space<vmem>>, vector<128x128xf32>,
    %c0_129 = arith.constant 0 : index
    %c3_130 = arith.constant 3 : index
    %c0_131 = arith.constant 0 : index
    %99 = vector.load %arg17[%c0_129, %c3_130, %c0_131] : memref<2x70x128xbf16, #tpu.memory_space<vmem>>, vector<2x64x128xbf16>
    %100 = vector.shape_cast %99 : vector<2x64x128xbf16> to vector<128x128xbf16>
    %c3_132 = arith.constant 3 : index
    %c0_133 = arith.constant 0 : index
    %c0_134 = arith.constant 0 : index
    %101 = vector.load %arg5[%c3_132, %c0_133, %c0_134] : memref<7x128x128xbf16, #tpu.memory_space<vmem>>, vector<1x128x128xbf16>
    %102 = vector.shape_cast %101 : vector<1x128x128xbf16> to vector<128x128xbf16>
    %cst_135 = arith.constant dense<0.000000e+00> : vector<128x128xf32>
    %103 = tpu.matmul %100, %102, %cst_135 {dimension_numbers = #tpu.dot_dimension_numbers<[1], [0], [0], [1], [0, 0, 1, 1], [], []>} : vector<128x128xbf16>, vector<128x128xbf16>, vector<128x128xf32> -> vector<128x128xf32>
    %c0_136 = arith.constant 0 : index
    %c0_137 = arith.constant 0 : index
    %104 = vector.load %arg18[%c0_136, %c0_137] : memref<128x128xf32, #tpu.memory_space<vmem>>, vector<128x128xf32>
    %105 = arith.addf %104, %103 : vector<128x128xf32>
    %c0_138 = arith.constant 0 : index
    %c0_139 = arith.constant 0 : index
    %106 = vector.load %arg18[%c0_138, %c0_139] : memref<128x128xf32, #tpu.memory_space<vmem>>, vector<128x128xf32>
    tpu.vector_store %arg18[%c0_138, %c0_139], %105 {strides = array<i32>} : memref<128x128xf32, #tpu.memory_space<vmem>>, vector<128x128xf32>,
    %c0_140 = arith.constant 0 : index
    %c4_141 = arith.constant 4 : index
    %c0_142 = arith.constant 0 : index
    %107 = vector.load %arg17[%c0_140, %c4_141, %c0_142] : memref<2x70x128xbf16, #tpu.memory_space<vmem>>, vector<2x64x128xbf16>
    %108 = vector.shape_cast %107 : vector<2x64x128xbf16> to vector<128x128xbf16>
    %c4_143 = arith.constant 4 : index
    %c0_144 = arith.constant 0 : index
    %c0_145 = arith.constant 0 : index
    %109 = vector.load %arg5[%c4_143, %c0_144, %c0_145] : memref<7x128x128xbf16, #tpu.memory_space<vmem>>, vector<1x128x128xbf16>
    %110 = vector.shape_cast %109 : vector<1x128x128xbf16> to vector<128x128xbf16>
    %cst_146 = arith.constant dense<0.000000e+00> : vector<128x128xf32>
    %111 = tpu.matmul %108, %110, %cst_146 {dimension_numbers = #tpu.dot_dimension_numbers<[1], [0], [0], [1], [0, 0, 1, 1], [], []>} : vector<128x128xbf16>, vector<128x128xbf16>, vector<128x128xf32> -> vector<128x128xf32>
    %c0_147 = arith.constant 0 : index
    %c0_148 = arith.constant 0 : index
    %112 = vector.load %arg18[%c0_147, %c0_148] : memref<128x128xf32, #tpu.memory_space<vmem>>, vector<128x128xf32>
    %113 = arith.addf %112, %111 : vector<128x128xf32>
    %c0_149 = arith.constant 0 : index
    %c0_150 = arith.constant 0 : index
    %114 = vector.load %arg18[%c0_149, %c0_150] : memref<128x128xf32, #tpu.memory_space<vmem>>, vector<128x128xf32>
    tpu.vector_store %arg18[%c0_149, %c0_150], %113 {strides = array<i32>} : memref<128x128xf32, #tpu.memory_space<vmem>>, vector<128x128xf32>,
    %c0_151 = arith.constant 0 : index
    %c5_152 = arith.constant 5 : index
    %c0_153 = arith.constant 0 : index
    %115 = vector.load %arg17[%c0_151, %c5_152, %c0_153] : memref<2x70x128xbf16, #tpu.memory_space<vmem>>, vector<2x64x128xbf16>
    %116 = vector.shape_cast %115 : vector<2x64x128xbf16> to vector<128x128xbf16>
    %c5_154 = arith.constant 5 : index
    %c0_155 = arith.constant 0 : index
    %c0_156 = arith.constant 0 : index
    %117 = vector.load %arg5[%c5_154, %c0_155, %c0_156] : memref<7x128x128xbf16, #tpu.memory_space<vmem>>, vector<1x128x128xbf16>
    %118 = vector.shape_cast %117 : vector<1x128x128xbf16> to vector<128x128xbf16>
    %cst_157 = arith.constant dense<0.000000e+00> : vector<128x128xf32>
    %119 = tpu.matmul %116, %118, %cst_157 {dimension_numbers = #tpu.dot_dimension_numbers<[1], [0], [0], [1], [0, 0, 1, 1], [], []>} : vector<128x128xbf16>, vector<128x128xbf16>, vector<128x128xf32> -> vector<128x128xf32>
    %c0_158 = arith.constant 0 : index
    %c0_159 = arith.constant 0 : index
    %120 = vector.load %arg18[%c0_158, %c0_159] : memref<128x128xf32, #tpu.memory_space<vmem>>, vector<128x128xf32>
    %121 = arith.addf %120, %119 : vector<128x128xf32>
    %c0_160 = arith.constant 0 : index
    %c0_161 = arith.constant 0 : index
    %122 = vector.load %arg18[%c0_160, %c0_161] : memref<128x128xf32, #tpu.memory_space<vmem>>, vector<128x128xf32>
    tpu.vector_store %arg18[%c0_160, %c0_161], %121 {strides = array<i32>} : memref<128x128xf32, #tpu.memory_space<vmem>>, vector<128x128xf32>,
    %c0_162 = arith.constant 0 : index
    %c6_163 = arith.constant 6 : index
    %c0_164 = arith.constant 0 : index
    %123 = vector.load %arg17[%c0_162, %c6_163, %c0_164] : memref<2x70x128xbf16, #tpu.memory_space<vmem>>, vector<2x64x128xbf16>
    %124 = vector.shape_cast %123 : vector<2x64x128xbf16> to vector<128x128xbf16>
    %c6_165 = arith.constant 6 : index
    %c0_166 = arith.constant 0 : index
    %c0_167 = arith.constant 0 : index
    %125 = vector.load %arg5[%c6_165, %c0_166, %c0_167] : memref<7x128x128xbf16, #tpu.memory_space<vmem>>, vector<1x128x128xbf16>
    %126 = vector.shape_cast %125 : vector<1x128x128xbf16> to vector<128x128xbf16>
    %cst_168 = arith.constant dense<0.000000e+00> : vector<128x128xf32>
    %127 = tpu.matmul %124, %126, %cst_168 {dimension_numbers = #tpu.dot_dimension_numbers<[1], [0], [0], [1], [0, 0, 1, 1], [], []>} : vector<128x128xbf16>, vector<128x128xbf16>, vector<128x128xf32> -> vector<128x128xf32>
    %c0_169 = arith.constant 0 : index
    %c0_170 = arith.constant 0 : index
    %128 = vector.load %arg18[%c0_169, %c0_170] : memref<128x128xf32, #tpu.memory_space<vmem>>, vector<128x128xf32>
    %129 = arith.addf %128, %127 : vector<128x128xf32>
    %c0_171 = arith.constant 0 : index
    %c0_172 = arith.constant 0 : index
    %130 = vector.load %arg18[%c0_171, %c0_172] : memref<128x128xf32, #tpu.memory_space<vmem>>, vector<128x128xf32>
    tpu.vector_store %arg18[%c0_171, %c0_172], %129 {strides = array<i32>} : memref<128x128xf32, #tpu.memory_space<vmem>>, vector<128x128xf32>,
    %c0_173 = arith.constant 0 : index
    %c0_174 = arith.constant 0 : index
    %131 = vector.load %arg18[%c0_173, %c0_174] : memref<128x128xf32, #tpu.memory_space<vmem>>, vector<128x128xf32>
    %c0_175 = arith.constant 0 : index
    %c0_176 = arith.constant 0 : index
    %132 = vector.load %arg6[%c0_175, %c0_176] : memref<1x128xf32, #tpu.memory_space<vmem>>, vector<1x128xf32>
    %133 = vector.broadcast %132 : vector<1x128xf32> to vector<128x128xf32>
    %134 = arith.mulf %131, %133 : vector<128x128xf32>
    %c0_177 = arith.constant 0 : index
    %c0_178 = arith.constant 0 : index
    %135 = vector.load %arg7[%c0_177, %c0_178] : memref<1x128xf32, #tpu.memory_space<vmem>>, vector<1x128xf32>
    %136 = vector.broadcast %135 : vector<1x128xf32> to vector<128x128xf32>
    %137 = arith.addf %134, %136 : vector<128x128xf32>
    %138 = vector.shape_cast %137 : vector<128x128xf32> to vector<2x64x128xf32>
    %cst_179 = arith.constant dense<0.000000e+00> : vector<2x128xf32>
    %139 = vector.multi_reduction <add>, %138, %cst_179 [1] : vector<2x64x128xf32> to vector<2x128xf32>
    %cst_180 = arith.constant 6.400000e+01 : f32
    %140 = vector.broadcast %cst_180 : f32 to vector<2x128xf32>
    %141 = arith.divf %139, %140 : vector<2x128xf32>
    %142 = arith.truncf %141 : vector<2x128xf32> to vector<2x128xbf16>
    %c0_181 = arith.constant 0 : index
    %c0_182 = arith.constant 0 : index
    %143 = vector.load %arg8[%c0_181, %c0_182] : memref<128x8xbf16, #tpu.memory_space<vmem>>, vector<128x8xbf16>
    %cst_183 = arith.constant dense<0.000000e+00> : vector<2x8xf32>
    %144 = tpu.matmul %142, %143, %cst_183 {dimension_numbers = #tpu.dot_dimension_numbers<[1], [0], [0], [1], [0, 0, 1, 1], [], []>} : vector<2x128xbf16>, vector<128x8xbf16>, vector<2x8xf32> -> vector<2x8xf32>
    %c0_184 = arith.constant 0 : index
    %c0_185 = arith.constant 0 : index
    %145 = vector.load %arg9[%c0_184, %c0_185] : memref<1x8xf32, #tpu.memory_space<vmem>>, vector<1x8xf32>
    %146 = vector.broadcast %145 : vector<1x8xf32> to vector<2x8xf32>
    %147 = arith.addf %144, %146 : vector<2x8xf32>
    %cst_186 = arith.constant 0.000000e+00 : f32
    %148 = vector.broadcast %cst_186 : f32 to vector<2x8xf32>
    %149 = arith.maximumf %147, %148 : vector<2x8xf32>
    %150 = arith.truncf %149 : vector<2x8xf32> to vector<2x8xbf16>
    %c0_187 = arith.constant 0 : index
    %c0_188 = arith.constant 0 : index
    %151 = vector.load %arg10[%c0_187, %c0_188] : memref<8x128xbf16, #tpu.memory_space<vmem>>, vector<8x128xbf16>
    %cst_189 = arith.constant dense<0.000000e+00> : vector<2x128xf32>
    %152 = tpu.matmul %150, %151, %cst_189 {dimension_numbers = #tpu.dot_dimension_numbers<[1], [0], [0], [1], [0, 0, 1, 1], [], []>} : vector<2x8xbf16>, vector<8x128xbf16>, vector<2x128xf32> -> vector<2x128xf32>
    %c0_190 = arith.constant 0 : index
    %c0_191 = arith.constant 0 : index
    %153 = vector.load %arg11[%c0_190, %c0_191] : memref<1x128xf32, #tpu.memory_space<vmem>>, vector<1x128xf32>
    %154 = vector.broadcast %153 : vector<1x128xf32> to vector<2x128xf32>
    %155 = arith.addf %152, %154 : vector<2x128xf32>
    %cst_192 = arith.constant 0.000000e+00 : f32
    %156 = vector.broadcast %cst_192 : f32 to vector<2x128xf32>
    %157 = arith.subf %156, %155 : vector<2x128xf32>
    %158 = math.exp %157 : vector<2x128xf32>
    %cst_193 = arith.constant 1.000000e+00 : f32
    %159 = vector.broadcast %cst_193 : f32 to vector<2x128xf32>
    %160 = arith.addf %159, %158 : vector<2x128xf32>
    %161 = tpu.reciprocal %160 {approx = true} : vector<2x128xf32> -> vector<2x128xf32>
    %162 = vector.shape_cast %161 : vector<2x128xf32> to vector<2x1x128xf32>
    %163 = vector.broadcast %162 : vector<2x1x128xf32> to vector<2x64x128xf32>
    %164 = arith.mulf %138, %163 : vector<2x64x128xf32>
    %c0_194 = arith.constant 0 : index
    %c0_195 = arith.constant 0 : index
    %c0_196 = arith.constant 0 : index
    %165 = vector.load %arg1[%c0_194, %c0_195, %c0_196] : memref<2x64x64xf32, #tpu.memory_space<vmem>>, vector<2x64x64xf32>
    %166 = arith.truncf %165 : vector<2x64x64xf32> to vector<2x64x64xbf16>
    %167 = vector.shape_cast %166 : vector<2x64x64xbf16> to vector<128x64xbf16>
    %c0_197 = arith.constant 0 : index
    %c0_198 = arith.constant 0 : index
    %168 = vector.load %arg12[%c0_197, %c0_198] : memref<64x128xbf16, #tpu.memory_space<vmem>>, vector<64x128xbf16>
    %cst_199 = arith.constant dense<0.000000e+00> : vector<128x128xf32>
    %169 = tpu.matmul %167, %168, %cst_199 {dimension_numbers = #tpu.dot_dimension_numbers<[1], [0], [0], [1], [0, 0, 1, 1], [], []>} : vector<128x64xbf16>, vector<64x128xbf16>, vector<128x128xf32> -> vector<128x128xf32>
    %c0_200 = arith.constant 0 : index
    %c0_201 = arith.constant 0 : index
    %170 = vector.load %arg13[%c0_200, %c0_201] : memref<1x128xf32, #tpu.memory_space<vmem>>, vector<1x128xf32>
    %171 = vector.broadcast %170 : vector<1x128xf32> to vector<128x128xf32>
    %172 = arith.mulf %169, %171 : vector<128x128xf32>
    %c0_202 = arith.constant 0 : index
    %c0_203 = arith.constant 0 : index
    %173 = vector.load %arg14[%c0_202, %c0_203] : memref<1x128xf32, #tpu.memory_space<vmem>>, vector<1x128xf32>
    %174 = vector.broadcast %173 : vector<1x128xf32> to vector<128x128xf32>
    %175 = arith.addf %172, %174 : vector<128x128xf32>
    %176 = vector.shape_cast %175 : vector<128x128xf32> to vector<2x64x128xf32>
    %177 = arith.addf %164, %176 : vector<2x64x128xf32>
    %cst_204 = arith.constant 0.000000e+00 : f32
    %178 = vector.broadcast %cst_204 : f32 to vector<2x64x128xf32>
    %179 = arith.maximumf %177, %178 : vector<2x64x128xf32>
    %c0_205 = arith.constant 0 : index
    %c0_206 = arith.constant 0 : index
    %c0_207 = arith.constant 0 : index
    %180 = vector.load %arg15[%c0_205, %c0_206, %c0_207] : memref<2x64x128xf32, #tpu.memory_space<vmem>>, vector<2x64x128xf32>
    tpu.vector_store %arg15[%c0_205, %c0_206, %c0_207], %179 {strides = array<i32>} : memref<2x64x128xf32, #tpu.memory_space<vmem>>, vector<2x64x128xf32>,
    return
  }
  func.func @transform_0(%arg0: i32) -> (i32, i32, i32) {
    %c0_i32 = arith.constant 0 : i32
    %c0_i32_0 = arith.constant 0 : i32
    %c0_i32_1 = arith.constant 0 : i32
    return %arg0, %c0_i32, %c0_i32_0 : i32, i32, i32
  }
  func.func @transform_1(%arg0: i32) -> (i32, i32, i32) {
    %c0_i32 = arith.constant 0 : i32
    %c0_i32_0 = arith.constant 0 : i32
    %c0_i32_1 = arith.constant 0 : i32
    %c0_i32_2 = arith.constant 0 : i32
    return %c0_i32, %c0_i32_0, %c0_i32_1 : i32, i32, i32
  }
  func.func @transform_2(%arg0: i32) -> (i32, i32) {
    %c0_i32 = arith.constant 0 : i32
    %c0_i32_0 = arith.constant 0 : i32
    %c0_i32_1 = arith.constant 0 : i32
    return %c0_i32, %c0_i32_0 : i32, i32
  }
  func.func @transform_3(%arg0: i32) -> (i32, i32) {
    %c0_i32 = arith.constant 0 : i32
    %c0_i32_0 = arith.constant 0 : i32
    %c0_i32_1 = arith.constant 0 : i32
    return %c0_i32, %c0_i32_0 : i32, i32
  }
  func.func @transform_4(%arg0: i32) -> (i32, i32, i32) {
    %c0_i32 = arith.constant 0 : i32
    %c0_i32_0 = arith.constant 0 : i32
    %c0_i32_1 = arith.constant 0 : i32
    %c0_i32_2 = arith.constant 0 : i32
    return %c0_i32, %c0_i32_0, %c0_i32_1 : i32, i32, i32
  }
  func.func @transform_5(%arg0: i32) -> (i32, i32) {
    %c0_i32 = arith.constant 0 : i32
    %c0_i32_0 = arith.constant 0 : i32
    %c0_i32_1 = arith.constant 0 : i32
    return %c0_i32, %c0_i32_0 : i32, i32
  }
  func.func @transform_6(%arg0: i32) -> (i32, i32) {
    %c0_i32 = arith.constant 0 : i32
    %c0_i32_0 = arith.constant 0 : i32
    %c0_i32_1 = arith.constant 0 : i32
    return %c0_i32, %c0_i32_0 : i32, i32
  }
  func.func @transform_7(%arg0: i32) -> (i32, i32) {
    %c0_i32 = arith.constant 0 : i32
    %c0_i32_0 = arith.constant 0 : i32
    %c0_i32_1 = arith.constant 0 : i32
    return %c0_i32, %c0_i32_0 : i32, i32
  }
  func.func @transform_8(%arg0: i32) -> (i32, i32) {
    %c0_i32 = arith.constant 0 : i32
    %c0_i32_0 = arith.constant 0 : i32
    %c0_i32_1 = arith.constant 0 : i32
    return %c0_i32, %c0_i32_0 : i32, i32
  }
  func.func @transform_9(%arg0: i32) -> (i32, i32) {
    %c0_i32 = arith.constant 0 : i32
    %c0_i32_0 = arith.constant 0 : i32
    %c0_i32_1 = arith.constant 0 : i32
    return %c0_i32, %c0_i32_0 : i32, i32
  }
  func.func @transform_10(%arg0: i32) -> (i32, i32) {
    %c0_i32 = arith.constant 0 : i32
    %c0_i32_0 = arith.constant 0 : i32
    %c0_i32_1 = arith.constant 0 : i32
    return %c0_i32, %c0_i32_0 : i32, i32
  }
  func.func @transform_11(%arg0: i32) -> (i32, i32) {
    %c0_i32 = arith.constant 0 : i32
    %c0_i32_0 = arith.constant 0 : i32
    %c0_i32_1 = arith.constant 0 : i32
    return %c0_i32, %c0_i32_0 : i32, i32
  }
  func.func @transform_12(%arg0: i32) -> (i32, i32) {
    %c0_i32 = arith.constant 0 : i32
    %c0_i32_0 = arith.constant 0 : i32
    %c0_i32_1 = arith.constant 0 : i32
    return %c0_i32, %c0_i32_0 : i32, i32
  }
  func.func @transform_13(%arg0: i32) -> (i32, i32) {
    %c0_i32 = arith.constant 0 : i32
    %c0_i32_0 = arith.constant 0 : i32
    %c0_i32_1 = arith.constant 0 : i32
    return %c0_i32, %c0_i32_0 : i32, i32
  }
  func.func @transform_14(%arg0: i32) -> (i32, i32, i32) {
    %c0_i32 = arith.constant 0 : i32
    %c0_i32_0 = arith.constant 0 : i32
    %c0_i32_1 = arith.constant 0 : i32
    return %arg0, %c0_i32, %c0_i32_0 : i32, i32, i32
  }
}

</mosaic_0001>

<bundles_post_ra>
// kernel: residual_block.1
= control target key start
LH: loop header
LB: loop body
LE: loop exit
PB: predicated region body
PF: predicated region fallthrough
CT: control target
= control target key end

     0   :  { %s8926_s0 = inlined_call_operand.vmem [shape: f32[4,64,64], index: 0, kind: input, shape index: {}]   ;;  %s8927_s1 = inlined_call_operand.vmem [shape: bf16[7,64,128], index: 1, kind: input, shape index: {}]   ;;  %s8928_s2 = inlined_call_operand.vmem [shape: f32[1,128], index: 2, kind: input, shape index: {}]   ;;  %s8929_s3 = inlined_call_operand.vmem [shape: f32[1,128], index: 3, kind: input, shape index: {}]   ;;  %s8930_s4 = inlined_call_operand.vmem [shape: bf16[7,128,128], index: 4, kind: input, shape index: {}]   ;;  %s8931_s5 = inlined_call_operand.vmem [shape: f32[1,128], index: 5, kind: input, shape index: {}]   ;;  %s8932_s6 = inlined_call_operand.vmem [shape: f32[1,128], index: 6, kind: input, shape index: {}]   ;;  %s8933_s7 = inlined_call_operand.vmem [shape: bf16[128,8], index: 7, kind: input, shape index: {}]   ;;  %s8934_s8 = inlined_call_operand.vmem [shape: f32[1,8], index: 8, kind: input, shape index: {}]   ;;  %s8935_s9 = inlined_call_operand.vmem [shape: bf16[8,128], index: 9, kind: input, shape index: {}]   ;;  %s8936_s10 = inlined_call_operand.vmem [shape: f32[1,128], index: 10, kind: input, shape index: {}]   ;;  %s8937_s11 = inlined_call_operand.vmem [shape: bf16[64,128], index: 11, kind: input, shape index: {}]   ;;  %s8938_s12 = inlined_call_operand.vmem [shape: f32[1,128], index: 12, kind: input, shape index: {}]   ;;  %s8939_s13 = inlined_call_operand.vmem [shape: f32[1,128], index: 13, kind: input, shape index: {}]   ;;  %s8940_s14 = inlined_call_operand.hbm [shape: f32[4,64,128], index: 14, kind: output, shape index: {}]  }
   0x1   :  { %8945 = sst [smem:[#allocation12_spill]] %s8926_s0 }
   0x2   :  { %19 = vsyncpa [#allocation6], 0 }
   0x3   :  { %21 = vsyncpa [#allocation6 + $0x1], 0  ;;  %s6910_s29 = smov 0   ;;  %s6912_s30 = smov 0  }
   0x4   :  { %s6914_s15 = smov 0   ;;  %s6916_s16 = smov 0  }
   0x5 LB: > { %8946 = sst [smem:[#allocation8_spill]] %s6826_s15  ;;  %s6931_s17 = sadd.s32 4294967295, %s6830_s16   ;;  %s6830_s16 = sphi %s6916_s16, %s8978_s16   ;;  %s6826_s15 = sphi %s6914_s15, %s8980_s15   ;;  %s6822_s30 = sphi %s6912_s30, %s8982_s30   ;;  %s6818_s29 = sphi %s6910_s29, %s8981_s29  }
   0x6   : > { %s5900_s18 = sadd.s32 4294967294, %s6830_s16   ;;  %s6935_s19 = sadd.s32 1, %s6830_s16  }
   0x7   : > { %8947 = sst [smem:[#allocation9_spill]] %s6935_s19  ;;  %s333_s20 = sadd.s32 1, %s6826_s15 }
   0x8   : > { %s330_s21 = ssub.s32 %s6830_s16, %s6935_s19  ;;  %p343_p0 = scmp.ne.s32.totalorder %s6826_s15, %s6822_s30 }
   0x9   : > { %p331_p1 = scmp.eq.s32.totalorder %s330_s21, 0  ;;  %p344_p2 = scmp.eq.s32.totalorder %s6931_s17, 1 }
   0xa   : > { %p349_p3 = scmp.ne.s32.totalorder %s6822_s30, %s6818_s29  ;;  %p350_p4 = scmp.eq.s32.totalorder %s5900_s18, 1 }
   0xb   : > { %s6946_s22 = scalar_select %p331_p1, %s6826_s15, %s333_s20  }
   0xc   : > { %p6948_p5 = por %p344_p2, %p343_p0  ;;  %p6952_p6 = por %p350_p4, %p349_p3 }
   0xd   : > { %8948 = sst [smem:[#allocation10_spill]] %s6946_s22  ;;  %p5903_p7 = scmp.ge.s32.totalorder %s6830_s16, 1 }
   0xe   : > { %s8950_s24 = scalar_select %p6952_p6, 1, 0 }
   0xf   : > { %p417_p8 = scmp.lt.s32.totalorder %s6830_s16, 3 }
  0x10   : > { %8951 = sst [smem:[#allocation11_spill]] %s8950_s24 }
  0x11   : > { %p418_p9 = pnand %p5903_p7, %p417_p8 }
  0x12   : > { %s5905_s18 = sshll.u32 (!%p418_p9), %s6931_s17, 1  ;;  %s8956_s0 = sld [smem:[#allocation12_spill]] (!%p418_p9) }
  0x13   : > { %421 = sbr.rel (%p418_p9) target bundleno = 1098 (0x44a), region = 76  ;;  %p465_p10 = scmp.lt.s32.totalorder (!%p418_p9), %s5905_s18, 3 }
  0x14   : > { %s461_s26 = sand.u32 (!%p418_p9), 1, %s6822_s30   ;;  %s6697_s20 = sshll.u32 (!%p418_p9), %s6931_s17, 7 }
  0x15   : > { %s5822_s22 = scalar_lea.sflag (!%p418_p9), [#allocation6], %s461_s26  ;;  %s6788_s17 = scalar_lea.hbm (!%p418_p9), %s8940_s14, 256 }
  0x18   : > { %v6595_v0 = vld [vmem:[%s8927_s1 + $0x18] sm:$0xff]  ;;  %vm473_vm0 = vcmask 517120   ;;  %vm482_vm1 = vcmask 518145   ;;  %vm474_vm2 = vsmask.f32 1280  ;;  %v6594_v3 = vld [vmem:[%s8927_s1 + $0x10] sm:$0xff] }
  0x19   : > { %v6964_v1 = vld [vmem:[%s8927_s1 + $0x58] sm:$0xff]  ;;  %863 = vmatpush.bf16.msra.mxu0 %v6595_v0  ;;  %6698 = vmatpush.bf16.msra.mxu3 %v6595_v0  ;;  %vm6976_vm3 = vmand %vm473_vm0, %vm474_vm2  ;;  %v476_v5 = vld [vmem:[#allocation2] sm:$0x3]  ;;  %vm483_vm4 = vsmask.f32 7942  ;;  %s8984_s18 = smov (!%p465_p10, %s5905_s18), 3 }
  0x1a   : > { %v6970_v2 = vld [vmem:[%s8927_s1 + $0x38] sm:$0xff]  ;;  %1465 = vmatpush.bf16.msra.mxu2 %v6964_v1  ;;  %v6985_v6 = vld [vmem:[%s8927_s1 + $0x50] sm:$0xff]  ;;  %v477_v7 = vsel %vm6976_vm3, 0, %v476_v5  ;;  %vm6991_vm5 = vmand %vm482_vm1, %vm483_vm4  ;;  %s6583_s27 = sshll.u32 %s8984_s18, 6  ;;  %vm717_vm6 = vcmask 519169   ;;  %vm722_vm10 = vcmask 519168  }
  0x1b   : > { %1198 = vmatpush.bf16.msra.mxu1 %v6970_v2  ;;  %v488_v9 = vld [vmem:[#allocation2 + $0x44] sm:$0x6]  ;;  %478 = vst [vmem:[#allocation2] sm:$0x3] %v477_v7  ;;  %v7000_v11 = vld [vmem:[%s8927_s1 + $0x30] sm:$0xff]  ;;  %v6593_v12 = vld [vmem:[%s8927_s1 + $0x8] sm:$0xff]  ;;  %s7013_s24 = scalar_lea.vmem %s8956_s0, %s6583_s27 }
  0x1c   : > { %v489_v10 = vsel %vm6991_vm5, 0, %v488_v9  ;;  %v7008_v13 = vld [vmem:[%s8927_s1 + $0x48] sm:$0xff]  ;;  %v507_v15 = vld [vmem:[%s7013_s24] sm:$0xff]  ;;  %v521_v21 = vld [vmem:[%s7013_s24 + $0x70] sm:$0xff]  ;;  %vm539_vm7 = vsmask.f32 5392 }
  0x1d   : > { %490 = vst [vmem:[#allocation2 + $0x44] sm:$0x6] %v489_v10  ;;  %864 = vmatpush.bf16.msra.mxu0 %v6594_v3  ;;  %6699 = vmatpush.bf16.msra.mxu3 %v6594_v3  ;;  %v7018_v14 = vld [vmem:[%s8927_s1 + $0x28] sm:$0xff]  ;;  %v519_v17 = vld [vmem:[%s7013_s24 + $0x60] sm:$0xff]  ;;  %v523_v18 = vpack.c.bf16 %v507_v15, %v507_v15  ;;  %v522_v22 = vld [vmem:[%s7013_s24 + $0x78] sm:$0xff]  ;;  %v537_v25 = vpack.c.bf16 %v521_v21, %v521_v21  ;;  %vm834_vm11 = vcmask 523264  }
  0x1e   : > { %1466 = vmatpush.bf16.msra.mxu2 %v6985_v6  ;;  %v508_v16 = vld [vmem:[%s7013_s24 + $0x8] sm:$0xff]  ;;  %v535_v23 = vpack.c.bf16 %v519_v17, %v519_v17  ;;  %v538_v26 = vpack.c.bf16 %v522_v22, %v522_v22  ;;  %v6592_v27 = vld [vmem:[%s8927_s1] sm:$0xff]  ;;  %v6611_v38 = vld [vmem:[%s8927_s1 + $0x98] sm:$0xff]  ;;  %vm1327_vm12 = vcmask 1042432   ;;  %vm1328_vm13 = vcmask 1046532   ;;  %s5904_s27 = sshll.u32 %s461_s26, 7 }
  0x1f   : > { %1199 = vmatpush.bf16.msra.mxu1 %v7000_v11  ;;  %v524_v19 = vpack.c.bf16 %v508_v16, %v508_v16  ;;  %v520_v20 = vld [vmem:[%s7013_s24 + $0x68] sm:$0xff]  ;;  %v542_v28 = vshrl.u32 %v523_v18, 16  ;;  %v545_v29 = vshll.u32 %v523_v18, 16  ;;  %v7034_v32 = vld [vmem:[%s8927_s1 + $0x40] sm:$0xff]  ;;  %vm7048_vm8 = vmand %vm717_vm6, %vm483_vm4  ;;  %v680_v53 = vshrl.u32 %v537_v25, 16  ;;  %s8865_s28 = scalar_lea.vmem [#allocation5], %s5904_s27 }
  0x20   : > { %v536_v24 = vpack.c.bf16 %v520_v20, %v520_v20  ;;  %v660_v33 = vshrl.u32 %v535_v23, 16  ;;  %v663_v34 = vshll.u32 %v535_v23, 16  ;;  %v7041_v37 = vld [vmem:[%s8927_s1 + $0x20] sm:$0xff]  ;;  %v6615_v49 = vld [vmem:[%s8927_s1 + $0xb8] sm:$0xff]  ;;  %vm7057_vm9 = vmor %vm474_vm2, %vm539_vm7  ;;  %v683_v54 = vshll.u32 %v537_v25, 16  ;;  %s5835_s15 = sshll.u32 %s8865_s28, 4  ;;  %s5836_s15 = int_to_ptr.vmem [resolvable:$true] %s5835_s15 }
  0x21   : > { %865 = vmatpush.bf16.msra.mxu0 %v6593_v12  ;;  %6700 = vmatpush.bf16.msra.mxu3 %v6593_v12  ;;  %v551_v30 = vshrl.u32 %v524_v19, 16  ;;  %v554_v31 = vshll.u32 %v524_v19, 16  ;;  %v544_v39 = vrot.slane %v542_v28, 6  ;;  %v547_v40 = vrot.slane %v545_v29, 7  ;;  %v509_v59 = vld [vmem:[%s7013_s24 + $0x10] sm:$0xff]  ;;  %v510_v60 = vld [vmem:[%s7013_s24 + $0x18] sm:$0xff]  ;;  %vm7099_vm0 = vmor %vm1327_vm12, %vm1328_vm13 }
  0x22   : > { %v670_v35 = vshrl.u32 %v536_v24, 16  ;;  %v673_v36 = vshll.u32 %v536_v24, 16  ;;  %1467 = vmatpush.bf16.msra.mxu2 %v7008_v13  ;;  %v719_v43 = vld [vmem:[#allocation2] sm:$0xe]  ;;  %v662_v45 = vrot.slane %v660_v33, 6  ;;  %v665_v46 = vrot.slane %v663_v34, 7 }
  0x23   : > { %1200 = vmatpush.bf16.msra.mxu1 %v7018_v14  ;;  %v553_v41 = vrot.slane %v551_v30, 6  ;;  %v556_v42 = vrot.slane %v554_v31, 7  ;;  %v548_v51 = vor.u32 %v547_v40, %v544_v39  ;;  %v690_v57 = vshrl.u32 %v538_v26, 16  ;;  %v511_v0 = vld [vmem:[%s7013_s24 + $0x20] sm:$0xff] }
  0x24   : > { %v672_v47 = vrot.slane %v670_v35, 6  ;;  %v675_v48 = vrot.slane %v673_v36, 7  ;;  %v7063_v55 = vor.u32 %v665_v46, %v662_v45  ;;  %v693_v58 = vshll.u32 %v538_v26, 16  ;;  %v743_v26 = vld [vmem:[#allocation2 + $0x44] sm:$0x3] }
  0x25   : > { %866 = vmatpush.bf16.msra.mxu0 %v6592_v27  ;;  %6701 = vmatpush.bf16.msra.mxu3 %v6592_v27  ;;  %v7061_v52 = vor.u32 %v556_v42, %v553_v41  ;;  %v549_v61 = vrot.slane %v548_v51, 4  ;;  %v720_v62 = vsel %vm7048_vm8, %v548_v51, %v719_v43  ;;  %v682_v63 = vrot.slane %v680_v53, 6 }
  0x26   : > { %v676_v56 = vor.u32 %v675_v48, %v672_v47  ;;  %1468 = vmatpush.bf16.msra.mxu2 %v7034_v32  ;;  %721 = vst [vmem:[#allocation2] sm:$0xe] %v720_v62  ;;  %v668_v3 = vrot.slane %v7063_v55, 4  ;;  %v692_v7 = vrot.slane %v690_v57, 6  ;;  %v695_v10 = vrot.slane %v693_v58, 7  ;;  %v512_v62 = vld [vmem:[%s7013_s24 + $0x28] sm:$0xff] }
  0x27   : > { %1201 = vmatpush.bf16.msra.mxu1 %v7041_v37  ;;  %v558_v9 = vsel %vm7057_vm9, %v549_v61, %v7061_v52  ;;  %v525_v12 = vpack.c.bf16 %v509_v59, %v509_v59  ;;  %v526_v15 = vpack.c.bf16 %v510_v60, %v510_v60  ;;  %v559_v16 = vrot.slane %v7061_v52, 4  ;;  %v6619_v61 = vld [vmem:[%s8927_s1 + $0xd8] sm:$0xff] }
  0x28   : > { %v678_v5 = vrot.slane %v676_v56, 4  ;;  %723 = vst.msk [vmem:[#allocation2 + $0x4] sm:$0xf] %vm722_vm10, %v558_v9  ;;  %v677_v17 = vsel %vm7057_vm9, %v668_v3, %v676_v56  ;;  %v527_v19 = vpack.c.bf16 %v511_v0, %v511_v0  ;;  %v696_v20 = vor.u32 %v695_v10, %v692_v7 }
  0x29   : > { %6702 = vmatpush.bf16.msrb.mxu3 %v6970_v2  ;;  %2106 = vmatpush.bf16.msrb.mxu0 %v6611_v38  ;;  %v685_v2 = vrot.slane %v683_v54, 7  ;;  %740 = vst.msk [vmem:[#allocation2 + $0x38] sm:$0xf] %vm722_vm10, %v677_v17  ;;  %v561_v21 = vshrl.u32 %v525_v12, 16  ;;  %v564_v22 = vshll.u32 %v525_v12, 16  ;;  %v571_v23 = vshrl.u32 %v526_v15, 16 }
  0x2a   : > { %vm942_vm14 = vsmask.f32 3328  ;;  %v574_v27 = vshll.u32 %v526_v15, 16  ;;  %v581_v28 = vshrl.u32 %v527_v19, 16  ;;  %v698_v29 = vrot.slane %v696_v20, 4  ;;  %2745 = vmatpush.bf16.msrb.mxu2 %v6619_v61 }
  0x2b   : > { %2478 = vmatpush.bf16.msrb.mxu1 %v6615_v49  ;;  %v686_v18 = vor.u32 %v685_v2, %v682_v63  ;;  %v563_v30 = vrot.slane %v561_v21, 6  ;;  %v573_v31 = vrot.slane %v571_v23, 6  ;;  %vm943_vm15 = vsmask.f32 7440 }
  0x2c   : > { %v576_v34 = vrot.slane %v574_v27, 7  ;;  %v584_v35 = vshll.u32 %v527_v19, 16  ;;  %v744_v36 = vsel %vm6976_vm3, %v698_v29, %v743_v26  ;;  %v583_v45 = vrot.slane %v581_v28, 6  ;;  %vm7114_vm1 = vmor %vm942_vm14, %vm943_vm15  ;;  %v518_v28 = vld [vmem:[%s7013_s24 + $0x58] sm:$0xff] }
  0x2d   : > { %6703 = vmatpush.bf16.msrb.mxu3 %v7000_v11  ;;  %v687_v24 = vsel %vm7057_vm9, %v678_v5, %v686_v18  ;;  %v688_v25 = vrot.slane %v686_v18, 4  ;;  %v566_v11 = vrot.slane %v564_v22, 7  ;;  %v1291_v39 = vld [vmem:[#allocation2] sm:$0xe]  ;;  %745 = vst [vmem:[#allocation2 + $0x44] sm:$0x3] %v744_v36  ;;  %v7120_v18 = vpack.c.bf16 %v512_v62, %v512_v62 }
  0x2e   : > { %741 = vst.msk [vmem:[#allocation2 + $0x3c] sm:$0xf] %vm722_vm10, %v687_v24  ;;  %v924_v40 = vld [vmem:[#allocation2] sm:$0xf]  ;;  %v577_v43 = vor.u32 %v576_v34, %v573_v31  ;;  %v5996_v51 = vrot.slane %v1291_v39, 9  ;;  %v586_v60 = vrot.slane %v584_v35, 7 }
  0x2f   : > { %v697_v33 = vsel %vm7057_vm9, %v688_v25, %v696_v20  ;;  %v567_v38 = vor.u32 %v566_v11, %v563_v30  ;;  %v946_v41 = vshrl.u32 %v924_v40, 16  ;;  %v949_v42 = vshll.u32 %v924_v40, 16  ;;  %v6584_v46 = vld [vmem:[#allocation2] sm:$0xff] }
  0x30   : > { %742 = vst.msk [vmem:[#allocation2 + $0x40] sm:$0xf] %vm722_vm10, %v697_v33  ;;  %v1292_v47 = vld [vmem:[#allocation2 + $0x4] sm:$0xf]  ;;  %5956 = vmatmul.msk.bf16.vlgmr.msra.gmra.mxu0 %vm834_vm11, %v6584_v46  ;;  %v579_v0 = vrot.slane %v577_v43, 4  ;;  %v7118_v17 = vor.u32 %v586_v60, %v583_v45  ;;  %v534_v45 = vpack.c.bf16 %v518_v28, %v518_v28  ;;  %v6610_v60 = vld [vmem:[%s8927_s1 + $0x90] sm:$0xff] }
  0x31   : > { %6704 = vmatpush.bf16.msrb.mxu3 %v7018_v14  ;;  %v568_v14 = vsel %vm7057_vm9, %v559_v16, %v567_v38  ;;  %v925_v48 = vld [vmem:[#allocation2 + $0x4] sm:$0xf]  ;;  %v569_v49 = vrot.slane %v567_v38, 4  ;;  %v948_v52 = vrot.slane %v946_v41, 4  ;;  %v951_v53 = vrot.slane %v949_v42, 5  ;;  %2107 = vmatpush.bf16.msrb.mxu0 %v6610_v60 }
  0x32   : > { %724 = vst.msk [vmem:[#allocation2 + $0x8] sm:$0xf] %vm722_vm10, %v568_v14  ;;  %v955_v54 = vshll.u32 %v925_v48, 16  ;;  %v1332_v57 = vrot.slane %v1292_v47, 5  ;;  %v959_v58 = vshrl.u32 %v925_v48, 16  ;;  %v588_v27 = vsel %vm7057_vm9, %v579_v0, %v7118_v17 }
  0x33   : > { %v578_v59 = vsel %vm7057_vm9, %v569_v49, %v577_v43  ;;  %726 = vst.msk [vmem:[#allocation2 + $0x10] sm:$0xf] %vm722_vm10, %v588_v27  ;;  %v591_v43 = vshrl.u32 %v7120_v18, 16  ;;  %v594_v0 = vshll.u32 %v7120_v18, 16  ;;  %v650_v28 = vshrl.u32 %v534_v45, 16 }
  0x34   : > { %v957_v63 = vrot.slane %v955_v54, 5  ;;  %725 = vst.msk [vmem:[#allocation2 + $0xc] sm:$0xf] %vm722_vm10, %v578_v59  ;;  %v961_v5 = vrot.slane %v959_v58, 4  ;;  %v1333_v10 = vsel %vm7099_vm0, %v5996_v51, %v1332_v57  ;;  %v941_v20 = vld [vmem:[#allocation2 + $0x44] sm:$0x1] }
  0x35   : > { %6705 = vmatpush.bf16.msrb.mxu3 %v7041_v37  ;;  %v952_v37 = vor.u32 %v951_v53, %v948_v52  ;;  %v939_v3 = vld [vmem:[#allocation2 + $0x3c] sm:$0xf]  ;;  %v1334_v24 = vrot.slane %v1332_v57, 4  ;;  %v1109_v26 = vshll.u32 %v941_v20, 16  ;;  %v1389_v40 = vunpack.c.l.b16 %v1333_v10  ;;  %v485_v60 = vld [vmem:[#allocation2 + $0x20] sm:$0x6] }
  0x36   : > { %v1089_v2 = vshll.u32 %v939_v3, 16  ;;  %v1093_v7 = vshrl.u32 %v939_v3, 16  ;;  %v962_v19 = vor.u32 %v961_v5, %v957_v63  ;;  %v593_v20 = vrot.slane %v591_v43, 6 }
  0x37   : > { %v6591_v9 = vld [vmem:[#allocation2 + $0x3c] sm:$0xff]  ;;  %v953_v15 = vrot.slane %v952_v37, 4  ;;  %v1111_v48 = vrot.slane %v1109_v26, 5  ;;  %vm2607_vm7 = vcmask 1040384   ;;  %vm491_vm12 = vcmask 1041408  }
  0x38   : > { %v940_v16 = vld [vmem:[#allocation2 + $0x40] sm:$0xf]  ;;  %v7122_v21 = vrot.slane %v1089_v2, 5  ;;  %v1095_v22 = vrot.slane %v1093_v7, 4  ;;  %5963 = vmatmul.msk.bf16.vlgmr.msra.gmra.mxu3 %vm834_vm11, %v6591_v9  ;;  %v963_v31 = vrot.slane %v962_v19, 4  ;;  %v513_v7 = vld [vmem:[%s7013_s24 + $0x30] sm:$0xff]  ;;  %vm7757_vm15 = vmand %vm491_vm12, %vm474_vm2 }
  0x39   : > { %v1099_v23 = vshll.u32 %v940_v16, 16  ;;  %v1103_v25 = vshrl.u32 %v940_v16, 16  ;;  %v1293_v29 = vld [vmem:[#allocation2 + $0x8] sm:$0xf]  ;;  %v958_v11 = vsel %vm7114_vm1, %v953_v15, %v957_v63  ;;  %6706 = vmatpush.bf16.msra.mxu3 %v6964_v1  ;;  %vm1969_vm13 = vcmask 1045508  }
  0x3a   : > { %v926_v30 = vld [vmem:[#allocation2 + $0x8] sm:$0xf]  ;;  %v1096_v33 = vor.u32 %v1095_v22, %v7122_v21  ;;  %v1335_v35 = vrot.slane %v1293_v29, 5  ;;  %v1122_v51 = vunpack.c.l.b16 %v958_v11  ;;  %v7150_v15 = vld [vmem:[#allocation2 + $0x10] sm:$0xf]  ;;  %v653_v11 = vshll.u32 %v534_v45, 16  ;;  %vm7383_vm14 = vmor %vm491_vm12, %vm1969_vm13 }
  0x3b   : > { %v1101_v34 = vrot.slane %v1099_v23, 5  ;;  %v965_v36 = vshll.u32 %v926_v30, 16  ;;  %v969_v38 = vshrl.u32 %v926_v30, 16  ;;  %v1105_v39 = vrot.slane %v1103_v25, 4  ;;  %v1294_v42 = vld [vmem:[#allocation2 + $0xc] sm:$0xf] }
  0x3c   : > { %v1097_v41 = vrot.slane %v1096_v33, 4  ;;  %v1336_v46 = vsel %vm7099_vm0, %v1334_v24, %v1335_v35  ;;  %v927_v49 = vld [vmem:[#allocation2 + $0xc] sm:$0xf]  ;;  %v1338_v58 = vrot.slane %v1294_v42, 5  ;;  %v1337_v63 = vrot.slane %v1335_v35, 4  ;;  %v6614_v25 = vld [vmem:[%s8927_s1 + $0xb0] sm:$0xff] }
  0x3d   : > { %v967_v14 = vrot.slane %v965_v36, 5  ;;  %v1106_v47 = vor.u32 %v1105_v39, %v1101_v34  ;;  %v1390_v1 = vunpack.c.l.b16 %v1336_v46  ;;  %6707 = vmatpush.bf16.msra.mxu3 %v6985_v6  ;;  %v971_v53 = vrot.slane %v969_v38, 4  ;;  %v6585_v37 = vld [vmem:[#allocation2 + $0x8] sm:$0xff]  ;;  %v928_v16 = vld [vmem:[#allocation2 + $0x10] sm:$0xf]  ;;  %2479 = vmatpush.bf16.msrb.mxu1 %v6614_v25  ;;  %v514_v42 = vld [vmem:[%s7013_s24 + $0x38] sm:$0xff] }
  0x3e   : > { %v1102_v52 = vsel %vm7114_vm1, %v1097_v41, %v1101_v34  ;;  %v975_v59 = vshll.u32 %v927_v49, 16  ;;  %v979_v19 = vshrl.u32 %v927_v49, 16  ;;  %v1340_v18 = vrot.slane %v1338_v58, 4  ;;  %v6618_v29 = vld [vmem:[%s8927_s1 + $0xd0] sm:$0xff]  ;;  %v7172_v41 = vld [vmem:[#allocation2 + $0x38] sm:$0xf] }
  0x3f   : > { %v968_v54 = vsel %vm7114_vm1, %v963_v31, %v967_v14  ;;  %v1107_v57 = vrot.slane %v1106_v47, 4  ;;  %v1405_v61 = vpack.c.b16 %v1390_v1, %v1389_v40  ;;  %v1136_v3 = vunpack.c.l.b16 %v1102_v52  ;;  %2746 = vmatpush.bf16.msrb.mxu2 %v6618_v29 }
  0x40   : > { %v1123_v62 = vunpack.c.l.b16 %v968_v54  ;;  %v972_v5 = vor.u32 %v971_v53, %v967_v14  ;;  %v977_v2 = vrot.slane %v975_v59, 5  ;;  %v1341_v22 = vrot.slane %v7150_v15, 5  ;;  %5957 = vmatmul.msk.bf16.gmra.mxu0 %vm834_vm11, %v6585_v37 }
  0x41   : > { %v1112_v6 = vsel %vm7114_vm1, %v1107_v57, %v1111_v48  ;;  %6022 = vmatmul.msk.bf16.vlgmr.msra.gmra.mxu2 %vm834_vm11, %v1405_v61  ;;  %6708 = vmatpush.bf16.msra.mxu3 %v7008_v13  ;;  %v985_v23 = vshll.u32 %v928_v16, 16  ;;  %v589_v24 = vrot.slane %v7118_v17, 4  ;;  %v981_v27 = vrot.slane %v979_v19, 4  ;;  %v7195_v19 = vld [vmem:[#allocation2 + $0x40] sm:$0xf] }
  0x42   : > { %v1138_v9 = vpack.c.b16 %v1123_v62, %v1122_v51  ;;  %v1137_v10 = vunpack.c.l.b16 %v1112_v6  ;;  %v973_v26 = vrot.slane %v972_v5, 4  ;;  %v596_v13 = vrot.slane %v594_v0, 7  ;;  %v1306_v51 = vld [vmem:[#allocation2 + $0x3c] sm:$0xf]  ;;  %v479_v0 = vld [vmem:[#allocation2 + $0x24] sm:$0x3] }
  0x43   : > { %v529_v17 = vpack.c.bf16 %v513_v7, %v513_v7  ;;  %v1339_v31 = vsel %vm7099_vm0, %v1337_v63, %v1338_v58  ;;  %v982_v33 = vor.u32 %v981_v27, %v977_v2  ;;  %v7165_v34 = vrot.slane %v985_v23, 5  ;;  %v7201_v23 = vld [vmem:[#allocation2 + $0x44] sm:$0x1] }
  0x44   : > { %5988 = vmatmul.msk.bf16.vlgmr.msra.gmra.mxu1 %vm834_vm11, %v1138_v9  ;;  %v1145_v30 = vpack.c.b16 %v1137_v10, %v1136_v3  ;;  %v597_v35 = vor.u32 %v596_v13, %v593_v20  ;;  %v1342_v36 = vsel %vm7099_vm0, %v1340_v18, %v1341_v22  ;;  %v989_v38 = vshrl.u32 %v928_v16, 16  ;;  %v6607_v20 = vld [vmem:[%s8927_s1 + $0x78] sm:$0xff] }
  0x45   : > { %6709 = vmatpush.bf16.msra.mxu3 %v7034_v32  ;;  %v652_v39 = vrot.slane %v650_v28, 6  ;;  %v655_v40 = vrot.slane %v653_v11, 7  ;;  %v978_v43 = vsel %vm7114_vm1, %v973_v26, %v977_v2  ;;  %v983_v45 = vrot.slane %v982_v33, 4  ;;  %v515_v2 = vld [vmem:[%s7013_s24 + $0x40] sm:$0xff]  ;;  %v516_v26 = vld [vmem:[%s7013_s24 + $0x48] sm:$0xff] }
  0x46   : > { %v598_v32 = vsel %vm7057_vm9, %v589_v24, %v597_v35  ;;  %v1391_v46 = vunpack.c.l.b16 %v1339_v31  ;;  %v601_v47 = vshrl.u32 %v529_v17, 16  ;;  %v604_v48 = vshll.u32 %v529_v17, 16 }
  0x47   : > { %727 = vst.msk [vmem:[#allocation2 + $0x14] sm:$0xf] %vm722_vm10, %v598_v32  ;;  %v7181_v14 = vor.u32 %v655_v40, %v652_v39  ;;  %v1392_v49 = vunpack.c.l.b16 %v1342_v36  ;;  %v988_v1 = vsel %vm7114_vm1, %v983_v45, %v7165_v34  ;;  %v1369_v52 = vrot.slane %v7172_v41, 5 }
  0x48   : > { %5995 = vmatmul.msk.bf16.vlgmr.msrb.gmra.mxu3 %vm834_vm11, %v1145_v30  ;;  %v530_v53 = vpack.c.bf16 %v514_v42, %v514_v42  ;;  %v1124_v54 = vunpack.c.l.b16 %v978_v43  ;;  %v603_v58 = vrot.slane %v601_v47, 6  ;;  %v991_v59 = vrot.slane %v989_v38, 4 }
  0x49   : > { %v658_v57 = vrot.slane %v7181_v14, 4  ;;  %v1125_v61 = vunpack.c.l.b16 %v988_v1  ;;  %v599_v62 = vrot.slane %v597_v35, 4  ;;  %v606_v37 = vrot.slane %v604_v48, 7  ;;  %1840 = vmatpush.bf16.msrb.mxu3 %v6607_v20  ;;  %v6606_v35 = vld [vmem:[%s8927_s1 + $0x70] sm:$0xff] }
  0x4a   : > { %v611_v63 = vshrl.u32 %v530_v53, 16  ;;  %v1372_v3 = vrot.slane %v1306_v51, 5  ;;  %v614_v5 = vshll.u32 %v530_v53, 16  ;;  %v1406_v7 = vpack.c.b16 %v1392_v49, %v1391_v46  ;;  %v6605_v53 = vld [vmem:[%s8927_s1 + $0x68] sm:$0xff] }
  0x4b   : > { %v667_v6 = vsel %vm7057_vm9, %v658_v57, %v7063_v55  ;;  %v1371_v9 = vrot.slane %v1369_v52, 4  ;;  %v607_v10 = vor.u32 %v606_v37, %v603_v58  ;;  %v992_v55 = vor.u32 %v991_v59, %v7165_v34  ;;  %v6604_v37 = vld [vmem:[%s8927_s1 + $0x60] sm:$0xff] }
  0x4c   : > { %739 = vst.msk [vmem:[#allocation2 + $0x34] sm:$0xf] %vm722_vm10, %v667_v6  ;;  %v613_v16 = vrot.slane %v611_v63, 6  ;;  %v616_v18 = vrot.slane %v614_v5, 7  ;;  %v486_v24 = vsel %vm6991_vm5, 0, %v485_v60  ;;  %v480_v25 = vsel %vm6976_vm3, 0, %v479_v0 }
  0x4d   : > { %v1139_v27 = vpack.c.b16 %v1125_v61, %v1124_v54  ;;  %v608_v28 = vsel %vm7057_vm9, %v599_v62, %v607_v10  ;;  %v609_v11 = vrot.slane %v607_v10, 4  ;;  %v531_v17 = vpack.c.bf16 %v515_v2, %v515_v2  ;;  %487 = vst [vmem:[#allocation2 + $0x20] sm:$0x6] %v486_v24  ;;  %1841 = vmatpush.bf16.msrb.mxu3 %v6606_v35 }
  0x4e   : > { %v6586_v13 = vld [vmem:[#allocation2 + $0x10] sm:$0xff]  ;;  %728 = vst.msk [vmem:[#allocation2 + $0x18] sm:$0xf] %vm722_vm10, %v608_v28  ;;  %v1343_v8 = vrot.slane %v1341_v22, 4  ;;  %v617_v34 = vor.u32 %v616_v18, %v613_v16  ;;  %v1373_v36 = vsel %vm7099_vm0, %v1371_v9, %v1372_v3  ;;  %v532_v38 = vpack.c.bf16 %v516_v26, %v516_v26 }
  0x4f   : > { %v1296_v29 = vld [vmem:[#allocation2 + $0x14] sm:$0xf]  ;;  %v621_v39 = vshrl.u32 %v531_v17, 16  ;;  %v1375_v15 = vrot.slane %v7195_v19, 5  ;;  %481 = vst [vmem:[#allocation2 + $0x24] sm:$0x3] %v480_v25  ;;  %v1402_v48 = vunpack.c.l.b16 %v1373_v36 }
  0x50   : > { %v929_v30 = vld [vmem:[#allocation2 + $0x14] sm:$0xf]  ;;  %v1344_v40 = vrot.slane %v1296_v29, 5  ;;  %5958 = vmatmul.msk.bf16.gmra.mxu0 %vm834_vm11, %v6586_v13  ;;  %v993_v22 = vrot.slane %v992_v55, 4  ;;  %v618_v45 = vsel %vm7057_vm9, %v609_v11, %v617_v34  ;;  %v1374_v32 = vrot.slane %v1372_v3, 4 }
  0x51   : > { %v995_v31 = vshll.u32 %v929_v30, 16  ;;  %v999_v33 = vshrl.u32 %v929_v30, 16  ;;  %6023 = vmatmul.msk.bf16.gmra.mxu2 %vm834_vm11, %v1406_v7  ;;  %v1378_v46 = vrot.slane %v7201_v23, 5  ;;  %v619_v51 = vrot.slane %v617_v34, 4  ;;  %729 = vst.msk [vmem:[#allocation2 + $0x1c] sm:$0xf] %vm722_vm10, %v618_v45  ;;  %1842 = vmatpush.bf16.msrb.mxu3 %v6605_v53 }
  0x52   : > { %v1345_v49 = vsel %vm7099_vm0, %v1343_v8, %v1344_v40  ;;  %v623_v57 = vrot.slane %v621_v39, 6  ;;  %v624_v58 = vshll.u32 %v531_v17, 16  ;;  %v630_v59 = vshrl.u32 %v532_v38, 16  ;;  %v6613_v45 = vld [vmem:[%s8927_s1 + $0xa8] sm:$0xff] }
  0x53   : > { %v997_v42 = vrot.slane %v995_v31, 5  ;;  %v1001_v43 = vrot.slane %v999_v33, 4  ;;  %v7225_v47 = vld [vmem:[#allocation2 + $0x34] sm:$0xf]  ;;  %v1346_v60 = vrot.slane %v1344_v40, 4  ;;  %v1377_v62 = vrot.slane %v1375_v15, 4  ;;  %2480 = vmatpush.bf16.msrb.mxu1 %v6613_v45 }
  0x54   : > { %5989 = vmatmul.msk.bf16.gmra.mxu1 %vm834_vm11, %v1139_v27  ;;  %v1366_v54 = vrot.slane %v7225_v47, 5  ;;  %v633_v63 = vshll.u32 %v532_v38, 16  ;;  %v1393_v3 = vunpack.c.l.b16 %v1345_v49  ;;  %v626_v7 = vrot.slane %v624_v58, 7  ;;  %v730_v20 = vld [vmem:[#allocation2 + $0x20] sm:$0x3] }
  0x55   : > { %v1002_v1 = vor.u32 %v1001_v43, %v997_v42  ;;  %v1297_v6 = vld [vmem:[#allocation2 + $0x18] sm:$0xf]  ;;  %v998_v2 = vsel %vm7114_vm1, %v993_v22, %v997_v42  ;;  %v632_v55 = vrot.slane %v630_v59, 6  ;;  %v731_v24 = vsel %vm6976_vm3, %v619_v51, %v730_v20  ;;  %1843 = vmatpush.bf16.msrb.mxu3 %v6604_v37  ;;  %v1558_v40 = vld [vmem:[#allocation2] sm:$0xe]  ;;  %v6609_v22 = vld [vmem:[%s8927_s1 + $0x88] sm:$0xff] }
  0x56   : > { %v1368_v0 = vrot.slane %v1366_v54, 4  ;;  %v930_v5 = vld [vmem:[#allocation2 + $0x18] sm:$0xf]  ;;  %v1347_v9 = vrot.slane %v1297_v6, 5  ;;  %v627_v25 = vor.u32 %v626_v7, %v623_v57  ;;  %v635_v26 = vrot.slane %v633_v63, 7  ;;  %2108 = vmatpush.bf16.msrb.mxu0 %v6609_v22 }
  0x57   : > { %v1003_v61 = vrot.slane %v1002_v1, 4  ;;  %v1005_v10 = vshll.u32 %v930_v5, 16  ;;  %v1009_v16 = vshrl.u32 %v930_v5, 16  ;;  %v733_v27 = vld [vmem:[#allocation2 + $0x24] sm:$0xe]  ;;  %v1126_v30 = vunpack.c.l.b16 %v998_v2 }
  0x58   : > { %v1370_v18 = vsel %vm7099_vm0, %v1368_v0, %v1369_v52  ;;  %v1348_v28 = vsel %vm7099_vm0, %v1346_v60, %v1347_v9  ;;  %732 = vst [vmem:[#allocation2 + $0x20] sm:$0x3] %v731_v24  ;;  %v1298_v17 = vld [vmem:[#allocation2 + $0x1c] sm:$0xf]  ;;  %v7251_v31 = vor.u32 %v635_v26, %v632_v55  ;;  %v734_v4 = vsel %vm7048_vm8, %v627_v25, %v733_v27  ;;  %v1559_v58 = vld [vmem:[#allocation2 + $0x4] sm:$0xf] }
  0x59   : > { %v1401_v13 = vunpack.c.l.b16 %v1370_v18  ;;  %v1007_v29 = vrot.slane %v1005_v10, 5  ;;  %v1394_v11 = vunpack.c.l.b16 %v1348_v28  ;;  %v931_v8 = vld [vmem:[#allocation2 + $0x1c] sm:$0xf]  ;;  %v1011_v41 = vrot.slane %v1009_v16, 4  ;;  %735 = vst [vmem:[#allocation2 + $0x24] sm:$0xe] %v734_v4 }
  0x5a   : > { %v1350_v34 = vrot.slane %v1298_v17, 5  ;;  %v1015_v35 = vshll.u32 %v931_v8, 16  ;;  %v1019_v39 = vshrl.u32 %v931_v8, 16  ;;  %v1376_v44 = vsel %vm7099_vm0, %v1374_v32, %v1375_v15  ;;  %v6587_v49 = vld [vmem:[#allocation2 + $0x18] sm:$0xff]  ;;  %v517_v32 = vld [vmem:[%s7013_s24 + $0x50] sm:$0xff] }
  0x5b   : > { %v1411_v52 = vpack.c.b16 %v1402_v48, %v1401_v13  ;;  %v1008_v33 = vsel %vm7114_vm1, %v1003_v61, %v1007_v29  ;;  %v1407_v36 = vpack.c.b16 %v1394_v11, %v1393_v3  ;;  %v628_v43 = vrot.slane %v627_v25, 4  ;;  %v1560_v0 = vld [vmem:[#allocation2 + $0x8] sm:$0xf] }
  0x5c   : > { %v1127_v38 = vunpack.c.l.b16 %v1008_v33  ;;  %v7262_v42 = vrot.slane %v1015_v35, 5  ;;  %v1379_v19 = vsel %vm7099_vm0, %v1377_v62, %v1378_v46  ;;  %v1012_v1 = vor.u32 %v1011_v41, %v1007_v29  ;;  %v6617_v3 = vld [vmem:[%s8927_s1 + $0xc8] sm:$0xff] }
  0x5d   : > { %6028 = vmatmul.msk.bf16.vlgmr.msra.gmra.mxu3 %vm834_vm11, %v1411_v52  ;;  %v1021_v15 = vrot.slane %v1019_v39, 4  ;;  %v1349_v51 = vrot.slane %v1347_v9, 4  ;;  %v1352_v53 = vrot.slane %v1350_v34, 4  ;;  %v637_v57 = vsel %vm7057_vm9, %v628_v43, %v7251_v31  ;;  %2747 = vmatpush.bf16.msrb.mxu2 %v6617_v3 }
  0x5e   : > { %v1140_v48 = vpack.c.b16 %v1127_v38, %v1126_v30  ;;  %v1580_v59 = vshrl.u32 %v1558_v40, 16  ;;  %v1403_v60 = vunpack.c.l.b16 %v1376_v44  ;;  %736 = vst.msk [vmem:[#allocation2 + $0x28] sm:$0xf] %vm722_vm10, %v637_v57  ;;  %v1404_v62 = vunpack.c.l.b16 %v1379_v19 }
  0x5f   : > { %v1299_v23 = vld [vmem:[#allocation2 + $0x20] sm:$0x1]  ;;  %v1022_v46 = vor.u32 %v1021_v15, %v7262_v42  ;;  %v533_v6 = vpack.c.bf16 %v517_v32, %v517_v32  ;;  %v1013_v5 = vrot.slane %v1012_v1, 4  ;;  %v1583_v2 = vshll.u32 %v1558_v40, 16 }
  0x60   : > { %v932_v61 = vld [vmem:[#allocation2 + $0x20] sm:$0x1]  ;;  %v1353_v37 = vrot.slane %v1299_v23, 5  ;;  %5959 = vmatmul.msk.bf16.gmra.mxu0 %vm834_vm11, %v6587_v49  ;;  %v1589_v7 = vshrl.u32 %v1559_v58, 16  ;;  %v1592_v9 = vshll.u32 %v1559_v58, 16  ;;  %v1351_v10 = vsel %vm7099_vm0, %v1349_v51, %v1350_v34 }
  0x61   : > { %6024 = vmatmul.msk.bf16.gmra.mxu2 %vm834_vm11, %v1407_v36  ;;  %v1025_v63 = vshll.u32 %v932_v61, 16  ;;  %v1023_v16 = vrot.slane %v1022_v46, 4  ;;  %v1582_v55 = vrot.slane %v1580_v59, 5  ;;  %v1585_v24 = vrot.slane %v1583_v2, 6  ;;  %v933_v17 = vld [vmem:[#allocation2 + $0x24] sm:$0xf] }
  0x62   : > { %v1354_v18 = vsel %vm7099_vm0, %v1352_v53, %v1353_v37  ;;  %v1599_v25 = vshrl.u32 %v1560_v0, 16  ;;  %v1602_v26 = vshll.u32 %v1560_v0, 16  ;;  %v1591_v27 = vrot.slane %v1589_v7, 5  ;;  %v1300_v1 = vld [vmem:[#allocation2 + $0x24] sm:$0xe] }
  0x63   : > { %v1027_v20 = vrot.slane %v1025_v63, 5  ;;  %v1594_v13 = vrot.slane %v1592_v9, 6  ;;  %v640_v28 = vshrl.u32 %v533_v6, 16  ;;  %v1412_v29 = vpack.c.b16 %v1404_v62, %v1403_v60  ;;  %v1561_v51 = vld [vmem:[#allocation2 + $0xc] sm:$0xf] }
  0x64   : > { %5990 = vmatmul.msk.bf16.gmra.mxu1 %vm834_vm11, %v1140_v48  ;;  %v1395_v30 = vunpack.c.l.b16 %v1351_v10  ;;  %v1018_v11 = vsel %vm7114_vm1, %v1013_v5, %v7262_v42  ;;  %v1396_v8 = vunpack.c.l.b16 %v1354_v18  ;;  %v643_v52 = vshll.u32 %v533_v6, 16  ;;  %v1562_v7 = vld [vmem:[#allocation2 + $0x10] sm:$0xf] }
  0x65   : > { %v1028_v41 = vsel %vm7114_vm1, %v1023_v16, %v1027_v20  ;;  %v642_v4 = vrot.slane %v640_v28, 6  ;;  %v638_v33 = vrot.slane %v7251_v31, 4  ;;  %v1586_v34 = vor.u32 %v1585_v24, %v1582_v55  ;;  %v934_v38 = vld [vmem:[#allocation2 + $0x28] sm:$0xf]  ;;  %v6608_v16 = vld [vmem:[%s8927_s1 + $0x80] sm:$0xff] }
  0x66   : > { %v1601_v35 = vrot.slane %v1599_v25, 5  ;;  %v1604_v36 = vrot.slane %v1602_v26, 6  ;;  %v1595_v39 = vor.u32 %v1594_v13, %v1591_v27  ;;  %v645_v40 = vrot.slane %v643_v52, 7  ;;  %v1301_v59 = vld [vmem:[#allocation2 + $0x28] sm:$0xf]  ;;  %v6612_v20 = vld [vmem:[%s8927_s1 + $0xa0] sm:$0xff]  ;;  %2109 = vmatpush.bf16.msrb.mxu0 %v6608_v16 }
  0x67   : > { %v1030_v44 = vshrl.u32 %v933_v17, 16  ;;  %v1033_v43 = vshll.u32 %v933_v17, 16  ;;  %v1128_v22 = vunpack.c.l.b16 %v1018_v11  ;;  %v1129_v45 = vunpack.c.l.b16 %v1028_v41  ;;  %v6588_v61 = vld [vmem:[#allocation2 + $0x24] sm:$0xff]  ;;  %2481 = vmatpush.bf16.msrb.mxu1 %v6612_v20 }
  0x68   : > { %v1039_v42 = vshll.u32 %v934_v38, 16  ;;  %v1408_v48 = vpack.c.b16 %v1396_v8, %v1395_v30  ;;  %vm1576_vm3 = vsmask.f32 2304  ;;  %vm1577_vm5 = vsmask.f32 6416  ;;  %v6616_v55 = vld [vmem:[%s8927_s1 + $0xc0] sm:$0xff] }
  0x69   : > { %v646_v49 = vor.u32 %v645_v40, %v642_v4  ;;  %v7296_v19 = vor.u32 %v1604_v36, %v1601_v35  ;;  %v1032_v15 = vrot.slane %v1030_v44, 4  ;;  %v1035_v31 = vrot.slane %v1033_v43, 5  ;;  %vm7303_vm6 = vmor %vm1576_vm3, %vm1577_vm5  ;;  %2748 = vmatpush.bf16.msrb.mxu2 %v6616_v55 }
  0x6a   : > { %v1043_v32 = vshrl.u32 %v934_v38, 16  ;;  %v1587_v53 = vrot.slane %v1586_v34, 4  ;;  %v1597_v57 = vrot.slane %v1595_v39, 4  ;;  %v1141_v23 = vpack.c.b16 %v1129_v45, %v1128_v22  ;;  %v937_v22 = vld [vmem:[#allocation2 + $0x34] sm:$0xf] }
  0x6b   : > { %v647_v58 = vsel %vm7057_vm9, %v638_v33, %v646_v49  ;;  %v648_v60 = vrot.slane %v646_v49, 4  ;;  %v1041_v62 = vrot.slane %v1039_v42, 5  ;;  %v1036_v63 = vor.u32 %v1035_v31, %v1032_v15  ;;  %v1563_v31 = vld [vmem:[#allocation2 + $0x14] sm:$0xf] }
  0x6c   : > { %737 = vst.msk [vmem:[#allocation2 + $0x2c] sm:$0xf] %vm722_vm10, %v647_v58  ;;  %v1045_v37 = vrot.slane %v1043_v32, 4  ;;  %v1357_v6 = vrot.slane %v1301_v59, 5  ;;  %v1596_v3 = vsel %vm7303_vm6, %v1587_v53, %v1595_v39  ;;  %v1606_v5 = vsel %vm7303_vm6, %v1597_v57, %v7296_v19 }
  0x6d   : > { %6029 = vmatmul.msk.bf16.gmra.mxu3 %vm834_vm11, %v1412_v29  ;;  %v657_v0 = vsel %vm7057_vm9, %v648_v60, %v7181_v14  ;;  %v5997_v2 = vrot.slane %v1300_v1, 9  ;;  %v1609_v9 = vshrl.u32 %v1561_v51, 16  ;;  %v1612_v10 = vshll.u32 %v1561_v51, 16 }
  0x6e   : > { %738 = vst.msk [vmem:[#allocation2 + $0x30] sm:$0xf] %vm722_vm10, %v657_v0  ;;  %v1046_v14 = vor.u32 %v1045_v37, %v1041_v62  ;;  %v1037_v18 = vrot.slane %v1036_v63, 4  ;;  %v1764_v24 = vunpack.c.l.b16 %v1596_v3  ;;  %v1765_v25 = vunpack.c.l.b16 %v1606_v5 }
  0x6f   : > { %v1359_v26 = vrot.slane %v1357_v6, 4  ;;  %v1619_v27 = vshrl.u32 %v1562_v7, 16  ;;  %v1358_v28 = vsel %vm7099_vm0, %v5997_v2, %v1357_v6  ;;  %v1611_v30 = vrot.slane %v1609_v9, 5  ;;  %v1564_v2 = vld [vmem:[#allocation2 + $0x18] sm:$0xf] }
  0x70   : > { %5960 = vmatmul.msk.bf16.gmra.mxu0 %vm834_vm11, %v6588_v61  ;;  %v1622_v11 = vshll.u32 %v1562_v7, 16  ;;  %v1047_v8 = vrot.slane %v1046_v14, 4  ;;  %v1614_v4 = vrot.slane %v1612_v10, 6  ;;  %v1042_v52 = vsel %vm7114_vm1, %v1037_v18, %v1041_v62  ;;  %v938_v14 = vld [vmem:[#allocation2 + $0x38] sm:$0xf] }
  0x71   : > { %6025 = vmatmul.msk.bf16.gmra.mxu2 %vm834_vm11, %v1408_v48  ;;  %v1780_v35 = vpack.c.b16 %v1765_v25, %v1764_v24  ;;  %v1397_v38 = vunpack.c.l.b16 %v1358_v28  ;;  %v1621_v44 = vrot.slane %v1619_v27, 5  ;;  %v1130_v48 = vunpack.c.l.b16 %v1042_v52 }
  0x72   : > { %v1624_v43 = vrot.slane %v1622_v11, 6  ;;  %v1615_v49 = vor.u32 %v1614_v4, %v1611_v30  ;;  %v1069_v59 = vshll.u32 %v937_v22, 16  ;;  %v1607_v60 = vrot.slane %v7296_v19, 4 }
  0x73   : > { %v1302_v13 = vld [vmem:[#allocation2 + $0x2c] sm:$0xf]  ;;  %v1629_v61 = vshrl.u32 %v1563_v31, 16  ;;  %v1632_v6 = vshll.u32 %v1563_v31, 16  ;;  %v1073_v9 = vshrl.u32 %v937_v22, 16  ;;  %v1639_v24 = vshrl.u32 %v1564_v2, 16 }
  0x74   : > { %5991 = vmatmul.msk.bf16.gmra.mxu1 %vm834_vm11, %v1141_v23  ;;  %v935_v29 = vld [vmem:[#allocation2 + $0x2c] sm:$0xf]  ;;  %v1360_v17 = vrot.slane %v1302_v13, 5  ;;  %v1617_v63 = vrot.slane %v1615_v49, 4  ;;  %v1625_v0 = vor.u32 %v1624_v43, %v1621_v44  ;;  %v1071_v7 = vrot.slane %v1069_v59, 5 }
  0x75   : > { %v1049_v41 = vshll.u32 %v935_v29, 16  ;;  %v1053_v33 = vshrl.u32 %v935_v29, 16  ;;  %v936_v34 = vld [vmem:[#allocation2 + $0x30] sm:$0xf]  ;;  %v1616_v10 = vsel %vm7303_vm6, %v1607_v60, %v1615_v49  ;;  %v1631_v20 = vrot.slane %v1629_v61, 5  ;;  %v6590_v60 = vld [vmem:[#allocation2 + $0x34] sm:$0xff] }
  0x76   : > { %v1361_v36 = vsel %vm7099_vm0, %v1359_v26, %v1360_v17  ;;  %v1059_v45 = vshll.u32 %v936_v34, 16  ;;  %v1303_v1 = vld [vmem:[#allocation2 + $0x30] sm:$0xf]  ;;  %v1063_v15 = vshrl.u32 %v936_v34, 16  ;;  %v1362_v16 = vrot.slane %v1360_v17, 4 }
  0x77   : > { %v1051_v39 = vrot.slane %v1049_v41, 5  ;;  %v1398_v40 = vunpack.c.l.b16 %v1361_v36  ;;  %v1055_v51 = vrot.slane %v1053_v33, 4  ;;  %v1363_v23 = vrot.slane %v1303_v1, 5  ;;  %v6589_v37 = vld [vmem:[#allocation2 + $0x2c] sm:$0xff]  ;;  %v2572_v43 = vld [vmem:[#allocation2 + $0x4] sm:$0xf] }
  0x78   : > { %v1061_v57 = vrot.slane %v1059_v45, 5  ;;  %v1065_v58 = vrot.slane %v1063_v15, 4  ;;  %v1626_v55 = vsel %vm7303_vm6, %v1617_v63, %v1625_v0  ;;  %v1634_v18 = vrot.slane %v1632_v6, 6  ;;  %v2571_v1 = vld [vmem:[#allocation2] sm:$0x8] }
  0x79   : > { %v1052_v42 = vsel %vm7114_vm1, %v1047_v8, %v1051_v39  ;;  %v1409_v53 = vpack.c.b16 %v1398_v40, %v1397_v38  ;;  %v1056_v3 = vor.u32 %v1055_v51, %v1051_v39  ;;  %v1365_v19 = vrot.slane %v1363_v23, 4  ;;  %v1934_v15 = vld [vmem:[#allocation2 + $0x4] sm:$0xf] }
  0x7a   : > { %v1131_v32 = vunpack.c.l.b16 %v1052_v42  ;;  %v1066_v5 = vor.u32 %v1065_v58, %v1061_v57  ;;  %v1642_v25 = vshll.u32 %v1564_v2, 16  ;;  %v1079_v13 = vshll.u32 %v938_v14, 16 }
  0x7b   : > { %v1057_v26 = vrot.slane %v1056_v3, 4  ;;  %v1083_v28 = vshrl.u32 %v938_v14, 16  ;;  %v1766_v29 = vunpack.c.l.b16 %v1616_v10  ;;  %v1767_v30 = vunpack.c.l.b16 %v1626_v55  ;;  %v7371_v3 = vld [vmem:[#allocation2 + $0x8] sm:$0xf] }
  0x7c   : > { %v1142_v62 = vpack.c.b16 %v1131_v32, %v1130_v48  ;;  %v1067_v27 = vrot.slane %v1066_v5, 4  ;;  %v1364_v11 = vsel %vm7099_vm0, %v1362_v16, %v1363_v23  ;;  %v1367_v17 = vsel %vm7099_vm0, %v1365_v19, %v1366_v54  ;;  %v1565_v48 = vld [vmem:[#allocation2 + $0x1c] sm:$0xf]  ;;  %v2199_v19 = vld [vmem:[#allocation2] sm:$0xc] }
  0x7d   : > { %6054 = vmatmul.msk.bf16.vlgmr.msrb.gmra.mxu3 %vm834_vm11, %v1780_v35  ;;  %v1075_v8 = vrot.slane %v1073_v9, 4  ;;  %v1635_v41 = vor.u32 %v1634_v18, %v1631_v20  ;;  %v1641_v4 = vrot.slane %v1639_v24, 5  ;;  %v1644_v52 = vrot.slane %v1642_v25, 6  ;;  %v2200_v20 = vld [vmem:[#allocation2 + $0x4] sm:$0xf] }
  0x7e   : > { %v1062_v33 = vsel %vm7114_vm1, %v1057_v26, %v1061_v57  ;;  %v1072_v34 = vsel %vm7114_vm1, %v1067_v27, %v1071_v7  ;;  %v1081_v35 = vrot.slane %v1079_v13, 5  ;;  %v1085_v36 = vrot.slane %v1083_v28, 4  ;;  %v7361_v57 = vld [vmem:[#allocation2 + $0x8] sm:$0xf] }
  0x7f   : > { %v1399_v38 = vunpack.c.l.b16 %v1364_v11  ;;  %v1400_v39 = vunpack.c.l.b16 %v1367_v17  ;;  %v1781_v40 = vpack.c.b16 %v1767_v30, %v1766_v29  ;;  %v1627_v44 = vrot.slane %v1625_v0, 4 }
  0x80   : > { %5961 = vmatmul.msk.bf16.gmra.mxu0 %vm834_vm11, %v6589_v37  ;;  %v1076_v47 = vor.u32 %v1075_v8, %v1071_v7  ;;  %v1132_v22 = vunpack.c.l.b16 %v1062_v33  ;;  %v1133_v54 = vunpack.c.l.b16 %v1072_v34  ;;  %v1637_v45 = vrot.slane %v1635_v41, 4  ;;  %v1566_v7 = vld [vmem:[#allocation2 + $0x20] sm:$0x3] }
  0x81   : > { %6026 = vmatmul.msk.bf16.gmra.mxu2 %vm834_vm11, %v1409_v53  ;;  %v7356_v42 = vor.u32 %v1644_v52, %v1641_v4  ;;  %v1086_v49 = vor.u32 %v1085_v36, %v1081_v35  ;;  %v1410_v31 = vpack.c.b16 %v1400_v39, %v1399_v38  ;;  %vm2608_vm8 = vcmask 1044484   ;;  %v2201_v36 = vld [vmem:[#allocation2 + $0x8] sm:$0xf] }
  0x82   : > { %v2612_v32 = vrot.slane %v2572_v43, 7  ;;  %v1636_v51 = vsel %vm7303_vm6, %v1627_v44, %v1635_v41  ;;  %v1077_v53 = vrot.slane %v1076_v47, 4  ;;  %v1649_v58 = vshrl.u32 %v1565_v48, 16  ;;  %vm7367_vm10 = vmor %vm2607_vm7, %vm2608_vm8  ;;  %v2574_v47 = vld [vmem:[#allocation2 + $0xc] sm:$0xf] }
  0x83   : > { %v1143_v59 = vpack.c.b16 %v1133_v54, %v1132_v22  ;;  %v1646_v23 = vsel %vm7303_vm6, %v1637_v45, %v7356_v42  ;;  %v6128_v61 = vrot.slane %v2571_v1, 11  ;;  %v1973_v37 = vrot.slane %v1934_v15, 6 }
  0x84   : > { %5992 = vmatmul.msk.bf16.gmra.mxu1 %vm834_vm11, %v1142_v62  ;;  %v1933_v62 = vld [vmem:[#allocation2] sm:$0xc]  ;;  %v1087_v63 = vrot.slane %v1086_v49, 4  ;;  %v1652_v6 = vshll.u32 %v1565_v48, 16  ;;  %v2614_v5 = vrot.slane %v2612_v32, 4  ;;  %v2615_v2 = vrot.slane %v7361_v57, 7 }
  0x85   : > { %v1768_v9 = vunpack.c.l.b16 %v1636_v51  ;;  %v1769_v14 = vunpack.c.l.b16 %v1646_v23  ;;  %v1082_v10 = vsel %vm7114_vm1, %v1077_v53, %v1081_v35  ;;  %v6062_v16 = vrot.slane %v1933_v62, 10 }
  0x86   : > { %v2613_v55 = vsel %vm7367_vm10, %v6128_v61, %v2612_v32  ;;  %v1651_v18 = vrot.slane %v1649_v58, 5  ;;  %v1975_v25 = vrot.slane %v1973_v37, 4  ;;  %v1976_v26 = vrot.slane %v7371_v3, 6  ;;  %v2203_v3 = vld [vmem:[#allocation2 + $0x10] sm:$0xf] }
  0x87   : > { %v1092_v27 = vsel %vm7114_vm1, %v1087_v63, %v7122_v21  ;;  %v1654_v13 = vrot.slane %v1652_v6, 6  ;;  %v1659_v28 = vshrl.u32 %v1566_v7, 16  ;;  %v1662_v29 = vshll.u32 %v1566_v7, 16  ;;  %v1936_v63 = vld [vmem:[#allocation2 + $0xc] sm:$0xf] }
  0x88   : > { %v2616_v30 = vsel %vm7367_vm10, %v2614_v5, %v2615_v2  ;;  %v2218_v11 = vshrl.u32 %v2199_v19, 16  ;;  %v2221_v17 = vshll.u32 %v2199_v19, 16  ;;  %v2227_v8 = vshrl.u32 %v2200_v20, 16 }
  0x89   : > { %v1134_v41 = vunpack.c.l.b16 %v1082_v10  ;;  %v1974_v4 = vsel %vm7383_vm14, %v6062_v16, %v1973_v37  ;;  %v2230_v52 = vshll.u32 %v2200_v20, 16  ;;  %v1782_v33 = vpack.c.b16 %v1769_v14, %v1768_v9 }
  0x8a   : > { %v1135_v34 = vunpack.c.l.b16 %v1092_v27  ;;  %v2669_v35 = vunpack.c.l.b16 %v2613_v55  ;;  %v1977_v21 = vsel %vm7383_vm14, %v1975_v25, %v1976_v26  ;;  %v2670_v38 = vunpack.c.l.b16 %v2616_v30  ;;  %v7409_v27 = vld [vmem:[#allocation2 + $0x10] sm:$0xf]  ;;  %v2202_v30 = vld [vmem:[#allocation2 + $0xc] sm:$0xf] }
  0x8b   : > { %v1655_v39 = vor.u32 %v1654_v13, %v1651_v18  ;;  %v1664_v44 = vrot.slane %v1662_v29, 6  ;;  %v2030_v43 = vunpack.c.l.b16 %v1974_v4  ;;  %v2220_v22 = vrot.slane %v2218_v11, 6  ;;  %v1569_v18 = vld [vmem:[#allocation2 + $0x2c] sm:$0xf] }
  0x8c   : > { %v2223_v54 = vrot.slane %v2221_v17, 7  ;;  %v2229_v45 = vrot.slane %v2227_v8, 6  ;;  %v2031_v48 = vunpack.c.l.b16 %v1977_v21  ;;  %v2232_v49 = vrot.slane %v2230_v52, 7 }
  0x8d   : > { %6055 = vmatmul.msk.bf16.gmra.mxu3 %vm834_vm11, %v1781_v40  ;;  %v1661_v40 = vrot.slane %v1659_v28, 5  ;;  %v2237_v1 = vshrl.u32 %v2201_v36, 16  ;;  %v2240_v15 = vshll.u32 %v2201_v36, 16  ;;  %v2618_v32 = vrot.slane %v2574_v47, 7 }
  0x8e   : > { %v1144_v51 = vpack.c.b16 %v1135_v34, %v1134_v41  ;;  %v2685_v53 = vpack.c.b16 %v2670_v38, %v2669_v35  ;;  %v1647_v57 = vrot.slane %v7356_v42, 4  ;;  %v1657_v58 = vrot.slane %v1655_v39, 4 }
  0x8f   : > { %v1665_v23 = vor.u32 %v1664_v44, %v1661_v40  ;;  %v2224_v61 = vor.u32 %v2223_v54, %v2220_v22  ;;  %v2046_v6 = vpack.c.b16 %v2031_v48, %v2030_v43  ;;  %v2233_v5 = vor.u32 %v2232_v49, %v2229_v45 }
  0x90   : > { %5962 = vmatmul.msk.bf16.gmra.mxu0 %vm834_vm11, %v6590_v60  ;;  %v1568_v60 = vld [vmem:[#allocation2 + $0x28] sm:$0xf]  ;;  %v2239_v7 = vrot.slane %v2237_v1, 6  ;;  %v2242_v9 = vrot.slane %v2240_v15, 7  ;;  %v2617_v14 = vrot.slane %v2615_v2, 4  ;;  %v2620_v10 = vrot.slane %v2618_v32, 4 }
  0x91   : > { %6027 = vmatmul.msk.bf16.gmra.mxu2 %vm834_vm11, %v1410_v31  ;;  %v1567_v31 = vld [vmem:[#allocation2 + $0x24] sm:$0xe]  ;;  %v1677_v42 = vshrl.u32 %v1568_v60, 16  ;;  %v1979_v19 = vrot.slane %v1936_v63, 6  ;;  %v1656_v20 = vsel %vm7303_vm6, %v1647_v57, %v1655_v39  ;;  %v1666_v55 = vsel %vm7303_vm6, %v1657_v58, %v1665_v23  ;;  %v1570_v57 = vld [vmem:[#allocation2 + $0x30] sm:$0xf] }
  0x92   : > { %v1668_v62 = vshrl.u32 %v1567_v31, 16  ;;  %v1671_v37 = vshll.u32 %v1567_v31, 16  ;;  %v1680_v25 = vshll.u32 %v1568_v60, 16  ;;  %v2225_v13 = vrot.slane %v2224_v61, 4 }
  0x93   : > { %v2235_v28 = vrot.slane %v2233_v5, 4  ;;  %v7411_v2 = vor.u32 %v2242_v9, %v2239_v7  ;;  %v2619_v11 = vsel %vm7367_vm10, %v2617_v14, %v2618_v32  ;;  %v1679_v41 = vrot.slane %v1677_v42, 5  ;;  %v1938_v14 = vld [vmem:[#allocation2 + $0x14] sm:$0xf] }
  0x94   : > { %5993 = vmatmul.msk.bf16.gmra.mxu1 %vm834_vm11, %v1143_v59  ;;  %v7400_v59 = vld [vmem:[#allocation2 + $0x10] sm:$0xf]  ;;  %v1670_v29 = vrot.slane %v1668_v62, 5  ;;  %v1673_v8 = vrot.slane %v1671_v37, 6  ;;  %v1687_v4 = vshrl.u32 %v1569_v18, 16  ;;  %v1978_v52 = vrot.slane %v1976_v26, 4 }
  0x95   : > { %v2621_v16 = vrot.slane %v7400_v59, 7  ;;  %v1982_v34 = vrot.slane %v7409_v27, 6  ;;  %v1682_v35 = vrot.slane %v1680_v25, 6  ;;  %v1690_v21 = vshll.u32 %v1569_v18, 16  ;;  %v2576_v62 = vld [vmem:[#allocation2 + $0x14] sm:$0xf] }
  0x96   : > { %v2247_v36 = vshrl.u32 %v2202_v30, 16  ;;  %v2250_v38 = vshll.u32 %v2202_v30, 16  ;;  %v1770_v39 = vunpack.c.l.b16 %v1656_v20  ;;  %v1771_v40 = vunpack.c.l.b16 %v1666_v55  ;;  %v7438_v18 = vld [vmem:[#allocation2 + $0x18] sm:$0xf] }
  0x97   : > { %v2622_v17 = vsel %vm7367_vm10, %v2620_v10, %v2621_v16  ;;  %v2234_v44 = vsel %vm7057_vm9, %v2225_v13, %v2233_v5  ;;  %v2244_v47 = vsel %vm7057_vm9, %v2235_v28, %v7411_v2  ;;  %v2671_v43 = vunpack.c.l.b16 %v2619_v11  ;;  %v2205_v27 = vld [vmem:[#allocation2 + $0x18] sm:$0xf] }
  0x98   : > { %v1674_v22 = vor.u32 %v1673_v8, %v1670_v29  ;;  %v2672_v26 = vunpack.c.l.b16 %v2622_v17  ;;  %v1689_v54 = vrot.slane %v1687_v4, 5  ;;  %v1980_v45 = vsel %vm7383_vm14, %v1978_v52, %v1979_v19  ;;  %v1571_v29 = vld [vmem:[#allocation2 + $0x34] sm:$0xf]  ;;  %v7449_v4 = vld [vmem:[#allocation2 + $0x18] sm:$0xf] }
  0x99   : > { %v1683_v49 = vor.u32 %v1682_v35, %v1679_v41  ;;  %v1692_v1 = vrot.slane %v1690_v21, 6  ;;  %v2249_v15 = vrot.slane %v2247_v36, 6  ;;  %v2252_v31 = vrot.slane %v2250_v38, 7  ;;  %v2204_v52 = vld [vmem:[#allocation2 + $0x14] sm:$0xf] }
  0x9a   : > { %v1783_v32 = vpack.c.b16 %v1771_v40, %v1770_v39  ;;  %v2402_v58 = vunpack.c.l.b16 %v2234_v44  ;;  %v2403_v60 = vunpack.c.l.b16 %v2244_v47  ;;  %v2032_v23 = vunpack.c.l.b16 %v1980_v45 }
  0x9b   : > { %v2686_v37 = vpack.c.b16 %v2672_v26, %v2671_v43  ;;  %v1675_v63 = vrot.slane %v1674_v22, 4  ;;  %v7435_v5 = vor.u32 %v1692_v1, %v1689_v54  ;;  %v2253_v7 = vor.u32 %v2252_v31, %v2249_v15 }
  0x9c   : > { %v1697_v9 = vshrl.u32 %v1570_v57, 16  ;;  %v2418_v20 = vpack.c.b16 %v2403_v60, %v2402_v58  ;;  %v1700_v25 = vshll.u32 %v1570_v57, 16  ;;  %v2245_v28 = vrot.slane %v7411_v2, 4 }
  0x9d   : > { %6056 = vmatmul.msk.bf16.gmra.mxu3 %vm834_vm11, %v1782_v33  ;;  %v1981_v33 = vrot.slane %v1979_v19, 4  ;;  %v2624_v19 = vrot.slane %v2576_v62, 7  ;;  %v1985_v30 = vrot.slane %v1938_v14, 6  ;;  %v1684_v11 = vsel %vm7303_vm6, %v1675_v63, %v1683_v49  ;;  %v2578_v14 = vld [vmem:[#allocation2 + $0x1c] sm:$0xf] }
  0x9e   : > { %v2255_v8 = vrot.slane %v2253_v7, 4  ;;  %v1699_v41 = vrot.slane %v1697_v9, 5  ;;  %v2623_v2 = vrot.slane %v2621_v16, 4  ;;  %v2627_v21 = vrot.slane %v7438_v18, 7  ;;  %v2206_v18 = vld [vmem:[#allocation2 + $0x1c] sm:$0xf] }
  0x9f   : > { %v1983_v48 = vsel %vm7383_vm14, %v1981_v33, %v1982_v34  ;;  %v2626_v35 = vrot.slane %v2624_v19, 4  ;;  %v1702_v36 = vrot.slane %v1700_v25, 6  ;;  %v1707_v38 = vshrl.u32 %v1571_v29, 16 }
  0xa0   : > { %6088 = vmatmul.msk.bf16.vlgmr.msrb.gmra.mxu0 %vm834_vm11, %v2046_v6  ;;  %v2033_v61 = vunpack.c.l.b16 %v1983_v48  ;;  %v1685_v6 = vrot.slane %v1683_v49, 4  ;;  %v1710_v39 = vshll.u32 %v1571_v29, 16  ;;  %v1984_v40 = vrot.slane %v1982_v34, 4 }
  0xa1   : > { %6154 = vmatmul.msk.bf16.vlgmr.msrb.gmra.mxu2 %vm834_vm11, %v2685_v53  ;;  %v2260_v53 = vshll.u32 %v2203_v3, 16  ;;  %v1987_v44 = vrot.slane %v1985_v30, 4  ;;  %v1988_v47 = vrot.slane %v7449_v4, 6  ;;  %v2267_v43 = vshrl.u32 %v2204_v52, 16 }
  0xa2   : > { %v2047_v55 = vpack.c.b16 %v2033_v61, %v2032_v23  ;;  %v1694_v17 = vsel %vm7303_vm6, %v1685_v6, %v7435_v5  ;;  %v2270_v22 = vshll.u32 %v2204_v52, 16  ;;  %v1772_v59 = vunpack.c.l.b16 %v1684_v11  ;;  %v1572_v23 = vld [vmem:[#allocation2 + $0x38] sm:$0xf]  ;;  %v2579_v52 = vld [vmem:[#allocation2 + $0x20] sm:$0x7] }
  0xa3   : > { %v2262_v42 = vrot.slane %v2260_v53, 7  ;;  %v1773_v16 = vunpack.c.l.b16 %v1694_v17  ;;  %v2625_v26 = vsel %vm7367_vm10, %v2623_v2, %v2624_v19  ;;  %v2628_v54 = vsel %vm7367_vm10, %v2626_v35, %v2627_v21  ;;  %v1573_v17 = vld [vmem:[#allocation2 + $0x3c] sm:$0xf] }
  0xa4   : > { %5994 = vmatmul.msk.bf16.gmra.mxu1 %vm834_vm11, %v1144_v51  ;;  %v2257_v51 = vshrl.u32 %v2203_v3, 16  ;;  %v2254_v3 = vsel %vm7057_vm9, %v2245_v28, %v2253_v7  ;;  %v1703_v45 = vor.u32 %v1702_v36, %v1699_v41  ;;  %v1709_v48 = vrot.slane %v1707_v38, 5 }
  0xa5   : > { %v1712_v49 = vrot.slane %v1710_v39, 6  ;;  %v1986_v15 = vsel %vm7383_vm14, %v1984_v40, %v1985_v30  ;;  %v1989_v31 = vsel %vm7383_vm14, %v1987_v44, %v1988_v47  ;;  %v2673_v53 = vunpack.c.l.b16 %v2625_v26  ;;  %v6635_v26 = vld [vmem:[%s8930_s4 + $0x38] sm:$0xff] }
  0xa6   : > { %v2259_v10 = vrot.slane %v2257_v51, 6  ;;  %v2272_v51 = vrot.slane %v2270_v22, 7  ;;  %v2674_v57 = vunpack.c.l.b16 %v2628_v54  ;;  %v2277_v58 = vshrl.u32 %v2205_v27, 16  ;;  %3258 = vmatpush.bf16.msra.mxu3 %v6635_v26 }
  0xa7   : > { %v2280_v60 = vshll.u32 %v2205_v27, 16  ;;  %v1784_v61 = vpack.c.b16 %v1773_v16, %v1772_v59  ;;  %v2404_v62 = vunpack.c.l.b16 %v2254_v3  ;;  %v1695_v6 = vrot.slane %v7435_v5, 4 }
  0xa8   : > { %v7451_v33 = vor.u32 %v2262_v42, %v2259_v10  ;;  %v2034_v7 = vunpack.c.l.b16 %v1986_v15  ;;  %v2035_v9 = vunpack.c.l.b16 %v1989_v31  ;;  %v1705_v10 = vrot.slane %v1703_v45, 4 }
  0xa9   : > { %v7483_v42 = vor.u32 %v1712_v49, %v1709_v48  ;;  %v2687_v25 = vpack.c.b16 %v2674_v57, %v2673_v53  ;;  %v2279_v28 = vrot.slane %v2277_v58, 6  ;;  %v2282_v29 = vrot.slane %v2280_v60, 7 }
  0xaa   : > { %v2264_v34 = vsel %vm7057_vm9, %v2255_v8, %v7451_v33  ;;  %v1720_v30 = vshll.u32 %v1572_v23, 16  ;;  %v2630_v11 = vrot.slane %v2578_v14, 7  ;;  %v1704_v5 = vsel %vm7303_vm6, %v1695_v6, %v1703_v45 }
  0xab   : > { %v2405_v63 = vunpack.c.l.b16 %v2264_v34  ;;  %v2048_v41 = vpack.c.b16 %v2035_v9, %v2034_v7  ;;  %v1714_v38 = vsel %vm7303_vm6, %v1705_v10, %v7483_v42  ;;  %v2265_v39 = vrot.slane %v7451_v33, 4 }
  0xac   : > { %v7496_v59 = vor.u32 %v2282_v29, %v2279_v28  ;;  %v1722_v16 = vrot.slane %v1720_v30, 6  ;;  %v1727_v3 = vshrl.u32 %v1573_v17, 16  ;;  %v2629_v54 = vrot.slane %v2627_v21, 4  ;;  %v6643_v29 = vld [vmem:[%s8930_s4 + $0x78] sm:$0xff] }
  0xad   : > { %6057 = vmatmul.msk.bf16.gmra.mxu3 %vm834_vm11, %v1783_v32  ;;  %v7440_v13 = vpop.f32.mrf.mxu0  ;;  %v2269_v32 = vrot.slane %v2267_v43, 6  ;;  %v2419_v8 = vpack.c.b16 %v2405_v63, %v2404_v62  ;;  %v1941_v43 = vld [vmem:[#allocation2 + $0x20] sm:$0x3]  ;;  %v2632_v27 = vrot.slane %v2630_v11, 4  ;;  %v2633_v33 = vrot.slane %v2579_v52, 7  ;;  %v6651_v30 = vld [vmem:[%s8930_s4 + $0xb8] sm:$0xff]  ;;  %3606 = vmatpush.bf16.msra.mxu0 %v6643_v29 }
  0xae   : > { %v1730_v34 = vshll.u32 %v1573_v17, 16  ;;  %v1994_v49 = vrot.slane %v1941_v43, 6  ;;  %v1774_v31 = vunpack.c.l.b16 %v1704_v5  ;;  %v2631_v4 = vsel %vm7367_vm10, %v2629_v54, %v2630_v11  ;;  %3886 = vmatpush.bf16.msra.mxu1 %v6651_v30  ;;  %v1574_v43 = vld [vmem:[#allocation2 + $0x40] sm:$0xf]  ;;  %v2209_v30 = vld [vmem:[#allocation2 + $0x28] sm:$0xf] }
  0xaf   : > { %v2273_v19 = vor.u32 %v2272_v51, %v2269_v32  ;;  %v1775_v32 = vunpack.c.l.b16 %v1714_v38  ;;  %v1729_v58 = vrot.slane %v1727_v3, 5  ;;  %v2287_v62 = vshrl.u32 %v2206_v18, 16 }
  0xb0   : > { %6089 = vmatmul.msk.bf16.gmra.mxu0 %vm834_vm11, %v2047_v55  ;;  %v1940_v55 = vld [vmem:[#allocation2 + $0x1c] sm:$0xf]  ;;  %v1732_v60 = vrot.slane %v1730_v34, 6  ;;  %v2290_v63 = vshll.u32 %v2206_v18, 16  ;;  %v1715_v28 = vrot.slane %v7483_v42, 4  ;;  %vm3102_vm2 = vcmask 1043457  }
  0xb1   : > { %6155 = vmatmul.msk.bf16.gmra.mxu2 %vm834_vm11, %v2686_v37  ;;  %v1991_v2 = vrot.slane %v1940_v55, 6  ;;  %v2275_v40 = vrot.slane %v2273_v19, 4  ;;  %v2274_v51 = vsel %vm7057_vm9, %v2265_v39, %v2273_v19  ;;  %v1785_v7 = vpack.c.b16 %v1775_v32, %v1774_v31  ;;  %v2207_v19 = vld [vmem:[#allocation2 + $0x20] sm:$0x7]  ;;  %v2581_v42 = vld [vmem:[#allocation2 + $0x28] sm:$0xf]  ;;  %vm7848_vm3 = vmand %vm3102_vm2, %vm483_vm4 }
  0xb2   : > { %v2406_v14 = vunpack.c.l.b16 %v2274_v51  ;;  %v2675_v55 = vunpack.c.l.b16 %v2631_v4  ;;  %v7534_v17 = vor.u32 %v1732_v60, %v1729_v58  ;;  %v2289_v52 = vrot.slane %v2287_v62, 6  ;;  %v1942_v4 = vld [vmem:[#allocation2 + $0x24] sm:$0xc]  ;;  %v6634_v62 = vld [vmem:[%s8930_s4 + $0x30] sm:$0xff] }
  0xb3   : > { %v1993_v48 = vrot.slane %v1991_v2, 4  ;;  %v2284_v53 = vsel %vm7057_vm9, %v2275_v40, %v7496_v59  ;;  %v2637_v54 = vrot.slane %v2581_v42, 7  ;;  %v1737_v31 = vshrl.u32 %v1574_v43, 16  ;;  %3259 = vmatpush.bf16.msra.mxu3 %v6634_v62 }
  0xb4   : > { %6120 = vmatmul.msk.bf16.vlgmr.msrb.gmra.mxu1 %vm834_vm11, %v2418_v20  ;;  %v1717_v20 = vshrl.u32 %v1572_v23, 16  ;;  %v2407_v10 = vunpack.c.l.b16 %v2284_v53  ;;  %vm499_vm5 = vcmask 1042433  }
  0xb5   : > { %v7472_v1 = vpop.f32.mrf.mxu0  ;;  %v2639_v60 = vrot.slane %v2637_v54, 4  ;;  %vm8011_vm7 = vmand %vm499_vm5, %vm483_vm4  ;;  %vm5512_vm4 = vcmask 1043456  }
  0xb6   : > { %v1719_v44 = vrot.slane %v1717_v20, 5 }
  0xb8   : > { %v1723_v57 = vor.u32 %v1722_v16, %v1719_v44  ;;  %v2420_v16 = vpack.c.b16 %v2407_v10, %v2406_v14  ;;  %v6063_v14 = vrot.slane %v1942_v4, 10 }
  0xba   : > { %v1725_v11 = vrot.slane %v1723_v57, 4  ;;  %v1724_v3 = vsel %vm7303_vm6, %v1715_v28, %v1723_v57  ;;  %v1575_v57 = vld [vmem:[#allocation2 + $0x44] sm:$0x3]  ;;  %v1739_v28 = vrot.slane %v1737_v31, 5  ;;  %v6642_v31 = vld [vmem:[%s8930_s4 + $0x70] sm:$0xff] }
  0xbb   : > { %v7480_v37 = vpop.f32.mrf.mxu3  ;;  %v1776_v51 = vunpack.c.l.b16 %v1724_v3  ;;  %v1747_v29 = vshrl.u32 %v1575_v57, 16  ;;  %3607 = vmatpush.bf16.msra.mxu0 %v6642_v31 }
  0xbc   : > { %v1734_v26 = vsel %vm7303_vm6, %v1725_v11, %v7534_v17 }
  0xbd   : > { %6058 = vmatmul.msk.bf16.gmra.mxu3 %vm834_vm11, %v1784_v61  ;;  %v7488_v36 = vpop.f32.mrf.mxu0  ;;  %v1995_v61 = vsel %vm7383_vm14, %v1993_v48, %v1994_v49  ;;  %v7547_v48 = vld [vmem:[#allocation2 + $0x2c] sm:$0xf]  ;;  %v1777_v53 = vunpack.c.l.b16 %v1734_v26 }
  0xbe   : > { %v2037_v5 = vunpack.c.l.b16 %v1995_v61  ;;  %v1740_v61 = vshll.u32 %v1574_v43, 16 }
  0xc0   : > { %6090 = vmatmul.msk.bf16.gmra.mxu0 %vm834_vm11, %v2048_v41 }
  0xc1   : > { %v1203_v35 = vpop.f32.mrf.mxu1  ;;  %6156 = vmatmul.msk.bf16.gmra.mxu2 %vm834_vm11, %v2687_v25 }
  0xc2   : > { %v1259_v22 = vadd.f32 %v1203_v35, %v7440_v13  ;;  %v1990_v13 = vrot.slane %v1988_v47, 4  ;;  %v2634_v47 = vsel %vm7367_vm10, %v2632_v27, %v2633_v33  ;;  %v2300_v35 = vshll.u32 %v2207_v19, 16 }
  0xc3   : > { %v7503_v45 = vpop.f32.mrf.mxu3  ;;  %v2676_v25 = vunpack.c.l.b16 %v2634_v47  ;;  %v7553_v47 = vld [vmem:[#allocation2 + $0x2c] sm:$0xf] }
  0xc4   : > { %6121 = vmatmul.msk.bf16.gmra.mxu1 %vm834_vm11, %v2419_v8  ;;  %v1470_v15 = vpop.f32.mrf.mxu2  ;;  %v1992_v23 = vsel %vm7383_vm14, %v1990_v13, %v1991_v2  ;;  %v2297_v2 = vshrl.u32 %v2207_v19, 16  ;;  %v2302_v34 = vrot.slane %v2300_v35, 7  ;;  %v2580_v13 = vld [vmem:[#allocation2 + $0x24] sm:$0x8]  ;;  %v2001_v19 = vrot.slane %v7553_v47, 6 }
  0xc5   : > { %v7509_v21 = vadd.f32 %v1470_v15, %v1259_v22  ;;  %v7524_v9 = vpop.f32.mrf.mxu0  ;;  %v2036_v8 = vunpack.c.l.b16 %v1992_v23  ;;  %v2688_v44 = vpack.c.b16 %v2676_v25, %v2675_v55  ;;  %v1943_v22 = vld [vmem:[#allocation2 + $0x28] sm:$0xf]  ;;  %v6129_v58 = vrot.slane %v2580_v13, 11 }
  0xc6   : > { %v1998_v32 = vrot.slane %v1943_v22, 6  ;;  %v2640_v23 = vrot.slane %v7547_v48, 7  ;;  %v1786_v25 = vpack.c.b16 %v1777_v53, %v1776_v51  ;;  %v2315_v22 = vshrl.u32 %v2209_v30, 16 }
  0xc7   : > { %v2049_v27 = vpack.c.b16 %v2037_v5, %v2036_v8  ;;  %v2638_v11 = vsel %vm7367_vm10, %v6129_v58, %v2637_v54  ;;  %v1742_v8 = vrot.slane %v1740_v61, 6  ;;  %v1750_v5 = vshll.u32 %v1575_v57, 16  ;;  %v2583_v57 = vld [vmem:[#allocation2 + $0x30] sm:$0xf] }
  0xc8   : > { %v2000_v10 = vrot.slane %v1998_v32, 4  ;;  %v2677_v26 = vunpack.c.l.b16 %v2638_v11  ;;  %v2317_v58 = vrot.slane %v2315_v22, 6  ;;  %v7596_v11 = vld [vmem:[#allocation2 + $0x34] sm:$0xf]  ;;  %v6633_v22 = vld [vmem:[%s8930_s4 + $0x28] sm:$0xff]  ;;  %v2003_v48 = vrot.slane %v2001_v19, 4 }
  0xc9   : > { %v1205_v6 = vpop.f32.mrf.mxu1  ;;  %v1743_v13 = vor.u32 %v1742_v8, %v1739_v28  ;;  %3260 = vmatpush.bf16.msra.mxu3 %v6633_v22 }
  0xca   : > { %v1260_v20 = vadd.f32 %v1205_v6, %v7472_v1  ;;  %v2292_v1 = vrot.slane %v2290_v63, 7  ;;  %v2002_v43 = vsel %vm7383_vm14, %v2000_v10, %v2001_v19  ;;  %v2643_v10 = vrot.slane %v2583_v57, 7 }
  0xcb   : > { %v1238_v41 = vpop.f32.mrf.mxu3  ;;  %v2039_v51 = vunpack.c.l.b16 %v2002_v43  ;;  %v2646_v43 = vrot.slane %v7596_v11, 7 }
  0xcc   : > { %v1472_v38 = vpop.f32.mrf.mxu2  ;;  %v7537_v39 = vadd.f32 %v1238_v41, %v7480_v37  ;;  %v2293_v33 = vor.u32 %v2292_v1, %v2289_v52  ;;  %v2299_v37 = vrot.slane %v2297_v2, 6 }
  0xcd   : > { %v7539_v40 = vadd.f32 %v1472_v38, %v1260_v20  ;;  %6059 = vmatmul.msk.bf16.gmra.mxu3 %vm834_vm11, %v1785_v7  ;;  %v7549_v15 = vpop.f32.mrf.mxu0  ;;  %v2208_v20 = vld [vmem:[#allocation2 + $0x24] sm:$0xc] }
  0xce   : > { %v2295_v63 = vrot.slane %v2293_v33, 4  ;;  %v2303_v6 = vor.u32 %v2302_v34, %v2299_v37  ;;  %v2306_v2 = vshrl.u32 %v2208_v20, 16  ;;  %v2309_v35 = vshll.u32 %v2208_v20, 16 }
  0xd0   : > { %6091 = vmatmul.msk.bf16.gmra.mxu0 %vm834_vm11, %v2049_v27  ;;  %v2304_v1 = vsel %vm7057_vm9, %v2295_v63, %v2303_v6  ;;  %v1749_v27 = vrot.slane %v1747_v29, 5  ;;  %v2308_v53 = vrot.slane %v2306_v2, 6  ;;  %v1945_v6 = vld [vmem:[#allocation2 + $0x30] sm:$0xf] }
  0xd1   : > { %v1208_v49 = vpop.f32.mrf.mxu1  ;;  %6157 = vmatmul.msk.bf16.gmra.mxu2 %vm834_vm11, %v2688_v44  ;;  %v1999_v44 = vsel %vm7383_vm14, %v6063_v14, %v1998_v32  ;;  %v2409_v34 = vunpack.c.l.b16 %v2304_v1  ;;  %v6650_v32 = vld [vmem:[%s8930_s4 + $0xb0] sm:$0xff]  ;;  %v1745_v14 = vrot.slane %v1743_v13, 4  ;;  %v2004_v2 = vrot.slane %v1945_v6, 6 }
  0xd2   : > { %v1261_v18 = vadd.f32 %v1208_v49, %v7488_v36  ;;  %v2285_v36 = vrot.slane %v7496_v59, 4  ;;  %v2641_v59 = vsel %vm7367_vm10, %v2639_v60, %v2640_v23  ;;  %v1752_v49 = vrot.slane %v1750_v5, 6  ;;  %3887 = vmatpush.bf16.msra.mxu1 %v6650_v32 }
  0xd3   : > { %v7571_v41 = vpop.f32.mrf.mxu3  ;;  %v2678_v54 = vunpack.c.l.b16 %v2641_v59 }
  0xd4   : > { %6122 = vmatmul.msk.bf16.gmra.mxu1 %vm834_vm11, %v2420_v16  ;;  %v1475_v7 = vpop.f32.mrf.mxu2  ;;  %v2294_v52 = vsel %vm7057_vm9, %v2285_v36, %v2293_v33  ;;  %v2318_v16 = vshll.u32 %v2209_v30, 16  ;;  %v2210_v33 = vld [vmem:[#allocation2 + $0x2c] sm:$0xf]  ;;  %v1753_v28 = vor.u32 %v1752_v49, %v1749_v27 }
  0xd5   : > { %v7563_v55 = vadd.f32 %v1475_v7, %v1261_v18  ;;  %v7577_v38 = vpop.f32.mrf.mxu0  ;;  %v2408_v37 = vunpack.c.l.b16 %v2294_v52  ;;  %v2038_v18 = vunpack.c.l.b16 %v1999_v44  ;;  %v2325_v61 = vshrl.u32 %v2210_v33, 16 }
  0xd6   : > { %v2320_v60 = vrot.slane %v2318_v16, 7  ;;  %v2328_v62 = vshll.u32 %v2210_v33, 16  ;;  %v2689_v63 = vpack.c.b16 %v2678_v54, %v2677_v26  ;;  %v1735_v7 = vrot.slane %v7534_v17, 4  ;;  %v2211_v16 = vld [vmem:[#allocation2 + $0x30] sm:$0xf] }
  0xd7   : > { %v2421_v20 = vpack.c.b16 %v2409_v34, %v2408_v37  ;;  %v2050_v29 = vpack.c.b16 %v2039_v51, %v2038_v18  ;;  %v2327_v52 = vrot.slane %v2325_v61, 6  ;;  %v2642_v17 = vrot.slane %v2640_v23, 4  ;;  %v2212_v51 = vld [vmem:[#allocation2 + $0x34] sm:$0xf] }
  0xd8   : > { %v2321_v5 = vor.u32 %v2320_v60, %v2317_v58  ;;  %v2330_v1 = vrot.slane %v2328_v62, 7  ;;  %v2645_v44 = vrot.slane %v2643_v10, 4  ;;  %v2006_v33 = vrot.slane %v2004_v2, 4 }
  0xd9   : > { %v1210_v42 = vpop.f32.mrf.mxu1  ;;  %v2335_v49 = vshrl.u32 %v2211_v16, 16  ;;  %v2338_v31 = vshll.u32 %v2211_v16, 16  ;;  %v2005_v58 = vsel %vm7383_vm14, %v2003_v48, %v2004_v2  ;;  %v1947_v2 = vld [vmem:[#allocation2 + $0x38] sm:$0xf] }
  0xda   : > { %v1262_v3 = vadd.f32 %v1210_v42, %v7524_v9  ;;  %v2311_v9 = vrot.slane %v2309_v35, 7  ;;  %v7606_v42 = vld [vmem:[#allocation2 + $0x34] sm:$0xf]  ;;  %v2323_v54 = vrot.slane %v2321_v5, 4  ;;  %v7620_v27 = vor.u32 %v2330_v1, %v2327_v52 }
  0xdb   : > { %v2007_v37 = vrot.slane %v7606_v42, 6  ;;  %v2647_v32 = vsel %vm7367_vm10, %v2645_v44, %v2646_v43  ;;  %v2337_v6 = vrot.slane %v2335_v49, 6  ;;  %v2010_v48 = vrot.slane %v1947_v2, 6 }
  0xdc   : > { %v1477_v4 = vpop.f32.mrf.mxu2  ;;  %v2312_v30 = vor.u32 %v2311_v9, %v2308_v53  ;;  %v2332_v57 = vsel %vm7057_vm9, %v2323_v54, %v7620_v27  ;;  %v7660_v54 = vld [vmem:[#allocation2 + $0x3c] sm:$0xf]  ;;  %v2333_v49 = vrot.slane %v7620_v27, 4 }
  0xdd   : > { %v7592_v36 = vadd.f32 %v1477_v4, %v1262_v3  ;;  %6060 = vmatmul.msk.bf16.gmra.mxu3 %vm834_vm11, %v1786_v25  ;;  %v7598_v8 = vpop.f32.mrf.mxu0  ;;  %v1754_v3 = vsel %vm7303_vm6, %v1745_v14, %v1753_v28  ;;  %v2008_v60 = vsel %vm7383_vm14, %v2006_v33, %v2007_v37  ;;  %v6641_v28 = vld [vmem:[%s8930_s4 + $0x68] sm:$0xff]  ;;  %v2009_v11 = vrot.slane %v2007_v37, 4 }
  0xde   : > { %v2313_v23 = vrot.slane %v2312_v30, 4  ;;  %v1779_v19 = vunpack.c.l.b16 %v1754_v3  ;;  %v2041_v52 = vunpack.c.l.b16 %v2008_v60  ;;  %3608 = vmatpush.bf16.msra.mxu0 %v6641_v28  ;;  %v7656_v3 = vld [vmem:[#allocation2 + $0x3c] sm:$0xf]  ;;  %v2013_v27 = vrot.slane %v7660_v54, 6 }
  0xdf   : > { %v2214_v28 = vld [vmem:[#allocation2 + $0x3c] sm:$0xf] }
  0xe0   : > { %v7600_v35 = vpop.f32.mrf.mxu3  ;;  %6092 = vmatmul.msk.bf16.gmra.mxu0 %vm834_vm11, %v2050_v29  ;;  %v2322_v18 = vsel %vm7057_vm9, %v2313_v23, %v2321_v5  ;;  %v6649_v29 = vld [vmem:[%s8930_s4 + $0xa8] sm:$0xff]  ;;  %v2040_v5 = vunpack.c.l.b16 %v2005_v58 }
  0xe1   : > { %v1213_v59 = vpop.f32.mrf.mxu1  ;;  %6158 = vmatmul.msk.bf16.gmra.mxu2 %vm834_vm11, %v2689_v63  ;;  %v2680_v63 = vunpack.c.l.b16 %v2647_v32  ;;  %v2410_v30 = vunpack.c.l.b16 %v2322_v18  ;;  %3888 = vmatpush.bf16.msra.mxu1 %v6649_v29 }
  0xe2   : > { %v1263_v25 = vadd.f32 %v1213_v59, %v7549_v15  ;;  %v1744_v15 = vsel %vm7303_vm6, %v1735_v7, %v1743_v13  ;;  %v2644_v13 = vsel %vm7367_vm10, %v2642_v17, %v2643_v10  ;;  %v2340_v7 = vrot.slane %v2338_v31, 7 }
  0xe3   : > { %v1778_v47 = vunpack.c.l.b16 %v1744_v15  ;;  %v2679_v4 = vunpack.c.l.b16 %v2644_v13  ;;  %v2345_v10 = vshrl.u32 %v2212_v51, 16  ;;  %v2411_v59 = vunpack.c.l.b16 %v2332_v57 }
  0xe4   : > { %6123 = vmatmul.msk.bf16.gmra.mxu1 %vm834_vm11, %v2421_v20  ;;  %v1480_v26 = vpop.f32.mrf.mxu2  ;;  %v2348_v20 = vshll.u32 %v2212_v51, 16  ;;  %v2341_v17 = vor.u32 %v2340_v7, %v2337_v6  ;;  %v2051_v15 = vpack.c.b16 %v2041_v52, %v2040_v5  ;;  %v2648_v31 = vrot.slane %v2646_v43, 4 }
  0xe5   : > { %v7623_v34 = vadd.f32 %v1480_v26, %v1263_v25  ;;  %v7633_v9 = vpop.f32.mrf.mxu0  ;;  %v1787_v14 = vpack.c.b16 %v1779_v19, %v1778_v47  ;;  %v2690_v25 = vpack.c.b16 %v2680_v63, %v2679_v4  ;;  %v2347_v42 = vrot.slane %v2345_v10, 6 }
  0xe6   : > { %v2350_v44 = vrot.slane %v2348_v20, 7  ;;  %v2422_v16 = vpack.c.b16 %v2411_v59, %v2410_v30  ;;  %v2343_v47 = vrot.slane %v2341_v17, 4  ;;  %v2652_v51 = vrot.slane %v7656_v3, 7 }
  0xe7   : > { %v2012_v43 = vrot.slane %v2010_v48, 4  ;;  %v2342_v4 = vsel %vm7057_vm9, %v2333_v49, %v2341_v17  ;;  %v2011_v63 = vsel %vm7383_vm14, %v2009_v11, %v2010_v48  ;;  %v6648_v17 = vld [vmem:[%s8930_s4 + $0xa0] sm:$0xff] }
  0xe8   : > { %v7642_v61 = vpop.f32.mrf.mxu3  ;;  %v7670_v32 = vor.u32 %v2350_v44, %v2347_v42  ;;  %v2412_v5 = vunpack.c.l.b16 %v2342_v4  ;;  %3889 = vmatpush.bf16.msra.mxu1 %v6648_v17  ;;  %v1950_v4 = vld [vmem:[#allocation2 + $0x44] sm:$0x3] }
  0xe9   : > { %v1215_v53 = vpop.f32.mrf.mxu1  ;;  %v2014_v6 = vsel %vm7383_vm14, %v2012_v43, %v2013_v27 }
  0xea   : > { %v7645_v62 = vadd.f32 %v1215_v53, %v7577_v38  ;;  %v2585_v38 = vld [vmem:[#allocation2 + $0x38] sm:$0xf]  ;;  %v2352_v58 = vsel %vm7057_vm9, %v2343_v47, %v7670_v32  ;;  %v2043_v2 = vunpack.c.l.b16 %v2014_v6  ;;  %v2353_v6 = vrot.slane %v7670_v32, 4 }
  0xeb   : > { %v2649_v22 = vrot.slane %v2585_v38, 7  ;;  %v2413_v52 = vunpack.c.l.b16 %v2352_v58  ;;  %v2042_v38 = vunpack.c.l.b16 %v2011_v63  ;;  %v2654_v58 = vrot.slane %v2652_v51, 4  ;;  %v6631_v63 = vld [vmem:[%s8930_s4 + $0x18] sm:$0xff] }
  0xec   : > { %v7653_v1 = vpop.f32.mrf.mxu2 }
  0xed   : > { %6061 = vmatmul.msk.bf16.gmra.mxu3 %vm834_vm11, %v1787_v14  ;;  %v7658_v26 = vpop.f32.mrf.mxu0  ;;  %v2651_v18 = vrot.slane %v2649_v22, 4  ;;  %v2650_v60 = vsel %vm7367_vm10, %v2648_v31, %v2649_v22  ;;  %v2365_v22 = vshrl.u32 %v2214_v28, 16  ;;  %v2423_v54 = vpack.c.b16 %v2413_v52, %v2412_v5  ;;  %v2215_v5 = vld [vmem:[#allocation2 + $0x40] sm:$0xf] }
  0xee   : > { %v2681_v30 = vunpack.c.l.b16 %v2650_v60 }
  0xef   : > { %v2653_v37 = vsel %vm7367_vm10, %v2651_v18, %v2652_v51  ;;  %v2367_v31 = vrot.slane %v2365_v22, 6  ;;  %v2588_v18 = vld [vmem:[#allocation2 + $0x44] sm:$0x7]  ;;  %v2378_v22 = vshll.u32 %v2215_v5, 16 }
  0xf0   : > { %v1505_v33 = vpop.f32.mrf.mxu3  ;;  %6093 = vmatmul.msk.bf16.gmra.mxu0 %vm834_vm11, %v2051_v15  ;;  %v2682_v59 = vunpack.c.l.b16 %v2653_v37  ;;  %v2587_v15 = vld [vmem:[#allocation2 + $0x40] sm:$0xf]  ;;  %v2658_v37 = vrot.slane %v2588_v18, 7 }
  0xf1   : > { %v1218_v23 = vpop.f32.mrf.mxu1  ;;  %6159 = vmatmul.msk.bf16.gmra.mxu2 %vm834_vm11, %v2690_v25  ;;  %v7668_v19 = vadd.f32 %v1505_v33, %v7537_v39  ;;  %v2213_v39 = vld [vmem:[#allocation2 + $0x38] sm:$0xf]  ;;  %v6640_v25 = vld [vmem:[%s8930_s4 + $0x60] sm:$0xff]  ;;  %v2655_v33 = vrot.slane %v2587_v15, 7 }
  0xf2   : > { %v1265_v13 = vadd.f32 %v1218_v23, %v7598_v8  ;;  %v6632_v8 = vld [vmem:[%s8930_s4 + $0x20] sm:$0xff]  ;;  %v2355_v7 = vshrl.u32 %v2213_v39, 16  ;;  %v2358_v14 = vshll.u32 %v2213_v39, 16  ;;  %3609 = vmatpush.bf16.msra.mxu0 %v6640_v25  ;;  %v2691_v48 = vpack.c.b16 %v2682_v59, %v2681_v30 }
  0xf3   : > { %3261 = vmatpush.bf16.msra.mxu3 %v6632_v8  ;;  %v1949_v23 = vld [vmem:[#allocation2 + $0x40] sm:$0xf]  ;;  %v2657_v60 = vrot.slane %v2655_v33, 4  ;;  %v2019_v59 = vrot.slane %v1950_v4, 6  ;;  %v2656_v52 = vsel %vm7367_vm10, %v2654_v58, %v2655_v33  ;;  %v6647_v33 = vld [vmem:[%s8930_s4 + $0x98] sm:$0xff] }
  0xf4   : > { %6124 = vmatmul.msk.bf16.gmra.mxu1 %vm834_vm11, %v2422_v16  ;;  %v1485_v53 = vpop.f32.mrf.mxu2  ;;  %v2357_v42 = vrot.slane %v2355_v7, 6  ;;  %v2360_v44 = vrot.slane %v2358_v14, 7  ;;  %v2368_v16 = vshll.u32 %v2214_v28, 16  ;;  %v2016_v43 = vrot.slane %v1949_v23, 6  ;;  %v2216_v23 = vld [vmem:[#allocation2 + $0x44] sm:$0x7] }
  0xf5   : > { %v7679_v57 = vadd.f32 %v1485_v53, %v1265_v13  ;;  %v7696_v20 = vpop.f32.mrf.mxu0  ;;  %v2052_v13 = vpack.c.b16 %v2043_v2, %v2042_v38  ;;  %v2015_v28 = vrot.slane %v2013_v27, 4  ;;  %v2659_v38 = vsel %vm7367_vm10, %v2657_v60, %v2658_v37  ;;  %3890 = vmatpush.bf16.msra.mxu1 %v6647_v33 }
  0xf6   : > { %v2361_v49 = vor.u32 %v2360_v44, %v2357_v42  ;;  %v2370_v47 = vrot.slane %v2368_v16, 7  ;;  %v2018_v30 = vrot.slane %v2016_v43, 4  ;;  %v2375_v44 = vshrl.u32 %v2215_v5, 16  ;;  %v6630_v5 = vld [vmem:[%s8930_s4 + $0x10] sm:$0xff] }
  0xf7   : > { %3262 = vmatpush.bf16.msra.mxu3 %v6631_v63  ;;  %v2017_v17 = vsel %vm7383_vm14, %v2015_v28, %v2016_v43  ;;  %v2683_v15 = vunpack.c.l.b16 %v2656_v52  ;;  %v2380_v43 = vrot.slane %v2378_v22, 7  ;;  %v2388_v4 = vshll.u32 %v2216_v23, 16 }
  0xf8   : > { %v7698_v29 = vpop.f32.mrf.mxu3  ;;  %v2363_v7 = vrot.slane %v2361_v49, 4  ;;  %v7718_v14 = vor.u32 %v2370_v47, %v2367_v31  ;;  %v2362_v32 = vsel %vm7057_vm9, %v2353_v6, %v2361_v49  ;;  %v2020_v42 = vsel %vm7383_vm14, %v2018_v30, %v2019_v59 }
  0xf9   : > { %v7694_v10 = vpop.f32.mrf.mxu1  ;;  %v2044_v31 = vunpack.c.l.b16 %v2017_v17  ;;  %v2045_v47 = vunpack.c.l.b16 %v2020_v42  ;;  %v2390_v28 = vrot.slane %v2388_v4, 7 }
  0xfa   : > { %v2372_v2 = vsel %vm7057_vm9, %v2363_v7, %v7718_v14 }
  0xfb   : > { %v2415_v49 = vunpack.c.l.b16 %v2372_v2  ;;  %v2053_v37 = vpack.c.b16 %v2045_v47, %v2044_v31  ;;  %v2373_v2 = vrot.slane %v7718_v14, 4  ;;  %3263 = vmatpush.bf16.msra.mxu3 %v6630_v5 }
  0xfc   : > { %v7706_v3 = vpop.f32.mrf.mxu2 }
  0xfd   : > { %v893_v11 = vpop.f32.mrf.mxu0 }
 0x100   : > { %v7708_v53 = vpop.f32.mrf.mxu3  ;;  %6094 = vmatmul.msk.bf16.gmra.mxu0 %vm834_vm11, %v2052_v13  ;;  %v2414_v13 = vunpack.c.l.b16 %v2362_v32 }
 0x101   : > { %v1223_v8 = vpop.f32.mrf.mxu1  ;;  %6160 = vmatmul.msk.bf16.gmra.mxu2 %vm834_vm11, %v2691_v48  ;;  %v2684_v48 = vunpack.c.l.b16 %v2659_v38  ;;  %v493_v38 = vld [vmem:[#allocation3] sm:$0x3] }
 0x102   : > { %v1267_v39 = vadd.f32 %v1223_v8, %v7658_v26  ;;  %v2377_v8 = vrot.slane %v2375_v44, 6  ;;  %v2424_v60 = vpack.c.b16 %v2415_v49, %v2414_v13 }
 0x103   : > { %v2692_v58 = vpack.c.b16 %v2684_v48, %v2683_v15 }
 0x104   : > { %6125 = vmatmul.msk.bf16.gmra.mxu1 %vm834_vm11, %v2423_v54  ;;  %v1490_v26 = vpop.f32.mrf.mxu2  ;;  %v6639_v54 = vld [vmem:[%s8930_s4 + $0x58] sm:$0xff]  ;;  %v2381_v7 = vor.u32 %v2380_v43, %v2377_v8 }
 0x105   : > { %v7720_v51 = vadd.f32 %v1490_v26, %v1267_v39  ;;  %v7733_v25 = vpop.f32.mrf.mxu0  ;;  %v2385_v39 = vshrl.u32 %v2216_v23, 16  ;;  %3610 = vmatpush.bf16.msra.mxu0 %v6639_v54 }
 0x106   : > { %v2383_v17 = vrot.slane %v2381_v7, 4  ;;  %v2382_v48 = vsel %vm7057_vm9, %v2373_v2, %v2381_v7  ;;  %v7809_v2 = vld [vmem:[%s8928_s2] ss:$0 sm:$0xff] }
 0x107   : > { %v2387_v26 = vrot.slane %v2385_v39, 6  ;;  %v2416_v33 = vunpack.c.l.b16 %v2382_v48  ;;  %v6637_v48 = vld [vmem:[%s8930_s4 + $0x48] sm:$0xff] }
 0x108   : > { %v7739_v16 = vpop.f32.mrf.mxu3 }
 0x109   : > { %v7731_v27 = vpop.f32.mrf.mxu1  ;;  %v2391_v42 = vor.u32 %v2390_v28, %v2387_v26  ;;  %v1901_v26 = vadd.f32 %v7708_v53, %v7509_v21  ;;  %v6659_v28 = vld [vmem:[%s8930_s4 + $0xf8] sm:$0xff]  ;;  %v6658_v21 = vld [vmem:[%s8930_s4 + $0xf0] sm:$0xff] }
 0x10a   : > { %4274 = vmatpush.bf16.msra.mxu2 %v6659_v28 }
 0x10b   : > { %v2392_v23 = vsel %vm7057_vm9, %v2383_v17, %v2391_v42  ;;  %v7817_v17 = vld [vmem:[%s8929_s3] ss:$0 sm:$0xff] }
 0x10c   : > { %v7747_v18 = vpop.f32.mrf.mxu2  ;;  %v2417_v14 = vunpack.c.l.b16 %v2392_v23  ;;  %v6645_v23 = vld [vmem:[%s8930_s4 + $0x88] sm:$0xff] }
 0x10d   : > { %v898_v6 = vpop.f32.mrf.mxu0 }
 0x10e   : > { %v2425_v49 = vpack.c.b16 %v2417_v14, %v2416_v33  ;;  %4275 = vmatpush.bf16.msra.mxu2 %v6658_v21  ;;  %v1902_v33 = vadd.f32 %v7739_v16, %v7539_v40 }
 0x110   : > { %v7749_v30 = vpop.f32.mrf.mxu3  ;;  %6095 = vmatmul.msk.bf16.gmra.mxu0 %vm834_vm11, %v2053_v37 }
 0x111   : > { %v1228_v63 = vpop.f32.mrf.mxu1  ;;  %6161 = vmatmul.msk.bf16.gmra.mxu2 %vm834_vm11, %v2692_v58  ;;  %v6638_v58 = vld [vmem:[%s8930_s4 + $0x50] sm:$0xff]  ;;  %v1903_v28 = vadd.f32 %v7749_v30, %v7563_v55 }
 0x112   : > { %v1269_v59 = vadd.f32 %v1228_v63, %v893_v11  ;;  %v494_v11 = vsel %vm7757_vm15, 0, %v493_v38  ;;  %3611 = vmatpush.bf16.msra.mxu0 %v6638_v58 }
 0x113   : > { %495 = vst [vmem:[#allocation3] sm:$0x3] %v494_v11 }
 0x114   : > { %6126 = vmatmul.msk.bf16.gmra.mxu1 %vm834_vm11, %v2424_v60  ;;  %v1495_v32 = vpop.f32.mrf.mxu2  ;;  %v6646_v60 = vld [vmem:[%s8930_s4 + $0x90] sm:$0xff] }
 0x115   : > { %v7766_v44 = vadd.f32 %v1495_v32, %v1269_v59  ;;  %v7770_v15 = vpop.f32.mrf.mxu0  ;;  %3891 = vmatpush.bf16.msra.mxu1 %v6646_v60 }
 0x116   : > { %3612 = vmatpush.bf16.msra.mxu0 %v6637_v48 }
 0x118   : > { %v7776_v54 = vpop.f32.mrf.mxu3 }
 0x119   : > { %v7768_v22 = vpop.f32.mrf.mxu1  ;;  %3892 = vmatpush.bf16.msra.mxu1 %v6645_v23 }
 0x11a   : > { %v3104_v55 = vld [vmem:[#allocation3] sm:$0xe] }
 0x11c   : > { %v7778_v13 = vpop.f32.mrf.mxu2 }
 0x11d   : > { %v2111_v47 = vpop.f32.mrf.mxu0 }
 0x11e   : > { %v2167_v59 = vadd.f32 %v2111_v47, %v1901_v26 }
 0x120   : > { %v7780_v8 = vpop.f32.mrf.mxu3 }
 0x121   : > { %v1233_v31 = vpop.f32.mrf.mxu1 }
 0x122   : > { %v1271_v43 = vadd.f32 %v1233_v31, %v898_v6 }
 0x124   : > { %6127 = vmatmul.msk.bf16.gmra.mxu1 %vm834_vm11, %v2425_v49  ;;  %v7784_v39 = vadd.f32 %v7600_v35, %v1271_v43  ;;  %v2750_v4 = vpop.f32.mrf.mxu2  ;;  %v6629_v35 = vld [vmem:[%s8930_s4 + $0x8] sm:$0xff]  ;;  %v6628_v43 = vld [vmem:[%s8930_s4] sm:$0xff] }
 0x125   : > { %v2113_v63 = vpop.f32.mrf.mxu0  ;;  %3264 = vmatpush.bf16.msra.mxu3 %v6629_v35  ;;  %v6657_v49 = vld [vmem:[%s8930_s4 + $0xe8] sm:$0xff]  ;;  %v6656_v35 = vld [vmem:[%s8930_s4 + $0xe0] sm:$0xff] }
 0x126   : > { %v2168_v31 = vadd.f32 %v2113_v63, %v1902_v33  ;;  %4276 = vmatpush.bf16.msra.mxu2 %v6657_v49 }
 0x128   : > { %v7794_v6 = vpop.f32.mrf.mxu3 }
 0x129   : > { %v7792_v37 = vpop.f32.mrf.mxu1  ;;  %3265 = vmatpush.bf16.msra.mxu3 %v6628_v43 }
 0x12a   : > { %4277 = vmatpush.bf16.msra.mxu2 %v6656_v35 }
 0x12c   : > { %v2752_v7 = vpop.f32.mrf.mxu2 }
 0x12d   : > { %v2116_v38 = vpop.f32.mrf.mxu0 }
 0x12e   : > { %v2169_v33 = vadd.f32 %v2116_v38, %v1903_v28  ;;  %v6654_v38 = vld [vmem:[%s8930_s4 + $0xd0] sm:$0xff]  ;;  %v6636_v28 = vld [vmem:[%s8930_s4 + $0x40] sm:$0xff] }
 0x12f   : > { %3613 = vmatpush.bf16.msra.mxu0 %v6636_v28 }
 0x130   : > { %v7804_v11 = vpop.f32.mrf.mxu3 }
 0x131   : > { %v2483_v5 = vpop.f32.mrf.mxu1 }
 0x132   : > { %v2539_v32 = vadd.f32 %v2483_v5, %v2167_v59 }
 0x134   : > { %v2806_v53 = vadd.f32 %v2750_v4, %v2539_v32  ;;  %v2755_v42 = vpop.f32.mrf.mxu2 }
 0x135   : > { %v2118_v58 = vpop.f32.mrf.mxu0 }
 0x136   : > { %v2858_v14 = vmul.f32 %v7809_v2, %v2806_v53  ;;  %v6655_v53 = vld [vmem:[%s8930_s4 + $0xd8] sm:$0xff] }
 0x137   : > { %4278 = vmatpush.bf16.msra.mxu2 %v6655_v53 }
 0x138   : > { %v2878_v47 = vadd.f32 %v7817_v17, %v2858_v14  ;;  %v7835_v40 = vpop.f32.mrf.mxu3 }
 0x139   : > { %v2485_v4 = vpop.f32.mrf.mxu1 }
 0x13a   : > { %v2894_v60 = vmax.f32 %v2878_v47, 0.0  ;;  %v2540_v16 = vadd.f32 %v2485_v4, %v2168_v31 }
 0x13b   : > { %4279 = vmatpush.bf16.msra.mxu2 %v6654_v38 }
 0x13c   : > { %v2910_v26 = vpack.c.bf16 %v2894_v60, %v2894_v60  ;;  %v2807_v63 = vadd.f32 %v2752_v7, %v2540_v16  ;;  %v2757_v59 = vpop.f32.mrf.mxu2 }
 0x13d   : > { %v7852_v49 = vpop.f32.mrf.mxu0 }
 0x13e   : > { %v2927_v5 = vshrl.u32 %v2910_v26, 16  ;;  %v2930_v32 = vshll.u32 %v2910_v26, 16  ;;  %v2859_v21 = vmul.f32 %v7809_v2, %v2807_v63  ;;  %v1274_v26 = vadd.f32 %v7571_v41, %v7503_v45  ;;  %v6653_v45 = vld [vmem:[%s8930_s4 + $0xc8] sm:$0xff] }
 0x13f   : > { %v1266_v41 = vadd.f32 %v7694_v10, %v7633_v9  ;;  %4280 = vmatpush.bf16.msra.mxu2 %v6653_v45  ;;  %v1272_v9 = vadd.f32 %v7792_v37, %v7770_v15 }
 0x140   : > { %v2929_v48 = vrot.slane %v2927_v5, 6  ;;  %v2932_v23 = vrot.slane %v2930_v32, 7  ;;  %v2879_v14 = vadd.f32 %v7817_v17, %v2859_v21  ;;  %v7854_v43 = vpop.f32.mrf.mxu3  ;;  %v6644_v5 = vld [vmem:[%s8930_s4 + $0x80] sm:$0xff]  ;;  %v1904_v32 = vadd.f32 %v7776_v54, %v7592_v36 }
 0x141   : > { %v2488_v30 = vpop.f32.mrf.mxu1  ;;  %3893 = vmatpush.bf16.msra.mxu1 %v6644_v5  ;;  %v1533_v38 = vadd.f32 %v7706_v3, %v1266_v41  ;;  %v1907_v3 = vadd.f32 %v7804_v11, %v7679_v57 }
 0x142   : > { %v2933_v31 = vor.u32 %v2932_v23, %v2929_v48  ;;  %v2895_v47 = vmax.f32 %v2879_v14, 0.0  ;;  %v2541_v4 = vadd.f32 %v2488_v30, %v2169_v33  ;;  %v1268_v48 = vadd.f32 %v7731_v27, %v7696_v20 }
 0x143   : > { %v1270_v23 = vadd.f32 %v7768_v22, %v7733_v25  ;;  %v2170_v33 = vadd.f32 %v2118_v58, %v1904_v32  ;;  %v7887_v30 = vadd.f32 %v7698_v29, %v1274_v26  ;;  %v6652_v58 = vld [vmem:[%s8930_s4 + $0xc0] sm:$0xff]  ;;  %v1905_v29 = vadd.f32 %v7780_v8, %v7623_v34 }
 0x144   : > { %v3105_v60 = vsel %vm7848_vm3, %v2933_v31, %v3104_v55  ;;  %v2911_v16 = vpack.c.bf16 %v2895_v47, %v2895_v47  ;;  %v2808_v35 = vadd.f32 %v2755_v42, %v2541_v4  ;;  %v7863_v63 = vpop.f32.mrf.mxu2  ;;  %v1531_v55 = vadd.f32 %v7653_v1, %v7645_v62  ;;  %4281 = vmatpush.bf16.msra.mxu2 %v6652_v58 }
 0x145   : > { %3106 = vst [vmem:[#allocation3] sm:$0xe] %v3105_v60  ;;  %v2123_v20 = vpop.f32.mrf.mxu0  ;;  %v2934_v27 = vrot.slane %v2933_v31, 4  ;;  %v1535_v62 = vadd.f32 %v7747_v18, %v1268_v48  ;;  %v7897_v1 = vadd.f32 %v7778_v13, %v1270_v23  ;;  %v6667_v13 = vld [vmem:[%s8930_s4 + $0x138] sm:$0xff]  ;;  %v7912_v34 = vadd.f32 %v7642_v61, %v1272_v9 }
 0x146   : > { %v2936_v21 = vshrl.u32 %v2911_v16, 16  ;;  %v2939_v42 = vshll.u32 %v2911_v16, 16  ;;  %v2860_v53 = vmul.f32 %v7809_v2, %v2808_v35  ;;  %v1906_v15 = vadd.f32 %v7794_v6, %v1531_v55  ;;  %4554 = vmatpush.bf16.msrb.mxu3 %v6667_v13 }
 0x147   : > { %v7915_v35 = vadd.f32 %v7835_v40, %v1533_v38  ;;  %v2171_v61 = vadd.f32 %v7852_v49, %v1905_v29  ;;  %v7922_v40 = vadd.f32 %v7854_v43, %v7720_v51 }
 0x148   : > { %v2938_v36 = vrot.slane %v2936_v21, 6  ;;  %v2941_v54 = vrot.slane %v2939_v42, 7  ;;  %v2880_v14 = vadd.f32 %v7817_v17, %v2860_v53  ;;  %v1867_v47 = vpop.f32.mrf.mxu3  ;;  %v2172_v49 = vadd.f32 %v2123_v20, %v1906_v15 }
 0x149   : > { %v2490_v10 = vpop.f32.mrf.mxu1 }
 0x14a   : > { %v2942_v25 = vor.u32 %v2941_v54, %v2938_v36  ;;  %v2896_v22 = vmax.f32 %v2880_v14, 0.0  ;;  %v2542_v4 = vadd.f32 %v2490_v10, %v2170_v33 }
 0x14c   : > { %v2943_v37 = vsel %vm7057_vm9, %v2934_v27, %v2942_v25  ;;  %v2912_v31 = vpack.c.bf16 %v2896_v22, %v2896_v22  ;;  %v2809_v60 = vadd.f32 %v2757_v59, %v2542_v4  ;;  %v3323_v16 = vld [vmem:[#allocation3] sm:$0xf]  ;;  %v7906_v18 = vpop.f32.mrf.mxu2  ;;  %v2944_v48 = vrot.slane %v2942_v25, 4 }
 0x14d   : > { %3107 = vst [vmem:[#allocation3 + $0x4] sm:$0xf] %v2943_v37  ;;  %v3342_v8 = vshrl.u32 %v3323_v16, 16  ;;  %v3345_v6 = vshll.u32 %v3323_v16, 16  ;;  %v3983_v57 = vld [vmem:[#allocation3] sm:$0xe]  ;;  %v2126_v36 = vpop.f32.mrf.mxu0  ;;  %v7924_v22 = vadd.f32 %v1867_v47, %v1535_v62 }
 0x14e   : > { %v2946_v59 = vshrl.u32 %v2912_v31, 16  ;;  %v2949_v26 = vshll.u32 %v2912_v31, 16  ;;  %v2861_v28 = vmul.f32 %v7809_v2, %v2809_v60  ;;  %v4002_v32 = vshrl.u32 %v3983_v57, 16  ;;  %v3703_v41 = vld [vmem:[#allocation3] sm:$0xe]  ;;  %v6675_v16 = vld [vmem:[%s8930_s4 + $0x178] sm:$0xff] }
 0x14f   : > { %v3344_v11 = vrot.slane %v3342_v8, 4  ;;  %v3347_v5 = vrot.slane %v3345_v6, 5  ;;  %v4005_v21 = vshll.u32 %v3983_v57, 16  ;;  %v6274_v4 = vrot.slane %v3703_v41, 9  ;;  %4942 = vmatpush.bf16.msrb.mxu0 %v6675_v16 }
 0x150   : > { %v2948_v42 = vrot.slane %v2946_v59, 6  ;;  %v2951_v53 = vrot.slane %v2949_v26, 7  ;;  %v2881_v45 = vadd.f32 %v7817_v17, %v2861_v28  ;;  %v4004_v54 = vrot.slane %v4002_v32, 5  ;;  %v1870_v9 = vpop.f32.mrf.mxu3 }
 0x151   : > { %v2493_v23 = vpop.f32.mrf.mxu1  ;;  %v4007_v33 = vrot.slane %v4005_v21, 6  ;;  %v3348_v27 = vor.u32 %v3347_v5, %v3344_v11  ;;  %v7929_v43 = vadd.f32 %v2126_v36, %v1907_v3  ;;  %v7932_v60 = vadd.f32 %v1870_v9, %v7766_v44  ;;  %v6683_v44 = vld [vmem:[%s8930_s4 + $0x1b8] sm:$0xff] }
 0x152   : > { %v2952_v14 = vor.u32 %v2951_v53, %v2948_v42  ;;  %v2897_v55 = vmax.f32 %v2881_v45, 0.0  ;;  %v2543_v10 = vadd.f32 %v2493_v23, %v2171_v61  ;;  %5222 = vmatpush.bf16.msrb.mxu1 %v6683_v44 }
 0x153   : > { %v4008_v58 = vor.u32 %v4007_v33, %v4004_v54  ;;  %v3349_v8 = vrot.slane %v3348_v27, 4 }
 0x154   : > { %v2953_v25 = vsel %vm7057_vm9, %v2944_v48, %v2952_v14  ;;  %v2913_v38 = vpack.c.bf16 %v2897_v55, %v2897_v55  ;;  %v2810_v51 = vadd.f32 %v7863_v63, %v2543_v10  ;;  %v6620_v29 = vld [vmem:[#allocation3] sm:$0xff]  ;;  %v7934_v47 = vpop.f32.mrf.mxu2  ;;  %v2954_v59 = vrot.slane %v2952_v14, 4 }
 0x155   : > { %v3704_v37 = vld [vmem:[#allocation3 + $0x4] sm:$0xf]  ;;  %3108 = vst [vmem:[#allocation3 + $0x8] sm:$0xf] %v2953_v25  ;;  %3266 = vmatmul.bf16.vlgmr.msra.gmra.mxu3 %v6620_v29  ;;  %v7943_v57 = vrot.slane %v4008_v58, 4  ;;  %v2128_v53 = vpop.f32.mrf.mxu0 }
 0x156   : > { %v3324_v31 = vld [vmem:[#allocation3 + $0x4] sm:$0xf]  ;;  %v3741_v20 = vrot.slane %v3704_v37, 5  ;;  %v2956_v13 = vshrl.u32 %v2913_v38, 16  ;;  %v2959_v63 = vshll.u32 %v2913_v38, 16  ;;  %v2862_v3 = vmul.f32 %v7809_v2, %v2810_v51 }
 0x157   : > { %v3351_v62 = vshll.u32 %v3324_v31, 16  ;;  %v3355_v15 = vshrl.u32 %v3324_v31, 16  ;;  %v3984_v6 = vld [vmem:[#allocation3 + $0x4] sm:$0xf]  ;;  %v7951_v55 = vadd.f32 %v2128_v53, %v7915_v35 }
 0x158   : > { %v2958_v11 = vrot.slane %v2956_v13, 6  ;;  %v2961_v5 = vrot.slane %v2959_v63, 7  ;;  %v2882_v32 = vadd.f32 %v7817_v17, %v2862_v3  ;;  %v3742_v21 = vsel %vm7099_vm0, %v6274_v4, %v3741_v20  ;;  %v1872_v54 = vpop.f32.mrf.mxu3 }
 0x159   : > { %v3353_v26 = vrot.slane %v3351_v62, 5  ;;  %v3357_v28 = vrot.slane %v3355_v15, 4  ;;  %v2495_v42 = vpop.f32.mrf.mxu1  ;;  %v3743_v61 = vrot.slane %v3741_v20, 4  ;;  %v4011_v48 = vshrl.u32 %v3984_v6, 16 }
 0x15a   : > { %v2962_v23 = vor.u32 %v2961_v5, %v2958_v11  ;;  %v2898_v36 = vmax.f32 %v2882_v32, 0.0  ;;  %v2544_v33 = vadd.f32 %v2495_v42, %v2172_v49  ;;  %v4014_v14 = vshll.u32 %v3984_v6, 16  ;;  %v6666_v6 = vld [vmem:[%s8930_s4 + $0x130] sm:$0xff] }
 0x15b   : > { %v3354_v45 = vsel %vm7114_vm1, %v3349_v8, %v3353_v26  ;;  %v3358_v41 = vor.u32 %v3357_v28, %v3353_v26  ;;  %v3806_v9 = vunpack.c.l.b16 %v3742_v21  ;;  %v4013_v27 = vrot.slane %v4011_v48, 5  ;;  %4555 = vmatpush.bf16.msrb.mxu3 %v6666_v6 }
 0x15c   : > { %v2963_v4 = vsel %vm7057_vm9, %v2954_v59, %v2962_v23  ;;  %v2964_v58 = vrot.slane %v2962_v23, 4  ;;  %v2914_v25 = vpack.c.bf16 %v2898_v36, %v2898_v36  ;;  %v2811_v38 = vadd.f32 %v7906_v18, %v2544_v33  ;;  %v7956_v51 = vld [vmem:[#allocation3 + $0x8] sm:$0xf]  ;;  %v7963_v35 = vpop.f32.mrf.mxu2 }
 0x15d   : > { %v3359_v10 = vrot.slane %v3358_v41, 4  ;;  %v7958_v29 = vld [vmem:[#allocation3 + $0x8] sm:$0xf]  ;;  %3109 = vst [vmem:[#allocation3 + $0xc] sm:$0xf] %v2963_v4  ;;  %v7961_v49 = vadd.f32 %v1872_v54, %v7897_v1  ;;  %v3744_v37 = vrot.slane %v7956_v51, 5  ;;  %v3526_v20 = vunpack.c.l.b16 %v3354_v45  ;;  %v2131_v5 = vpop.f32.mrf.mxu0 }
 0x15e   : > { %v3361_v31 = vshll.u32 %v7958_v29, 16  ;;  %v3985_v62 = vld [vmem:[#allocation3 + $0x8] sm:$0xf]  ;;  %v2966_v15 = vshrl.u32 %v2914_v25, 16  ;;  %v2969_v16 = vshll.u32 %v2914_v25, 16  ;;  %v2863_v18 = vmul.f32 %v7809_v2, %v2811_v38 }
 0x15f   : > { %v4016_v13 = vrot.slane %v4014_v14, 6  ;;  %v3745_v63 = vsel %vm7099_vm0, %v3743_v61, %v3744_v37  ;;  %v4021_v1 = vshrl.u32 %v3985_v62, 16  ;;  %v4024_v8 = vshll.u32 %v3985_v62, 16 }
 0x160   : > { %v7970_v3 = vrot.slane %v3361_v31, 5  ;;  %v2968_v44 = vrot.slane %v2966_v15, 6  ;;  %v2971_v59 = vrot.slane %v2969_v16, 7  ;;  %v2883_v26 = vadd.f32 %v7817_v17, %v2863_v18  ;;  %v1875_v41 = vpop.f32.mrf.mxu3 }
 0x161   : > { %v3807_v28 = vunpack.c.l.b16 %v3745_v63  ;;  %v2498_v11 = vpop.f32.mrf.mxu1  ;;  %v4017_v21 = vor.u32 %v4016_v13, %v4013_v27  ;;  %v4023_v42 = vrot.slane %v4021_v1, 5  ;;  %v4026_v53 = vrot.slane %v4024_v8, 6 }
 0x162   : > { %v3364_v32 = vsel %vm7114_vm1, %v3359_v10, %v7970_v3  ;;  %v7979_v61 = vor.u32 %v2971_v59, %v2968_v44  ;;  %v2899_v45 = vmax.f32 %v2883_v26, 0.0  ;;  %v2545_v48 = vadd.f32 %v2498_v11, %v7929_v43 }
 0x163   : > { %v3822_v23 = vpack.c.b16 %v3807_v28, %v3806_v9  ;;  %v7983_v36 = vadd.f32 %v1875_v41, %v7784_v39  ;;  %v7986_v54 = vadd.f32 %v2131_v5, %v7922_v40  ;;  %v3527_v33 = vunpack.c.l.b16 %v3364_v32  ;;  %v496_v9 = vld [vmem:[#allocation3 + $0x24] sm:$0x3] }
 0x164   : > { %v4018_v14 = vsel %vm7303_vm6, %v7943_v57, %v4017_v21  ;;  %v2973_v10 = vsel %vm7057_vm9, %v2964_v58, %v7979_v61  ;;  %v2974_v27 = vrot.slane %v7979_v61, 4  ;;  %v2915_v4 = vpack.c.bf16 %v2899_v45, %v2899_v45  ;;  %v6621_v39 = vld [vmem:[#allocation3 + $0x8] sm:$0xff]  ;;  %v8002_v16 = vpop.f32.mrf.mxu2 }
 0x165   : > { %v2812_v43 = vadd.f32 %v7934_v47, %v2545_v48  ;;  %3894 = vmatmul.bf16.vlgmr.msra.gmra.mxu1 %v3822_v23  ;;  %v3706_v25 = vld [vmem:[#allocation3 + $0xc] sm:$0xf]  ;;  %3110 = vst [vmem:[#allocation3 + $0x10] sm:$0xf] %v2973_v10  ;;  %v3542_v40 = vpack.c.b16 %v3527_v33, %v3526_v20  ;;  %v4019_v38 = vrot.slane %v4017_v21, 4  ;;  %v7996_v51 = vor.u32 %v4026_v53, %v4023_v42  ;;  %v2133_v5 = vpop.f32.mrf.mxu0 }
 0x166   : > { %v4194_v31 = vunpack.c.l.b16 %v4018_v14  ;;  %v6674_v57 = vld [vmem:[%s8930_s4 + $0x170] sm:$0xff]  ;;  %v2976_v58 = vshrl.u32 %v2915_v4, 16  ;;  %v2979_v62 = vshll.u32 %v2915_v4, 16  ;;  %3271 = vmatmul.bf16.gmra.mxu3 %v6621_v39  ;;  %v501_v47 = vld [vmem:[#allocation3 + $0x20] sm:$0x6]  ;;  %v497_v63 = vsel %vm7757_vm15, 0, %v496_v9 }
 0x167   : > { %v2864_v15 = vmul.f32 %v7809_v2, %v2812_v43  ;;  %v6682_v20 = vld [vmem:[%s8930_s4 + $0x1b0] sm:$0xff]  ;;  %3614 = vmatmul.bf16.vlgmr.msra.gmra.mxu0 %v3542_v40  ;;  %v4028_v18 = vsel %vm7303_vm6, %v4019_v38, %v7996_v51  ;;  %v3746_v1 = vrot.slane %v3744_v37, 4  ;;  %v3747_v8 = vrot.slane %v3706_v25, 5  ;;  %498 = vst [vmem:[#allocation3 + $0x24] sm:$0x3] %v497_v63 }
 0x168   : > { %v2978_v6 = vrot.slane %v2976_v58, 6  ;;  %v2981_v44 = vrot.slane %v2979_v62, 7  ;;  %v4195_v26 = vunpack.c.l.b16 %v4028_v18  ;;  %4943 = vmatpush.bf16.msrb.mxu0 %v6674_v57  ;;  %5223 = vmatpush.bf16.msrb.mxu1 %v6682_v20  ;;  %v502_v28 = vsel %vm8011_vm7, 0, %v501_v47  ;;  %v1877_v61 = vpop.f32.mrf.mxu3  ;;  %v3326_v48 = vld [vmem:[#allocation3 + $0xc] sm:$0xf] }
 0x169   : > { %v2884_v59 = vadd.f32 %v7817_v17, %v2864_v15  ;;  %v2500_v11 = vpop.f32.mrf.mxu1  ;;  %v3748_v32 = vsel %vm7099_vm0, %v3746_v1, %v3747_v8  ;;  %v3749_v21 = vrot.slane %v3747_v8, 4  ;;  %v3365_v37 = vshrl.u32 %v7958_v29, 16  ;;  %503 = vst [vmem:[#allocation3 + $0x20] sm:$0x6] %v502_v28 }
 0x16a   : > { %v2982_v42 = vor.u32 %v2981_v44, %v2978_v6  ;;  %v4210_v45 = vpack.c.b16 %v4195_v26, %v4194_v31  ;;  %v2546_v41 = vadd.f32 %v2500_v11, %v7951_v55  ;;  %v8025_v23 = vadd.f32 %v1877_v61, %v7912_v34 }
 0x16b   : > { %v2900_v53 = vmax.f32 %v2884_v59, 0.0  ;;  %v8028_v33 = vadd.f32 %v2133_v5, %v7924_v22  ;;  %v3808_v14 = vunpack.c.l.b16 %v3748_v32  ;;  %v3367_v10 = vrot.slane %v3365_v37, 4 }
 0x16c   : > { %v2983_v4 = vsel %vm7057_vm9, %v2974_v27, %v2982_v42  ;;  %v2984_v29 = vrot.slane %v2982_v42, 4  ;;  %4282 = vmatmul.bf16.vlgmr.msra.gmra.mxu2 %v4210_v45  ;;  %v2813_v39 = vadd.f32 %v7963_v35, %v2546_v41  ;;  %v8033_v9 = vld [vmem:[#allocation3 + $0x10] sm:$0xf]  ;;  %v3371_v25 = vshll.u32 %v3326_v48, 16  ;;  %v6665_v35 = vld [vmem:[%s8930_s4 + $0x128] sm:$0xff]  ;;  %v8049_v63 = vpop.f32.mrf.mxu2 }
 0x16d   : > { %v2916_v43 = vpack.c.bf16 %v2900_v53, %v2900_v53  ;;  %v8035_v55 = vld [vmem:[#allocation3 + $0x10] sm:$0xf]  ;;  %3111 = vst [vmem:[#allocation3 + $0x14] sm:$0xf] %v2983_v4  ;;  %v3750_v34 = vrot.slane %v8033_v9, 5  ;;  %v3368_v22 = vor.u32 %v3367_v10, %v7970_v3  ;;  %v3375_v40 = vshrl.u32 %v3326_v48, 16  ;;  %4556 = vmatpush.bf16.msrb.mxu3 %v6665_v35  ;;  %v2136_v6 = vpop.f32.mrf.mxu0 }
 0x16e   : > { %v2865_v27 = vmul.f32 %v7809_v2, %v2813_v39  ;;  %v3381_v57 = vshll.u32 %v8035_v55, 16  ;;  %v3373_v15 = vrot.slane %v3371_v25, 5  ;;  %v3385_v28 = vshrl.u32 %v8035_v55, 16  ;;  %v3986_v42 = vld [vmem:[#allocation3 + $0xc] sm:$0xf] }
 0x16f   : > { %v2986_v38 = vshrl.u32 %v2916_v43, 16  ;;  %v2989_v31 = vshll.u32 %v2916_v43, 16  ;;  %v3751_v58 = vsel %vm7099_vm0, %v3749_v21, %v3750_v34  ;;  %v3369_v62 = vrot.slane %v3368_v22, 4 }
 0x170   : > { %v3377_v3 = vrot.slane %v3375_v40, 4  ;;  %v2885_v18 = vadd.f32 %v7817_v17, %v2865_v27  ;;  %v3809_v1 = vunpack.c.l.b16 %v3751_v58  ;;  %v8053_v26 = vrot.slane %v3381_v57, 5  ;;  %v1880_v32 = vpop.f32.mrf.mxu3 }
 0x171   : > { %v2988_v47 = vrot.slane %v2986_v38, 6  ;;  %v2991_v20 = vrot.slane %v2989_v31, 7  ;;  %v2503_v8 = vpop.f32.mrf.mxu1  ;;  %v3374_v44 = vsel %vm7114_vm1, %v3369_v62, %v3373_v15  ;;  %v8058_v53 = vadd.f32 %v1880_v32, %v7668_v19  ;;  %v6681_v31 = vld [vmem:[%s8930_s4 + $0x1a8] sm:$0xff] }
 0x172   : > { %v3378_v59 = vor.u32 %v3377_v3, %v3373_v15  ;;  %v2901_v5 = vmax.f32 %v2885_v18, 0.0  ;;  %v2547_v21 = vadd.f32 %v2503_v8, %v7986_v54  ;;  %v3823_v37 = vpack.c.b16 %v3809_v1, %v3808_v14  ;;  %v3987_v54 = vld [vmem:[#allocation3 + $0x10] sm:$0xf]  ;;  %5224 = vmatpush.bf16.msrb.mxu1 %v6681_v31 }
 0x173   : > { %v2992_v11 = vor.u32 %v2991_v20, %v2988_v47  ;;  %v8061_v61 = vadd.f32 %v2136_v6, %v7932_v60  ;;  %v3528_v41 = vunpack.c.l.b16 %v3374_v44  ;;  %v4029_v60 = vrot.slane %v7996_v51, 4 }
 0x174   : > { %v3379_v45 = vrot.slane %v3378_v59, 4  ;;  %v2917_v4 = vpack.c.bf16 %v2901_v5, %v2901_v5  ;;  %v2814_v43 = vadd.f32 %v8002_v16, %v2547_v21  ;;  %v6622_v39 = vld [vmem:[#allocation3 + $0x10] sm:$0xff]  ;;  %v4031_v14 = vshrl.u32 %v3986_v42, 16 }
 0x175   : > { %v2993_v48 = vsel %vm7057_vm9, %v2984_v29, %v2992_v11  ;;  %v2994_v10 = vrot.slane %v2992_v11, 4  ;;  %3899 = vmatmul.bf16.gmra.mxu1 %v3823_v37  ;;  %v4034_v22 = vshll.u32 %v3986_v42, 16  ;;  %v6673_v29 = vld [vmem:[%s8930_s4 + $0x168] sm:$0xff]  ;;  %v4041_v35 = vshrl.u32 %v3987_v54, 16  ;;  %v2138_v8 = vpop.f32.mrf.mxu0  ;;  %v3708_v21 = vld [vmem:[#allocation3 + $0x14] sm:$0xf] }
 0x176   : > { %3112 = vst [vmem:[#allocation3 + $0x18] sm:$0xf] %v2993_v48  ;;  %v3384_v19 = vsel %vm7114_vm1, %v3379_v45, %v8053_v26  ;;  %v2996_v25 = vshrl.u32 %v2917_v4, 16  ;;  %v2999_v40 = vshll.u32 %v2917_v4, 16  ;;  %v2866_v16 = vmul.f32 %v7809_v2, %v2814_v43  ;;  %3276 = vmatmul.bf16.gmra.mxu3 %v6622_v39  ;;  %4944 = vmatpush.bf16.msrb.mxu0 %v6673_v29  ;;  %v3114_v37 = vld [vmem:[#allocation3 + $0x20] sm:$0x3] }
 0x177   : > { %v3529_v38 = vunpack.c.l.b16 %v3384_v19  ;;  %v4033_v27 = vrot.slane %v4031_v14, 5  ;;  %v4036_v57 = vrot.slane %v4034_v22, 6  ;;  %v4044_v51 = vshll.u32 %v3987_v54, 16  ;;  %v3328_v29 = vld [vmem:[#allocation3 + $0x14] sm:$0xf] }
 0x178   : > { %v2998_v58 = vrot.slane %v2996_v25, 6  ;;  %v3001_v62 = vrot.slane %v2999_v40, 7  ;;  %v2886_v15 = vadd.f32 %v7817_v17, %v2866_v16  ;;  %v4043_v20 = vrot.slane %v4041_v35, 5  ;;  %v1882_v11 = vpop.f32.mrf.mxu3  ;;  %v6664_v25 = vld [vmem:[%s8930_s4 + $0x120] sm:$0xff] }
 0x179   : > { %v3543_v3 = vpack.c.b16 %v3529_v38, %v3528_v41  ;;  %v4037_v47 = vor.u32 %v4036_v57, %v4033_v27  ;;  %v4046_v18 = vrot.slane %v4044_v51, 6  ;;  %v2505_v1 = vpop.f32.mrf.mxu1  ;;  %v3752_v6 = vrot.slane %v3750_v34, 4  ;;  %v2775_v34 = vpop.f32.mrf.mxu2  ;;  %4557 = vmatpush.bf16.msrb.mxu3 %v6664_v25  ;;  %v3117_v51 = vld [vmem:[#allocation3 + $0x24] sm:$0xe] }
 0x17a   : > { %v3002_v44 = vor.u32 %v3001_v62, %v2998_v58  ;;  %v2902_v59 = vmax.f32 %v2886_v15, 0.0  ;;  %v2548_v5 = vadd.f32 %v2505_v1, %v8028_v33  ;;  %v8082_v32 = vadd.f32 %v2138_v8, %v7961_v49 }
 0x17b   : > { %3619 = vmatmul.bf16.gmra.mxu0 %v3543_v3  ;;  %v8085_v42 = vadd.f32 %v1882_v11, %v7887_v30  ;;  %v4038_v45 = vsel %vm7303_vm6, %v4029_v60, %v4037_v47  ;;  %v4039_v41 = vrot.slane %v4037_v47, 4  ;;  %v8089_v9 = vor.u32 %v4046_v18, %v4043_v20 }
 0x17c   : > { %v3003_v48 = vsel %vm7057_vm9, %v2994_v10, %v3002_v44  ;;  %v3004_v4 = vrot.slane %v3002_v44, 4  ;;  %v2918_v33 = vpack.c.bf16 %v2902_v59, %v2902_v59  ;;  %v4196_v43 = vunpack.c.l.b16 %v4038_v45 }
 0x17d   : > { %v8093_v49 = vld [vmem:[#allocation3 + $0x18] sm:$0xf]  ;;  %3113 = vst [vmem:[#allocation3 + $0x1c] sm:$0xf] %v3003_v48  ;;  %v4048_v30 = vsel %vm7303_vm6, %v4039_v41, %v8089_v9  ;;  %v2815_v39 = vadd.f32 %v8049_v63, %v2548_v5  ;;  %v3753_v54 = vrot.slane %v3708_v21, 5  ;;  %v3387_v38 = vrot.slane %v3385_v28, 4  ;;  %v2141_v3 = vpop.f32.mrf.mxu0 }
 0x17e   : > { %v3756_v19 = vrot.slane %v8093_v49, 5  ;;  %v3115_v60 = vsel %vm7757_vm15, %v3004_v4, %v3114_v37  ;;  %v3006_v14 = vshrl.u32 %v2918_v33, 16  ;;  %v3009_v10 = vshll.u32 %v2918_v33, 16  ;;  %v8120_v8 = vld [vmem:[#allocation3 + $0x18] sm:$0xf] }
 0x17f   : > { %v4197_v22 = vunpack.c.l.b16 %v4048_v30  ;;  %3116 = vst [vmem:[#allocation3 + $0x20] sm:$0x3] %v3115_v60  ;;  %v2867_v40 = vmul.f32 %v7809_v2, %v2815_v39  ;;  %v3754_v63 = vsel %vm7099_vm0, %v3752_v6, %v3753_v54  ;;  %v3755_v16 = vrot.slane %v3753_v54, 4  ;;  %v3988_v41 = vld [vmem:[#allocation3 + $0x14] sm:$0xf]  ;;  %v6672_v30 = vld [vmem:[%s8930_s4 + $0x160] sm:$0xff] }
 0x180   : > { %v3008_v31 = vrot.slane %v3006_v14, 6  ;;  %v3011_v27 = vrot.slane %v3009_v10, 7  ;;  %v3810_v35 = vunpack.c.l.b16 %v3754_v63  ;;  %v3388_v47 = vor.u32 %v3387_v38, %v8053_v26  ;;  %v3989_v48 = vld [vmem:[#allocation3 + $0x18] sm:$0xf]  ;;  %4945 = vmatpush.bf16.msrb.mxu0 %v6672_v30 }
 0x181   : > { %v4211_v57 = vpack.c.b16 %v4197_v22, %v4196_v43  ;;  %v2887_v58 = vadd.f32 %v7817_v17, %v2867_v40  ;;  %v2508_v62 = vpop.f32.mrf.mxu1  ;;  %v3757_v15 = vsel %vm7099_vm0, %v3755_v16, %v3756_v19  ;;  %v3391_v20 = vshll.u32 %v3328_v29, 16  ;;  %v2777_v4 = vpop.f32.mrf.mxu2 }
 0x182   : > { %v3012_v55 = vor.u32 %v3011_v27, %v3008_v31  ;;  %v2549_v28 = vadd.f32 %v2508_v62, %v8061_v61  ;;  %v3811_v18 = vunpack.c.l.b16 %v3757_v15  ;;  %v8118_v1 = vadd.f32 %v2141_v3, %v7983_v36 }
 0x183   : > { %4287 = vmatmul.bf16.gmra.mxu2 %v4211_v57  ;;  %v2903_v6 = vmax.f32 %v2887_v58, 0.0  ;;  %v3389_v44 = vrot.slane %v3388_v47, 4  ;;  %v3393_v59 = vrot.slane %v3391_v20, 5  ;;  %v3395_v11 = vshrl.u32 %v3328_v29, 16  ;;  %v6680_v29 = vld [vmem:[%s8930_s4 + $0x1a0] sm:$0xff] }
 0x184   : > { %v3013_v5 = vrot.slane %v3012_v55, 4  ;;  %v3118_v21 = vsel %vm7848_vm3, %v3012_v55, %v3117_v51  ;;  %v2816_v26 = vadd.f32 %v2775_v34, %v2549_v28  ;;  %v3824_v37 = vpack.c.b16 %v3811_v18, %v3810_v35  ;;  %v6623_v45 = vld [vmem:[#allocation3 + $0x18] sm:$0xff]  ;;  %5225 = vmatpush.bf16.msrb.mxu1 %v6680_v29 }
 0x185   : > { %3119 = vst [vmem:[#allocation3 + $0x24] sm:$0xe] %v3118_v21  ;;  %v2919_v61 = vpack.c.bf16 %v2903_v6, %v2903_v6  ;;  %v3394_v36 = vsel %vm7114_vm1, %v3389_v44, %v3393_v59  ;;  %v3397_v33 = vrot.slane %v3395_v11, 4  ;;  %v3401_v43 = vshll.u32 %v8120_v8, 16  ;;  %v2143_v35 = vpop.f32.mrf.mxu0 }
 0x186   : > { %v2868_v7 = vmul.f32 %v7809_v2, %v2816_v26  ;;  %3904 = vmatmul.bf16.gmra.mxu1 %v3824_v37  ;;  %v3405_v34 = vshrl.u32 %v8120_v8, 16  ;;  %v3530_v39 = vunpack.c.l.b16 %v3394_v36  ;;  %3281 = vmatmul.bf16.gmra.mxu3 %v6623_v45  ;;  %v4049_v54 = vrot.slane %v8089_v9, 4  ;;  %v3710_v26 = vld [vmem:[#allocation3 + $0x1c] sm:$0xf]  ;;  %v3711_v37 = vld [vmem:[#allocation3 + $0x20] sm:$0x1] }
 0x187   : > { %v3015_v60 = vshrl.u32 %v2919_v61, 16  ;;  %v3018_v14 = vshll.u32 %v2919_v61, 16  ;;  %v3398_v10 = vor.u32 %v3397_v33, %v3393_v59  ;;  %v8133_v22 = vrot.slane %v3401_v43, 5  ;;  %v3330_v61 = vld [vmem:[#allocation3 + $0x1c] sm:$0xf] }
 0x188   : > { %v2888_v25 = vadd.f32 %v7817_v17, %v2868_v7  ;;  %v4051_v40 = vshrl.u32 %v3988_v41, 16  ;;  %v4054_v63 = vshll.u32 %v3988_v41, 16  ;;  %v4061_v16 = vshrl.u32 %v3989_v48, 16 }
 0x189   : > { %v3017_v38 = vrot.slane %v3015_v60, 6  ;;  %v3020_v31 = vrot.slane %v3018_v14, 7  ;;  %v3399_v27 = vrot.slane %v3398_v10, 4  ;;  %v4064_v57 = vshll.u32 %v3989_v48, 16  ;;  %v2510_v9 = vpop.f32.mrf.mxu1  ;;  %v2780_v43 = vpop.f32.mrf.mxu2 }
 0x18a   : > { %v2904_v51 = vmax.f32 %v2888_v25, 0.0  ;;  %v4053_v58 = vrot.slane %v4051_v40, 5  ;;  %v4056_v62 = vrot.slane %v4054_v63, 6  ;;  %v4063_v15 = vrot.slane %v4061_v16, 5 }
 0x18b   : > { %v3021_v3 = vor.u32 %v3020_v31, %v3017_v38  ;;  %v3404_v47 = vsel %vm7114_vm1, %v3399_v27, %v8133_v22  ;;  %v4066_v20 = vrot.slane %v4064_v57, 6  ;;  %v2550_v55 = vadd.f32 %v2510_v9, %v8082_v32  ;;  %v3331_v9 = vld [vmem:[#allocation3 + $0x20] sm:$0x1] }
 0x18c   : > { %v2920_v28 = vpack.c.bf16 %v2904_v51, %v2904_v51  ;;  %v3531_v18 = vunpack.c.l.b16 %v3404_v47  ;;  %v4057_v8 = vor.u32 %v4056_v62, %v4053_v58  ;;  %v8144_v6 = vadd.f32 %v2143_v35, %v8025_v23 }
 0x18d   : > { %v3022_v44 = vsel %vm7057_vm9, %v3013_v5, %v3021_v3  ;;  %v3023_v59 = vrot.slane %v3021_v3, 4  ;;  %v8148_v11 = vor.u32 %v4066_v20, %v4063_v15  ;;  %v2817_v21 = vadd.f32 %v2777_v4, %v2550_v55  ;;  %v2146_v29 = vpop.f32.mrf.mxu0 }
 0x18e   : > { %3120 = vst [vmem:[#allocation3 + $0x28] sm:$0xf] %v3022_v44  ;;  %v3025_v45 = vshrl.u32 %v2920_v28, 16  ;;  %v3028_v41 = vshll.u32 %v2920_v28, 16  ;;  %v3544_v48 = vpack.c.b16 %v3531_v18, %v3530_v39  ;;  %v4058_v32 = vsel %vm7303_vm6, %v4049_v54, %v4057_v8  ;;  %v6663_v39 = vld [vmem:[%s8930_s4 + $0x118] sm:$0xff] }
 0x18f   : > { %v4059_v36 = vrot.slane %v4057_v8, 4  ;;  %v4198_v23 = vunpack.c.l.b16 %v4058_v32  ;;  %v2869_v33 = vmul.f32 %v7809_v2, %v2817_v21  ;;  %v3758_v5 = vrot.slane %v3756_v19, 4  ;;  %4558 = vmatpush.bf16.msrb.mxu3 %v6663_v39  ;;  %v3990_v18 = vld [vmem:[#allocation3 + $0x1c] sm:$0xf]  ;;  %v6671_v8 = vld [vmem:[%s8930_s4 + $0x158] sm:$0xff] }
 0x190   : > { %v3027_v30 = vrot.slane %v3025_v45, 6  ;;  %v3030_v4 = vrot.slane %v3028_v41, 7  ;;  %3624 = vmatmul.bf16.gmra.mxu0 %v3544_v48  ;;  %v3759_v7 = vrot.slane %v3710_v26, 5  ;;  %v3762_v60 = vrot.slane %v3711_v37, 5 }
 0x191   : > { %v4068_v54 = vsel %vm7303_vm6, %v4059_v36, %v8148_v11  ;;  %v2889_v14 = vadd.f32 %v7817_v17, %v2869_v33  ;;  %v2513_v10 = vpop.f32.mrf.mxu1  ;;  %v3407_v25 = vrot.slane %v3405_v34, 4  ;;  %v3411_v49 = vshll.u32 %v3330_v61, 16  ;;  %4946 = vmatpush.bf16.msrb.mxu0 %v6671_v8 }
 0x192   : > { %v3031_v19 = vor.u32 %v3030_v4, %v3027_v30  ;;  %v4199_v40 = vunpack.c.l.b16 %v4068_v54  ;;  %v2551_v63 = vadd.f32 %v2513_v10, %v8118_v1  ;;  %v3760_v16 = vsel %vm7099_vm0, %v3758_v5, %v3759_v7 }
 0x193   : > { %v2905_v38 = vmax.f32 %v2889_v14, 0.0  ;;  %v3761_v31 = vrot.slane %v3759_v7, 4  ;;  %v3812_v27 = vunpack.c.l.b16 %v3760_v16  ;;  %v8166_v57 = vadd.f32 %v2146_v29, %v8058_v53 }
 0x194   : > { %v3032_v35 = vsel %vm7057_vm9, %v3023_v59, %v3031_v19  ;;  %v3033_v34 = vrot.slane %v3031_v19, 4  ;;  %v4212_v51 = vpack.c.b16 %v4199_v40, %v4198_v23  ;;  %v2818_v58 = vadd.f32 %v2780_v43, %v2551_v63  ;;  %v6679_v63 = vld [vmem:[%s8930_s4 + $0x198] sm:$0xff] }
 0x195   : > { %3121 = vst [vmem:[#allocation3 + $0x2c] sm:$0xf] %v3032_v35  ;;  %v2921_v62 = vpack.c.bf16 %v2905_v38, %v2905_v38  ;;  %v3763_v1 = vsel %vm7099_vm0, %v3761_v31, %v3762_v60  ;;  %v3408_v15 = vor.u32 %v3407_v25, %v8133_v22  ;;  %v3413_v3 = vrot.slane %v3411_v49, 5  ;;  %v6624_v47 = vld [vmem:[#allocation3 + $0x24] sm:$0xff]  ;;  %v2148_v29 = vpop.f32.mrf.mxu0  ;;  %5226 = vmatpush.bf16.msrb.mxu1 %v6679_v63 }
 0x196   : > { %4292 = vmatmul.bf16.gmra.mxu2 %v4212_v51  ;;  %v2870_v53 = vmul.f32 %v7809_v2, %v2818_v58  ;;  %v3813_v20 = vunpack.c.l.b16 %v3763_v1  ;;  %v3415_v55 = vshrl.u32 %v3330_v61, 16  ;;  %v3421_v28 = vshll.u32 %v3331_v9, 16  ;;  %3286 = vmatmul.bf16.gmra.mxu3 %v6624_v47  ;;  %v3991_v2 = vld [vmem:[#allocation3 + $0x20] sm:$0x3]  ;;  %v2782_v61 = vpop.f32.mrf.mxu2  ;;  %v3712_v9 = vld [vmem:[#allocation3 + $0x24] sm:$0xe] }
 0x197   : > { %v3035_v44 = vshrl.u32 %v2921_v62, 16  ;;  %v3038_v59 = vshll.u32 %v2921_v62, 16  ;;  %v3409_v21 = vrot.slane %v3408_v15, 4  ;;  %v4069_v26 = vrot.slane %v8148_v11, 4  ;;  %v3713_v58 = vld [vmem:[#allocation3 + $0x28] sm:$0xf] }
 0x198   : > { %v2890_v22 = vadd.f32 %v7817_v17, %v2870_v53  ;;  %v3825_v37 = vpack.c.b16 %v3813_v20, %v3812_v27  ;;  %v3417_v45 = vrot.slane %v3415_v55, 4  ;;  %v3423_v41 = vrot.slane %v3421_v28, 5  ;;  %v3332_v62 = vld [vmem:[#allocation3 + $0x24] sm:$0xf]  ;;  %v8199_v28 = vld [vmem:[%s8928_s2] ss:$0 sm:$0xff] }
 0x199   : > { %v3037_v48 = vrot.slane %v3035_v44, 6  ;;  %v3040_v32 = vrot.slane %v3038_v59, 7  ;;  %v3414_v36 = vsel %vm7114_vm1, %v3409_v21, %v3413_v3  ;;  %v4071_v23 = vshrl.u32 %v3990_v18, 16  ;;  %v2515_v33 = vpop.f32.mrf.mxu1  ;;  %v3992_v63 = vld [vmem:[#allocation3 + $0x24] sm:$0xe] }
 0x19a   : > { %v2906_v43 = vmax.f32 %v2890_v22, 0.0  ;;  %3909 = vmatmul.bf16.gmra.mxu1 %v3825_v37  ;;  %v3418_v5 = vor.u32 %v3417_v45, %v3413_v3  ;;  %v3532_v30 = vunpack.c.l.b16 %v3414_v36  ;;  %v4074_v11 = vshll.u32 %v3990_v18, 16  ;;  %v8210_v37 = vld [vmem:[%s8929_s3] ss:$0 sm:$0xff] }
 0x19b   : > { %v3041_v4 = vor.u32 %v3040_v32, %v3037_v48  ;;  %v4073_v17 = vrot.slane %v4071_v23, 5  ;;  %v4081_v7 = vshrl.u32 %v3991_v2, 16  ;;  %v4084_v60 = vshll.u32 %v3991_v2, 16  ;;  %v3333_v48 = vld [vmem:[#allocation3 + $0x28] sm:$0xf] }
 0x19c   : > { %v2922_v39 = vpack.c.bf16 %v2906_v43, %v2906_v43  ;;  %v3419_v54 = vrot.slane %v3418_v5, 4  ;;  %v4076_v14 = vrot.slane %v4074_v11, 6  ;;  %v2552_v10 = vadd.f32 %v2515_v33, %v8144_v6  ;;  %v8194_v53 = vld [vmem:[#allocation3 + $0x2c] sm:$0xf] }
 0x19d   : > { %v3042_v25 = vsel %vm7057_vm9, %v3033_v34, %v3041_v4  ;;  %v3043_v49 = vrot.slane %v3041_v4, 4  ;;  %v4083_v19 = vrot.slane %v4081_v7, 5  ;;  %v4086_v40 = vrot.slane %v4084_v60, 6  ;;  %v8220_v33 = vld [vmem:[#allocation3 + $0x2c] sm:$0xf] }
 0x19e   : > { %3122 = vst [vmem:[#allocation3 + $0x30] sm:$0xf] %v3042_v25  ;;  %v3045_v16 = vshrl.u32 %v2922_v39, 16  ;;  %v3048_v38 = vshll.u32 %v2922_v39, 16  ;;  %v3424_v31 = vsel %vm7114_vm1, %v3419_v54, %v3423_v41  ;;  %v4077_v27 = vor.u32 %v4076_v14, %v4073_v17  ;;  %v2785_v41 = vpop.f32.mrf.mxu2 }
 0x19f   : > { %v3533_v6 = vunpack.c.l.b16 %v3424_v31  ;;  %v4087_v35 = vor.u32 %v4086_v40, %v4083_v19  ;;  %v2819_v51 = vadd.f32 %v2782_v61, %v2552_v10  ;;  %v8190_v34 = vadd.f32 %v2148_v29, %v8085_v42 }
 0x1a0   : > { %v3047_v1 = vrot.slane %v3045_v16, 6  ;;  %v3050_v15 = vrot.slane %v3048_v38, 7  ;;  %v4078_v3 = vsel %vm7303_vm6, %v4069_v26, %v4077_v27  ;;  %v4079_v47 = vrot.slane %v4077_v27, 4  ;;  %v6662_v16 = vld [vmem:[%s8930_s4 + $0x110] sm:$0xff] }
 0x1a1   : > { %v3545_v20 = vpack.c.b16 %v3533_v6, %v3532_v30  ;;  %v4200_v55 = vunpack.c.l.b16 %v4078_v3  ;;  %v2871_v42 = vmul.f32 %v8199_v28, %v2819_v51  ;;  %v2518_v18 = vpop.f32.mrf.mxu1  ;;  %v6275_v8 = vrot.slane %v3712_v9, 9  ;;  %v6670_v38 = vld [vmem:[%s8930_s4 + $0x150] sm:$0xff]  ;;  %4559 = vmatpush.bf16.msrb.mxu3 %v6662_v16 }
 0x1a2   : > { %v8202_v44 = vor.u32 %v3050_v15, %v3047_v1  ;;  %v4088_v59 = vsel %vm7303_vm6, %v4079_v47, %v4087_v35  ;;  %v2553_v21 = vadd.f32 %v2518_v18, %v8166_v57  ;;  %v3766_v26 = vrot.slane %v3713_v58, 5  ;;  %v3993_v35 = vld [vmem:[#allocation3 + $0x28] sm:$0xf]  ;;  %4947 = vmatpush.bf16.msrb.mxu0 %v6670_v38 }
 0x1a3   : > { %3629 = vmatmul.bf16.gmra.mxu0 %v3545_v20  ;;  %v4201_v22 = vunpack.c.l.b16 %v4088_v59  ;;  %v2891_v45 = vadd.f32 %v8210_v37, %v2871_v42  ;;  %v3769_v2 = vrot.slane %v8194_v53, 5  ;;  %v3426_v32 = vshrl.u32 %v3332_v62, 16 }
 0x1a4   : > { %v3052_v61 = vsel %vm7057_vm9, %v3043_v49, %v8202_v44  ;;  %v3053_v57 = vrot.slane %v8202_v44, 4  ;;  %v2820_v36 = vadd.f32 %v2785_v41, %v2553_v21  ;;  %v3767_v23 = vsel %vm7099_vm0, %v6275_v8, %v3766_v26  ;;  %v6678_v44 = vld [vmem:[%s8930_s4 + $0x190] sm:$0xff] }
 0x1a5   : > { %3123 = vst [vmem:[#allocation3 + $0x34] sm:$0xf] %v3052_v61  ;;  %v4213_v43 = vpack.c.b16 %v4201_v22, %v4200_v55  ;;  %v2907_v5 = vmax.f32 %v2891_v45, 0.0  ;;  %v3768_v30 = vrot.slane %v3766_v26, 4  ;;  %v3814_v11 = vunpack.c.l.b16 %v3767_v23  ;;  %v6625_v4 = vld [vmem:[#allocation3 + $0x2c] sm:$0xff]  ;;  %v6661_v45 = vld [vmem:[%s8930_s4 + $0x108] sm:$0xff]  ;;  %5227 = vmatpush.bf16.msrb.mxu1 %v6678_v44 }
 0x1a6   : > { %v2872_v17 = vmul.f32 %v8199_v28, %v2820_v36  ;;  %v3428_v7 = vrot.slane %v3426_v32, 4  ;;  %v3429_v60 = vshll.u32 %v3332_v62, 16  ;;  %v3435_v39 = vshll.u32 %v3333_v48, 16  ;;  %3291 = vmatmul.bf16.gmra.mxu3 %v6625_v4  ;;  %v3994_v61 = vld [vmem:[#allocation3 + $0x2c] sm:$0xf] }
 0x1a7   : > { %4297 = vmatmul.bf16.gmra.mxu2 %v4213_v43  ;;  %v2923_v54 = vpack.c.bf16 %v2907_v5, %v2907_v5  ;;  %v3770_v14 = vsel %vm7099_vm0, %v3768_v30, %v3769_v2  ;;  %v3439_v10 = vshrl.u32 %v3333_v48, 16  ;;  %v3445_v29 = vshll.u32 %v8220_v33, 16  ;;  %4560 = vmatpush.bf16.msrb.mxu3 %v6661_v45 }
 0x1a8   : > { %v2892_v25 = vadd.f32 %v8210_v37, %v2872_v17  ;;  %v3815_v49 = vunpack.c.l.b16 %v3770_v14  ;;  %v3431_v19 = vrot.slane %v3429_v60, 5  ;;  %v3437_v40 = vrot.slane %v3435_v39, 5 }
 0x1a9   : > { %v3055_v31 = vshrl.u32 %v2923_v54, 16  ;;  %v3058_v27 = vshll.u32 %v2923_v54, 16  ;;  %v3441_v9 = vrot.slane %v3439_v10, 4  ;;  %v8235_v6 = vrot.slane %v3445_v29, 5  ;;  %v2520_v39 = vpop.f32.mrf.mxu1 }
 0x1aa   : > { %v2908_v51 = vmax.f32 %v2892_v25, 0.0  ;;  %v3826_v58 = vpack.c.b16 %v3815_v49, %v3814_v11  ;;  %v3432_v62 = vor.u32 %v3431_v19, %v3428_v7  ;;  %v3449_v1 = vshrl.u32 %v8220_v33, 16  ;;  %v504_v11 = vld [vmem:[#allocation3 + $0x44] sm:$0x6]  ;;  %v3715_v25 = vld [vmem:[#allocation3 + $0x30] sm:$0xf] }
 0x1ab   : > { %v3057_v15 = vrot.slane %v3055_v31, 6  ;;  %v3060_v3 = vrot.slane %v3058_v27, 7  ;;  %v3442_v47 = vor.u32 %v3441_v9, %v3437_v40  ;;  %v4090_v20 = vshrl.u32 %v3992_v63, 16 }
 0x1ac   : > { %v2924_v55 = vpack.c.bf16 %v2908_v51, %v2908_v51  ;;  %3914 = vmatmul.bf16.gmra.mxu1 %v3826_v58  ;;  %v3433_v42 = vrot.slane %v3432_v62, 4  ;;  %v4093_v18 = vshll.u32 %v3992_v63, 16  ;;  %v4099_v8 = vshrl.u32 %v3993_v35, 16  ;;  %v8256_v27 = vld [vmem:[#allocation3 + $0x34] sm:$0xf] }
 0x1ad   : > { %v3061_v59 = vor.u32 %v3060_v3, %v3057_v15  ;;  %v3443_v21 = vrot.slane %v3442_v47, 4  ;;  %v4092_v26 = vrot.slane %v4090_v20, 5  ;;  %v4102_v22 = vshll.u32 %v3993_v35, 16  ;;  %v2787_v35 = vpop.f32.mrf.mxu2  ;;  %v3335_v3 = vld [vmem:[#allocation3 + $0x30] sm:$0xf]  ;;  %v6669_v47 = vld [vmem:[%s8930_s4 + $0x148] sm:$0xff] }
 0x1ae   : > { %v3065_v41 = vshrl.u32 %v2924_v55, 16  ;;  %v3068_v48 = vshll.u32 %v2924_v55, 16  ;;  %v3438_v32 = vsel %vm7114_vm1, %v3433_v42, %v3437_v40  ;;  %v4095_v36 = vrot.slane %v4093_v18, 6  ;;  %v8273_v42 = vld [vmem:[#allocation3 + $0x34] sm:$0xf]  ;;  %4948 = vmatpush.bf16.msrb.mxu0 %v6669_v47 }
 0x1af   : > { %v3062_v23 = vsel %vm7057_vm9, %v3053_v57, %v3061_v59  ;;  %v3063_v43 = vrot.slane %v3061_v59, 4  ;;  %v3448_v5 = vsel %vm7114_vm1, %v3443_v21, %v8235_v6  ;;  %v3534_v30 = vunpack.c.l.b16 %v3438_v32 }
 0x1b0   : > { %3124 = vst [vmem:[#allocation3 + $0x38] sm:$0xf] %v3062_v23  ;;  %v3067_v4 = vrot.slane %v3065_v41, 6  ;;  %v3070_v17 = vrot.slane %v3068_v48, 7  ;;  %v3535_v7 = vunpack.c.l.b16 %v3448_v5  ;;  %v4096_v60 = vor.u32 %v4095_v36, %v4092_v26  ;;  %v3996_v5 = vld [vmem:[#allocation3 + $0x34] sm:$0xf] }
 0x1b1   : > { %v4101_v54 = vrot.slane %v4099_v8, 5  ;;  %v4104_v14 = vrot.slane %v4102_v22, 6  ;;  %v4109_v10 = vshrl.u32 %v3994_v61, 16  ;;  %v4112_v29 = vshll.u32 %v3994_v61, 16 }
 0x1b2   : > { %v8251_v57 = vor.u32 %v3070_v17, %v3067_v4  ;;  %v3546_v49 = vpack.c.b16 %v3535_v7, %v3534_v30  ;;  %v4097_v19 = vrot.slane %v4096_v60, 4  ;;  %v505_v40 = vsel %vm8011_vm7, 0, %v504_v11 }
 0x1b3   : > { %v4105_v63 = vor.u32 %v4104_v14, %v4101_v54  ;;  %v4111_v16 = vrot.slane %v4109_v10, 5  ;;  %v4114_v38 = vrot.slane %v4112_v29, 6  ;;  %506 = vst [vmem:[#allocation3 + $0x44] sm:$0x6] %v505_v40  ;;  %v2554_v31 = vadd.f32 %v2520_v39, %v8190_v34  ;;  %v6677_v39 = vld [vmem:[%s8930_s4 + $0x188] sm:$0xff] }
 0x1b4   : > { %v3072_v9 = vsel %vm7057_vm9, %v3063_v43, %v8251_v57  ;;  %3634 = vmatmul.bf16.gmra.mxu0 %v3546_v49  ;;  %v3771_v51 = vrot.slane %v3769_v2, 4  ;;  %v3772_v58 = vrot.slane %v3715_v25, 5  ;;  %v3775_v2 = vrot.slane %v8256_v27, 5  ;;  %5228 = vmatpush.bf16.msrb.mxu1 %v6677_v39 }
 0x1b5   : > { %3125 = vst [vmem:[#allocation3 + $0x3c] sm:$0xf] %v3072_v9  ;;  %v4106_v13 = vsel %vm7303_vm6, %v4097_v19, %v4105_v63  ;;  %v4107_v62 = vrot.slane %v4105_v63, 4  ;;  %v8265_v15 = vor.u32 %v4114_v38, %v4111_v16  ;;  %v2821_v34 = vadd.f32 %v2787_v35, %v2554_v31  ;;  %v6660_v16 = vld [vmem:[%s8930_s4 + $0x100] sm:$0xff] }
 0x1b6   : > { %v4202_v20 = vunpack.c.l.b16 %v4106_v13  ;;  %v3773_v55 = vsel %vm7099_vm0, %v3771_v51, %v3772_v58  ;;  %v3774_v53 = vrot.slane %v3772_v58, 4  ;;  %v3451_v59 = vrot.slane %v3449_v1, 4  ;;  %4561 = vmatpush.bf16.msrb.mxu3 %v6660_v16 }
 0x1b7   : > { %v4116_v18 = vsel %vm7303_vm6, %v4107_v62, %v8265_v15  ;;  %v2873_v8 = vmul.f32 %v8199_v28, %v2821_v34  ;;  %v3816_v44 = vunpack.c.l.b16 %v3773_v55  ;;  %v6626_v21 = vld [vmem:[#allocation3 + $0x34] sm:$0xff]  ;;  %v3455_v45 = vshll.u32 %v3335_v3, 16  ;;  %v3995_v28 = vld [vmem:[#allocation3 + $0x30] sm:$0xf] }
 0x1b8   : > { %v4203_v26 = vunpack.c.l.b16 %v4116_v18  ;;  %v3776_v22 = vsel %vm7099_vm0, %v3774_v53, %v3775_v2  ;;  %v3459_v41 = vshrl.u32 %v3335_v3, 16  ;;  %v3452_v61 = vor.u32 %v3451_v59, %v8235_v6  ;;  %3296 = vmatmul.bf16.gmra.mxu3 %v6626_v21  ;;  %v3717_v25 = vld [vmem:[#allocation3 + $0x38] sm:$0xf] }
 0x1b9   : > { %v2893_v48 = vadd.f32 %v8210_v37, %v2873_v8  ;;  %v3817_v32 = vunpack.c.l.b16 %v3776_v22  ;;  %v3465_v36 = vshll.u32 %v8273_v42, 16  ;;  %v3457_v33 = vrot.slane %v3455_v45, 5 }
 0x1ba   : > { %v4214_v23 = vpack.c.b16 %v4203_v26, %v4202_v20  ;;  %v3461_v1 = vrot.slane %v3459_v41, 4  ;;  %v3469_v43 = vshrl.u32 %v8273_v42, 16  ;;  %v3453_v4 = vrot.slane %v3452_v61, 4  ;;  %v3337_v20 = vld [vmem:[#allocation3 + $0x38] sm:$0xf] }
 0x1bb   : > { %v2909_v30 = vmax.f32 %v2893_v48, 0.0  ;;  %v3827_v11 = vpack.c.b16 %v3817_v32, %v3816_v44  ;;  %v8287_v17 = vrot.slane %v3465_v36, 5  ;;  %v4117_v7 = vrot.slane %v8265_v15, 4  ;;  %v3127_v21 = vld [vmem:[#allocation3 + $0x44] sm:$0x3] }
 0x1bc   : > { %4302 = vmatmul.bf16.gmra.mxu2 %v4214_v23  ;;  %v3462_v37 = vor.u32 %v3461_v1, %v3457_v33  ;;  %v4119_v6 = vshrl.u32 %v3995_v28, 16  ;;  %v4122_v60 = vshll.u32 %v3995_v28, 16  ;;  %v3458_v14 = vsel %vm7114_vm1, %v3453_v4, %v3457_v33  ;;  %v8301_v58 = vld [vmem:[#allocation3 + $0x3c] sm:$0xf]  ;;  %v3997_v28 = vld [vmem:[#allocation3 + $0x38] sm:$0xf] }
 0x1bd   : > { %v2925_v54 = vpack.c.bf16 %v2909_v30, %v2909_v30  ;;  %3919 = vmatmul.bf16.gmra.mxu1 %v3827_v11  ;;  %v4129_v10 = vshrl.u32 %v3996_v5, 16  ;;  %v4132_v29 = vshll.u32 %v3996_v5, 16  ;;  %v3536_v19 = vunpack.c.l.b16 %v3458_v14  ;;  %v8314_v45 = vld [vmem:[#allocation3 + $0x3c] sm:$0xf] }
 0x1be   : > { %v3463_v49 = vrot.slane %v3462_v37, 4  ;;  %v4121_v40 = vrot.slane %v4119_v6, 5  ;;  %v4124_v63 = vrot.slane %v4122_v60, 6  ;;  %v3777_v13 = vrot.slane %v3775_v2, 4  ;;  %v6668_v23 = vld [vmem:[%s8930_s4 + $0x140] sm:$0xff] }
 0x1bf   : > { %v3075_v38 = vshrl.u32 %v2925_v54, 16  ;;  %v3078_v31 = vshll.u32 %v2925_v54, 16  ;;  %v4131_v27 = vrot.slane %v4129_v10, 5  ;;  %v4134_v9 = vrot.slane %v4132_v29, 6  ;;  %v3998_v30 = vld [vmem:[#allocation3 + $0x3c] sm:$0xf]  ;;  %4949 = vmatpush.bf16.msrb.mxu0 %v6668_v23 }
 0x1c0   : > { %v3468_v35 = vsel %vm7114_vm1, %v3463_v49, %v8287_v17  ;;  %v4125_v51 = vor.u32 %v4124_v63, %v4121_v40  ;;  %v3778_v62 = vrot.slane %v3717_v25, 5  ;;  %v3073_v55 = vrot.slane %v8251_v57, 4 }
 0x1c1   : > { %v3077_v15 = vrot.slane %v3075_v38, 6  ;;  %v3080_v34 = vrot.slane %v3078_v31, 7  ;;  %v3537_v3 = vunpack.c.l.b16 %v3468_v35  ;;  %v8303_v47 = vor.u32 %v4134_v9, %v4131_v27  ;;  %v4372_v38 = vld [vmem:[#allocation3 + $0x4] sm:$0xf]  ;;  %v6676_v31 = vld [vmem:[%s8930_s4 + $0x180] sm:$0xff] }
 0x1c2   : > { %v4126_v53 = vsel %vm7303_vm6, %v4117_v7, %v4125_v51  ;;  %v4127_v42 = vrot.slane %v4125_v51, 4  ;;  %v3779_v18 = vsel %vm7099_vm0, %v3777_v13, %v3778_v62  ;;  %v3780_v2 = vrot.slane %v3778_v62, 4  ;;  %5229 = vmatpush.bf16.msrb.mxu1 %v6676_v31 }
 0x1c3   : > { %v3081_v8 = vor.u32 %v3080_v34, %v3077_v15  ;;  %v3547_v44 = vpack.c.b16 %v3537_v3, %v3536_v19  ;;  %v3781_v59 = vrot.slane %v8301_v58, 5  ;;  %v4204_v22 = vunpack.c.l.b16 %v4126_v53  ;;  %v8342_v3 = vld [vmem:[#allocation3 + $0x8] sm:$0xf] }
 0x1c4   : > { %v4136_v26 = vsel %vm7303_vm6, %v4127_v42, %v8303_v47  ;;  %v3471_v57 = vrot.slane %v3469_v43, 4  ;;  %v3475_v41 = vshll.u32 %v3337_v20, 16  ;;  %v3479_v5 = vshrl.u32 %v3337_v20, 16 }
 0x1c5   : > { %v3082_v48 = vsel %vm7057_vm9, %v3073_v55, %v3081_v8  ;;  %v3083_v32 = vrot.slane %v3081_v8, 4  ;;  %3639 = vmatmul.bf16.gmra.mxu0 %v3547_v44  ;;  %v4205_v61 = vunpack.c.l.b16 %v4136_v26  ;;  %v3782_v36 = vsel %vm7099_vm0, %v3780_v2, %v3781_v59 }
 0x1c6   : > { %3126 = vst [vmem:[#allocation3 + $0x40] sm:$0xf] %v3082_v48  ;;  %v3819_v33 = vunpack.c.l.b16 %v3782_v36  ;;  %v3472_v1 = vor.u32 %v3471_v57, %v8287_v17  ;;  %v3477_v43 = vrot.slane %v3475_v41, 5  ;;  %v3818_v4 = vunpack.c.l.b16 %v3779_v18 }
 0x1c7   : > { %v3128_v11 = vsel %vm7757_vm15, %v3083_v32, %v3127_v21  ;;  %v3485_v37 = vshll.u32 %v8314_v45, 16  ;;  %v4215_v7 = vpack.c.b16 %v4205_v61, %v4204_v22  ;;  %v3481_v6 = vrot.slane %v3479_v5, 4 }
 0x1c8   : > { %3129 = vst [vmem:[#allocation3 + $0x44] sm:$0x3] %v3128_v11  ;;  %v3828_v60 = vpack.c.b16 %v3819_v33, %v3818_v4  ;;  %v4139_v39 = vshrl.u32 %v3997_v28, 16  ;;  %v4142_v54 = vshll.u32 %v3997_v28, 16  ;;  %v4149_v14 = vshrl.u32 %v3998_v30, 16 }
 0x1c9   : > { %v3473_v10 = vrot.slane %v3472_v1, 4  ;;  %v3482_v29 = vor.u32 %v3481_v6, %v3477_v43  ;;  %v8329_v17 = vrot.slane %v3485_v37, 5  ;;  %v4152_v25 = vshll.u32 %v3998_v30, 16 }
 0x1ca   : > { %v4141_v49 = vrot.slane %v4139_v39, 5  ;;  %v4144_v19 = vrot.slane %v4142_v54, 6  ;;  %v4151_v52 = vrot.slane %v4149_v14, 5  ;;  %v3489_v62 = vshrl.u32 %v8314_v45, 16 }
 0x1cb   : > { %v3478_v40 = vsel %vm7114_vm1, %v3473_v10, %v3477_v43  ;;  %v3483_v63 = vrot.slane %v3482_v29, 4  ;;  %v4154_v16 = vrot.slane %v4152_v25, 6  ;;  %v4137_v8 = vrot.slane %v8303_v47, 4  ;;  %v4371_v47 = vld [vmem:[#allocation3] sm:$0xc] }
 0x1cc   : > { %4307 = vmatmul.bf16.gmra.mxu2 %v4215_v7  ;;  %v4145_v9 = vor.u32 %v4144_v19, %v4141_v49  ;;  %v3538_v20 = vunpack.c.l.b16 %v3478_v40  ;;  %v4409_v21 = vrot.slane %v4372_v38, 6  ;;  %v4412_v45 = vrot.slane %v8342_v3, 6  ;;  %v5040_v38 = vld [vmem:[#allocation3 + $0x4] sm:$0xf] }
 0x1cd   : > { %3924 = vmatmul.bf16.gmra.mxu1 %v3828_v60  ;;  %v6627_v27 = vld [vmem:[#allocation3 + $0x3c] sm:$0xff]  ;;  %v3488_v13 = vsel %vm7114_vm1, %v3483_v63, %v8329_v17  ;;  %v8340_v15 = vor.u32 %v4154_v16, %v4151_v52  ;;  %v3783_v61 = vrot.slane %v3781_v59, 4  ;;  %v3491_v33 = vrot.slane %v3489_v62, 4 }
 0x1ce   : > { %v3719_v35 = vld [vmem:[#allocation3 + $0x40] sm:$0xf]  ;;  %v3539_v55 = vunpack.c.l.b16 %v3488_v13  ;;  %3301 = vmatmul.bf16.gmra.mxu3 %v6627_v27  ;;  %v4147_v53 = vrot.slane %v4145_v9, 4  ;;  %v4146_v57 = vsel %vm7303_vm6, %v4137_v8, %v4145_v9  ;;  %v4411_v43 = vrot.slane %v4409_v21, 4  ;;  %v4652_v13 = vld [vmem:[#allocation3 + $0x4] sm:$0xf] }
 0x1cf   : > { %v3339_v51 = vld [vmem:[#allocation3 + $0x40] sm:$0xf]  ;;  %v3784_v34 = vrot.slane %v3719_v35, 5  ;;  %v3720_v42 = vld [vmem:[#allocation3 + $0x44] sm:$0x1]  ;;  %v4206_v30 = vunpack.c.l.b16 %v4146_v57  ;;  %v6372_v37 = vrot.slane %v4371_v47, 10  ;;  %v3492_v56 = vor.u32 %v3491_v33, %v8329_v17 }
 0x1d0   : > { %v3495_v18 = vshll.u32 %v3339_v51, 16  ;;  %v3787_v2 = vrot.slane %v3720_v42, 5  ;;  %v3548_v26 = vpack.c.b16 %v3539_v55, %v3538_v20  ;;  %v4156_v22 = vsel %vm7303_vm6, %v4147_v53, %v8340_v15  ;;  %v3340_v36 = vld [vmem:[#allocation3 + $0x44] sm:$0x1]  ;;  %v3999_v28 = vld [vmem:[#allocation3 + $0x40] sm:$0xf] }
 0x1d1   : > { %v3786_v44 = vrot.slane %v3784_v34, 4  ;;  %v3499_v32 = vshrl.u32 %v3339_v51, 16  ;;  %v4207_v23 = vunpack.c.l.b16 %v4156_v22  ;;  %v4000_v5 = vld [vmem:[#allocation3 + $0x44] sm:$0x3]  ;;  %v3785_v11 = vsel %vm7099_vm0, %v3783_v61, %v3784_v34  ;;  %v8367_v51 = vld [vmem:[#allocation3 + $0x8] sm:$0xf] }
 0x1d2   : > { %v8353_v48 = vrot.slane %v3495_v18, 5  ;;  %v3505_v6 = vshll.u32 %v3340_v36, 16  ;;  %v4413_v58 = vsel %vm7383_vm14, %v4411_v43, %v4412_v45  ;;  %v4159_v59 = vshrl.u32 %v3999_v28, 16  ;;  %v4651_v34 = vld [vmem:[#allocation3] sm:$0xc] }
 0x1d3   : > { %v3788_v41 = vsel %vm7099_vm0, %v3786_v44, %v3787_v2  ;;  %v3501_v1 = vrot.slane %v3499_v32, 4  ;;  %v4410_v60 = vsel %vm7383_vm14, %v6372_v37, %v4409_v21  ;;  %v4162_v39 = vshll.u32 %v3999_v28, 16  ;;  %v4653_v53 = vld [vmem:[#allocation3 + $0x8] sm:$0xf]  ;;  %v4374_v2 = vld [vmem:[#allocation3 + $0xc] sm:$0xf] }
 0x1d4   : > { %v3821_v4 = vunpack.c.l.b16 %v3788_v41  ;;  %v4169_v54 = vshrl.u32 %v4000_v5, 16  ;;  %v4172_v14 = vshll.u32 %v4000_v5, 16  ;;  %v4216_v10 = vpack.c.b16 %v4207_v23, %v4206_v30  ;;  %v5039_v57 = vld [vmem:[#allocation3] sm:$0x8]  ;;  %v8375_v32 = vld [vmem:[#allocation3 + $0x10] sm:$0xf] }
 0x1d5   : > { %3644 = vmatmul.bf16.gmra.mxu0 %v3548_v26  ;;  %v3502_v7 = vor.u32 %v3501_v1, %v8353_v48  ;;  %v4161_v25 = vrot.slane %v4159_v59, 5  ;;  %v3820_v49 = vunpack.c.l.b16 %v3785_v11  ;;  %v4475_v19 = vunpack.c.l.b16 %v4413_v58  ;;  %v5056_v24 = vld [vmem:[#allocation3 + $0x44] sm:$0x7] }
 0x1d6   : > { %v4164_v52 = vrot.slane %v4162_v39, 6  ;;  %v3507_v63 = vrot.slane %v3505_v6, 5  ;;  %v4474_v16 = vunpack.c.l.b16 %v4410_v60  ;;  %v4171_v9 = vrot.slane %v4169_v54, 5 }
 0x1d7   : > { %v3503_v29 = vrot.slane %v3502_v7, 4  ;;  %v3829_v31 = vpack.c.b16 %v3821_v4, %v3820_v49  ;;  %v4174_v35 = vrot.slane %v4172_v14, 6  ;;  %v3493_v62 = vrot.slane %v3492_v56, 4 }
 0x1d8   : > { %v3267_v40 = vpop.f32.mrf.mxu3  ;;  %v4165_v27 = vor.u32 %v4164_v52, %v4161_v25  ;;  %v4490_v20 = vpack.c.b16 %v4475_v19, %v4474_v16  ;;  %v5077_v55 = vrot.slane %v5040_v38, 7  ;;  %v5080_v18 = vrot.slane %v8367_v51, 7 }
 0x1d9   : > { %v3508_v17 = vsel %vm7114_vm1, %v3503_v29, %v3507_v63  ;;  %v3498_v42 = vsel %vm7114_vm1, %v3493_v62, %v8353_v48  ;;  %v4679_v8 = vshrl.u32 %v4652_v13, 16  ;;  %v4682_v44 = vshll.u32 %v4652_v13, 16  ;;  %v5042_v62 = vld [vmem:[#allocation3 + $0xc] sm:$0xf] }
 0x1da   : > { %v3541_v21 = vunpack.c.l.b16 %v3508_v17  ;;  %v4167_v26 = vrot.slane %v4165_v27, 4  ;;  %v4175_v22 = vor.u32 %v4174_v35, %v4171_v9  ;;  %v4670_v41 = vshrl.u32 %v4651_v34, 16  ;;  %v4654_v17 = vld [vmem:[#allocation3 + $0xc] sm:$0xf] }
 0x1db   : > { %v4673_v47 = vshll.u32 %v4651_v34, 16  ;;  %v4689_v61 = vshrl.u32 %v4653_v53, 16  ;;  %v4692_v36 = vshll.u32 %v4653_v53, 16  ;;  %v3540_v28 = vunpack.c.l.b16 %v3498_v42  ;;  %v8402_v53 = vld [vmem:[#allocation3 + $0x10] sm:$0xf] }
 0x1dc   : > { %4312 = vmatmul.bf16.gmra.mxu2 %v4216_v10  ;;  %v4157_v12 = vrot.slane %v8340_v15, 4  ;;  %v5079_v33 = vrot.slane %v5077_v55, 4  ;;  %v4415_v1 = vrot.slane %v4374_v2, 6  ;;  %v6470_v43 = vrot.slane %v5039_v57, 11  ;;  %v4376_v2 = vld [vmem:[#allocation3 + $0x14] sm:$0xf] }
 0x1dd   : > { %3929 = vmatmul.bf16.gmra.mxu1 %v3829_v31  ;;  %v4681_v5 = vrot.slane %v4679_v8, 6  ;;  %v4684_v30 = vrot.slane %v4682_v44, 7  ;;  %v4418_v11 = vrot.slane %v8375_v32, 6  ;;  %v3549_v4 = vpack.c.b16 %v3541_v21, %v3540_v28  ;;  %v4655_v44 = vld [vmem:[#allocation3 + $0x10] sm:$0xf] }
 0x1de   : > { %4562 = vmatmul.bf16.vlgmr.msrb.gmra.mxu3 %v4490_v20  ;;  %v4176_v37 = vsel %vm7303_vm6, %v4167_v26, %v4175_v22  ;;  %v5081_v7 = vsel %vm7367_vm10, %v5079_v33, %v5080_v18  ;;  %v4672_v6 = vrot.slane %v4670_v41, 6  ;;  %v4675_v58 = vrot.slane %v4673_v47, 7  ;;  %v8409_v28 = vld [vmem:[#allocation3 + $0x18] sm:$0xf] }
 0x1df   : > { %v4691_v59 = vrot.slane %v4689_v61, 6  ;;  %v4694_v60 = vrot.slane %v4692_v36, 7  ;;  %v4417_v39 = vrot.slane %v4415_v1, 4  ;;  %v4166_v54 = vsel %vm7303_vm6, %v4157_v12, %v4165_v27 }
 0x1e0   : > { %v3269_v23 = vpop.f32.mrf.mxu3  ;;  %v5078_v10 = vsel %vm7367_vm10, %v6470_v43, %v5077_v55  ;;  %v4209_v56 = vunpack.c.l.b16 %v4176_v37  ;;  %v4685_v29 = vor.u32 %v4684_v30, %v4681_v5  ;;  %v4414_v25 = vrot.slane %v4412_v45, 4 }
 0x1e1   : > { %v4419_v49 = vsel %vm7383_vm14, %v4417_v39, %v4418_v11  ;;  %v5143_v19 = vunpack.c.l.b16 %v5081_v7  ;;  %v4208_v63 = vunpack.c.l.b16 %v4166_v54  ;;  %v4676_v16 = vor.u32 %v4675_v58, %v4672_v6 }
 0x1e2   : > { %v3895_v48 = vpop.f32.mrf.mxu1  ;;  %v8395_v46 = vor.u32 %v4694_v60, %v4691_v59  ;;  %v5142_v38 = vunpack.c.l.b16 %v5078_v10  ;;  %v4477_v31 = vunpack.c.l.b16 %v4419_v49  ;;  %v4687_v45 = vrot.slane %v4685_v29, 4 }
 0x1e3   : > { %v4217_v3 = vpack.c.b16 %v4209_v56, %v4208_v63  ;;  %v4677_v34 = vrot.slane %v4676_v16, 4  ;;  %v5083_v26 = vrot.slane %v5042_v62, 7  ;;  %v4699_v22 = vshrl.u32 %v4654_v17, 16  ;;  %v8440_v62 = vld [vmem:[#allocation3 + $0x18] sm:$0xf] }
 0x1e4   : > { %v3615_v15 = vpop.f32.mrf.mxu0  ;;  %v5158_v35 = vpack.c.b16 %v5143_v19, %v5142_v38  ;;  %v4696_v20 = vsel %vm7057_vm9, %v4687_v45, %v8395_v46  ;;  %v4702_v57 = vshll.u32 %v4654_v17, 16  ;;  %v5086_v36 = vrot.slane %v8402_v53, 7  ;;  %v4656_v38 = vld [vmem:[#allocation3 + $0x14] sm:$0xf]  ;;  %v4378_v45 = vld [vmem:[#allocation3 + $0x1c] sm:$0xf] }
 0x1e5   : > { %3649 = vmatmul.bf16.gmra.mxu0 %v3549_v4  ;;  %v3671_v14 = vadd.f32 %v3615_v15, %v3267_v40  ;;  %v4416_v40 = vsel %vm7383_vm14, %v4414_v25, %v4415_v1  ;;  %v4686_v21 = vsel %vm7057_vm9, %v4677_v34, %v4685_v29  ;;  %v4863_v41 = vunpack.c.l.b16 %v4696_v20  ;;  %v4657_v34 = vld [vmem:[#allocation3 + $0x18] sm:$0xf] }
 0x1e6   : > { %v4476_v13 = vunpack.c.l.b16 %v4416_v40  ;;  %v4421_v33 = vrot.slane %v4376_v2, 6  ;;  %v4862_v1 = vunpack.c.l.b16 %v4686_v21  ;;  %v5085_v30 = vrot.slane %v5083_v26, 4  ;;  %v5044_v40 = vld [vmem:[#allocation3 + $0x14] sm:$0xf] }
 0x1e7   : > { %v3951_v52 = vadd.f32 %v3895_v48, %v3671_v14  ;;  %v4709_v48 = vshrl.u32 %v4655_v44, 16  ;;  %v4701_v4 = vrot.slane %v4699_v22, 6  ;;  %v4704_v37 = vrot.slane %v4702_v57, 7 }
 0x1e8   : > { %v4491_v42 = vpack.c.b16 %v4477_v31, %v4476_v13  ;;  %v4424_v7 = vrot.slane %v8409_v28, 6  ;;  %v4878_v6 = vpack.c.b16 %v4863_v41, %v4862_v1  ;;  %v5082_v15 = vrot.slane %v5080_v18, 4  ;;  %v5047_v28 = vld [vmem:[#allocation3 + $0x20] sm:$0x7] }
 0x1e9   : > { %v3272_v9 = vpop.f32.mrf.mxu3  ;;  %v5087_v58 = vsel %vm7367_vm10, %v5085_v30, %v5086_v36  ;;  %v4711_v59 = vrot.slane %v4709_v48, 6  ;;  %v4423_v39 = vrot.slane %v4421_v33, 4  ;;  %v4705_v14 = vor.u32 %v4704_v37, %v4701_v4 }
 0x1ea   : > { %v3897_v27 = vpop.f32.mrf.mxu1  ;;  %v5084_v54 = vsel %vm7367_vm10, %v5082_v15, %v5083_v26  ;;  %v4420_v10 = vrot.slane %v4418_v11, 4  ;;  %v5145_v56 = vunpack.c.l.b16 %v5087_v58  ;;  %v5089_v17 = vrot.slane %v5044_v40, 7 }
 0x1eb   : > { %v4425_v51 = vsel %vm7383_vm14, %v4423_v39, %v4424_v7  ;;  %v5144_v19 = vunpack.c.l.b16 %v5084_v54  ;;  %v4707_v32 = vrot.slane %v4705_v14, 4  ;;  %v4719_v20 = vshrl.u32 %v4656_v38, 16 }
 0x1ec   : > { %4317 = vmatmul.bf16.gmra.mxu2 %v4217_v3  ;;  %v3617_v55 = vpop.f32.mrf.mxu0  ;;  %v4422_v49 = vsel %vm7383_vm14, %v4420_v10, %v4421_v33  ;;  %v5092_v26 = vrot.slane %v8440_v62, 7  ;;  %v4729_v22 = vshrl.u32 %v4657_v34, 16  ;;  %v4732_v57 = vshll.u32 %v4657_v34, 16 }
 0x1ed   : > { %5230 = vmatmul.bf16.vlgmr.msrb.gmra.mxu1 %v5158_v35  ;;  %v3672_v8 = vadd.f32 %v3617_v55, %v3269_v23  ;;  %v4712_v23 = vshll.u32 %v4655_v44, 16  ;;  %v4478_v3 = vunpack.c.l.b16 %v4422_v49  ;;  %v5091_v48 = vrot.slane %v5089_v17, 4 }
 0x1ee   : > { %4567 = vmatmul.bf16.gmra.mxu3 %v4491_v42  ;;  %v4722_v42 = vshll.u32 %v4656_v38, 16  ;;  %v4731_v15 = vrot.slane %v4729_v22, 6  ;;  %v4734_v58 = vrot.slane %v4732_v57, 7  ;;  %vm5436_vm0 = vcmask 1041409  }
 0x1ef   : > { %v4283_v47 = vpop.f32.mrf.mxu2  ;;  %v8406_v61 = vadd.f32 %v3897_v27, %v3672_v8  ;;  %v4714_v60 = vrot.slane %v4712_v23, 7  ;;  %v5159_v27 = vpack.c.b16 %v5145_v56, %v5144_v19  ;;  %v4427_v8 = vrot.slane %v4378_v45, 6  ;;  %v4658_v56 = vld [vmem:[#allocation3 + $0x1c] sm:$0xf] }
 0x1f0   : > { %v8411_v12 = vadd.f32 %v4283_v47, %v3951_v52  ;;  %v4479_v52 = vunpack.c.l.b16 %v4425_v51  ;;  %v4721_v23 = vrot.slane %v4719_v20, 6  ;;  %v4724_v1 = vrot.slane %v4722_v42, 7 }
 0x1f1   : > { %v3274_v5 = vpop.f32.mrf.mxu3  ;;  %v8428_v25 = vor.u32 %v4714_v60, %v4711_v59  ;;  %v8463_v10 = vor.u32 %v4734_v58, %v4731_v15  ;;  %v5098_v20 = vrot.slane %v5047_v28, 7  ;;  %v4661_v28 = vld [vmem:[#allocation3 + $0x28] sm:$0xf]  ;;  %vm5508_vm1 = vcmask 64512  }
 0x1f2   : > { %v3900_v43 = vpop.f32.mrf.mxu1  ;;  %v4492_v13 = vpack.c.b16 %v4479_v52, %v4478_v3  ;;  %v4725_v54 = vor.u32 %v4724_v1, %v4721_v23  ;;  %v4742_v3 = vshll.u32 %v4658_v56, 16  ;;  %v5094_v1 = vrot.slane %v5092_v26, 4 }
 0x1f3   : > { %v4716_v35 = vsel %vm7057_vm9, %v4707_v32, %v8428_v25  ;;  %v4717_v40 = vrot.slane %v8428_v25, 4 }
 0x1f4   : > { %v4865_v44 = vunpack.c.l.b16 %v4716_v35  ;;  %v4727_v52 = vrot.slane %v4725_v54, 4 }
 0x1f5   : > { %4950 = vmatmul.bf16.vlgmr.msrb.gmra.mxu0 %v4878_v6  ;;  %v5088_v6 = vrot.slane %v5086_v36, 4  ;;  %v4726_v34 = vsel %vm7057_vm9, %v4717_v40, %v4725_v54  ;;  %v4660_v40 = vld [vmem:[#allocation3 + $0x24] sm:$0xc] }
 0x1f6   : > { %v4736_v38 = vsel %vm7057_vm9, %v4727_v52, %v8463_v10 }
 0x1f7   : > { %v8434_v31 = vpop.f32.mrf.mxu2  ;;  %v5090_v60 = vsel %vm7367_vm10, %v5088_v6, %v5089_v17  ;;  %v4867_v25 = vunpack.c.l.b16 %v4736_v38 }
 0x1f8   : > { %v3620_v18 = vpop.f32.mrf.mxu0 }
 0x1f9   : > { %v3673_v29 = vadd.f32 %v3620_v18, %v3272_v9  ;;  %v8432_v16 = vpop.f32.mrf.mxu3  ;;  %v4697_v9 = vrot.slane %v8395_v46, 4  ;;  %v4379_v46 = vld [vmem:[#allocation3 + $0x20] sm:$0x3]  ;;  %v5046_v18 = vld [vmem:[#allocation3 + $0x1c] sm:$0xf] }
 0x1fa   : > { %v3902_v63 = vpop.f32.mrf.mxu1  ;;  %v4430_v30 = vrot.slane %v4379_v46, 6 }
 0x1fb   : > { %v3953_v11 = vadd.f32 %v3900_v43, %v3673_v29  ;;  %v4706_v55 = vsel %vm7057_vm9, %v4697_v9, %v4705_v14  ;;  %v4429_v43 = vrot.slane %v4427_v8, 4  ;;  %v4426_v14 = vrot.slane %v4424_v7, 4 }
 0x1fc   : > { %v4864_v41 = vunpack.c.l.b16 %v4706_v55  ;;  %v5146_v29 = vunpack.c.l.b16 %v5090_v60  ;;  %v5095_v7 = vrot.slane %v5046_v18, 7 }
 0x1fd   : > { %5235 = vmatmul.bf16.gmra.mxu1 %v5159_v27  ;;  %v4431_v53 = vsel %vm7383_vm14, %v4429_v43, %v4430_v30  ;;  %v4428_v51 = vsel %vm7383_vm14, %v4426_v14, %v4427_v8  ;;  %v4659_v27 = vld [vmem:[#allocation3 + $0x20] sm:$0x7]  ;;  %v4380_v30 = vld [vmem:[#allocation3 + $0x24] sm:$0xc] }
 0x1fe   : > { %4572 = vmatmul.bf16.gmra.mxu3 %v4492_v13  ;;  %v4879_v4 = vpack.c.b16 %v4865_v44, %v4864_v41  ;;  %v4481_v49 = vunpack.c.l.b16 %v4431_v53  ;;  %v4480_v32 = vunpack.c.l.b16 %v4428_v51  ;;  %v4381_v13 = vld [vmem:[#allocation3 + $0x28] sm:$0xf]  ;;  %v5097_v42 = vrot.slane %v5095_v7, 4 }
 0x1ff   : > { %v4749_v44 = vshrl.u32 %v4659_v27, 16  ;;  %v4752_v22 = vshll.u32 %v4659_v27, 16  ;;  %v4434_v57 = vrot.slane %v4381_v13, 6  ;;  %v4866_v41 = vunpack.c.l.b16 %v4726_v34  ;;  %v8505_v27 = vld [vmem:[#allocation3 + $0x2c] sm:$0xf] }
 0x200   : > { %v3622_v2 = vpop.f32.mrf.mxu0  ;;  %v4493_v9 = vpack.c.b16 %v4481_v49, %v4480_v32  ;;  %v5099_v43 = vsel %vm7367_vm10, %v5097_v42, %v5098_v20  ;;  %v6373_v60 = vrot.slane %v4380_v30, 10  ;;  %v5049_v32 = vld [vmem:[#allocation3 + $0x28] sm:$0xf]  ;;  %v4770_v34 = vshll.u32 %v4661_v28, 16 }
 0x201   : > { %v3674_v21 = vadd.f32 %v3622_v2, %v3274_v5  ;;  %v8445_v47 = vpop.f32.mrf.mxu3  ;;  %v5093_v5 = vsel %vm7367_vm10, %v5091_v48, %v5092_v26  ;;  %v8478_v2 = vld [vmem:[#allocation3 + $0x2c] sm:$0xf]  ;;  %v4880_v23 = vpack.c.b16 %v4867_v25, %v4866_v41  ;;  %v4751_v6 = vrot.slane %v4749_v44, 6 }
 0x202   : > { %v5147_v36 = vunpack.c.l.b16 %v5093_v5  ;;  %v4754_v5 = vrot.slane %v4752_v22, 7  ;;  %v5149_v54 = vunpack.c.l.b16 %v5099_v43  ;;  %v4435_v51 = vsel %vm7383_vm14, %v6373_v60, %v4434_v57 }
 0x203   : > { %v8447_v33 = vadd.f32 %v3902_v63, %v3674_v21  ;;  %v3905_v37 = vpop.f32.mrf.mxu1  ;;  %v4744_v21 = vrot.slane %v4742_v3, 7  ;;  %v4662_v3 = vld [vmem:[#allocation3 + $0x2c] sm:$0xf]  ;;  %v5102_v13 = vrot.slane %v5049_v32, 7  ;;  %v4758_v25 = vshrl.u32 %v4660_v40, 16 }
 0x204   : > { %v5160_v63 = vpack.c.b16 %v5147_v36, %v5146_v29  ;;  %v4755_v36 = vor.u32 %v4754_v5, %v4751_v6  ;;  %v4761_v42 = vshll.u32 %v4660_v40, 16  ;;  %v4780_v22 = vshll.u32 %v4662_v3, 16 }
 0x205   : > { %4955 = vmatmul.bf16.gmra.mxu0 %v4879_v4  ;;  %v4772_v5 = vrot.slane %v4770_v34, 7 }
 0x206   : > { %v4288_v59 = vpop.f32.mrf.mxu2  ;;  %v4763_v60 = vrot.slane %v4761_v42, 7 }
 0x207   : > { %v8457_v39 = vadd.f32 %v4288_v59, %v3953_v11  ;;  %v4739_v11 = vshrl.u32 %v4658_v56, 16  ;;  %v5096_v59 = vsel %vm7367_vm10, %v5094_v1, %v5095_v7  ;;  %v4737_v7 = vrot.slane %v8463_v10, 4 }
 0x209   : > { %v8467_v19 = vpop.f32.mrf.mxu3  ;;  %v4741_v8 = vrot.slane %v4739_v11, 6 }
 0x20b   : > { %v3907_v35 = vpop.f32.mrf.mxu1  ;;  %v4745_v4 = vor.u32 %v4744_v21, %v4741_v8  ;;  %v8509_v8 = vld [vmem:[#allocation3 + $0x34] sm:$0xf]  ;;  %v4777_v21 = vshrl.u32 %v4662_v3, 16 }
 0x20d   : > { %v3625_v45 = vpop.f32.mrf.mxu0  ;;  %5240 = vmatmul.bf16.gmra.mxu1 %v5160_v63  ;;  %v4747_v53 = vrot.slane %v4745_v4, 4  ;;  %v4482_v63 = vunpack.c.l.b16 %v4435_v51 }
 0x20e   : > { %v3675_v17 = vadd.f32 %v3625_v45, %v8432_v16  ;;  %v8476_v55 = vpop.f32.mrf.mxu2  ;;  %4577 = vmatmul.bf16.gmra.mxu3 %v4493_v9  ;;  %v4437_v16 = vrot.slane %v8478_v2, 6  ;;  %v4383_v45 = vld [vmem:[#allocation3 + $0x30] sm:$0xf]  ;;  %v4746_v9 = vsel %vm7057_vm9, %v4737_v7, %v4745_v4  ;;  %v5104_v4 = vrot.slane %v5102_v13, 4 }
 0x20f   : > { %v4756_v11 = vsel %vm7057_vm9, %v4747_v53, %v4755_v36  ;;  %v4868_v1 = vunpack.c.l.b16 %v4746_v9 }
 0x210   : > { %v3955_v46 = vadd.f32 %v3905_v37, %v3675_v17  ;;  %v4436_v37 = vrot.slane %v4434_v57, 4  ;;  %v4767_v17 = vshrl.u32 %v4661_v28, 16  ;;  %v4869_v20 = vunpack.c.l.b16 %v4756_v11 }
 0x211   : > { %v8480_v48 = vpop.f32.mrf.mxu3  ;;  %v4440_v57 = vrot.slane %v4383_v45, 6 }
 0x212   : > { %v4438_v62 = vsel %vm7383_vm14, %v4436_v37, %v4437_v16  ;;  %v4769_v6 = vrot.slane %v4767_v17, 6  ;;  %v4443_v37 = vrot.slane %v8509_v8, 6  ;;  %v4663_v17 = vld [vmem:[#allocation3 + $0x30] sm:$0xf]  ;;  %v5053_v8 = vld [vmem:[#allocation3 + $0x38] sm:$0xf] }
 0x213   : > { %v4483_v56 = vunpack.c.l.b16 %v4438_v62  ;;  %v4779_v62 = vrot.slane %v4777_v21, 6  ;;  %v4442_v53 = vrot.slane %v4440_v57, 4  ;;  %v4385_v21 = vld [vmem:[#allocation3 + $0x38] sm:$0xf] }
 0x214   : > { %v4773_v51 = vor.u32 %v4772_v5, %v4769_v6  ;;  %v4446_v5 = vrot.slane %v4385_v21, 6 }
 0x215   : > { %4960 = vmatmul.bf16.gmra.mxu0 %v4880_v23  ;;  %v3627_v15 = vpop.f32.mrf.mxu0  ;;  %v4494_v38 = vpack.c.b16 %v4483_v56, %v4482_v63 }
 0x216   : > { %v3676_v58 = vadd.f32 %v3627_v15, %v8445_v47  ;;  %v5148_v47 = vunpack.c.l.b16 %v5096_v59  ;;  %v4881_v15 = vpack.c.b16 %v4869_v20, %v4868_v1  ;;  %v4760_v59 = vrot.slane %v4758_v25, 6  ;;  %v8544_v20 = vld [vmem:[#allocation3 + $0x34] sm:$0xf] }
 0x217   : > { %v3910_v26 = vpop.f32.mrf.mxu1  ;;  %v5111_v1 = vrot.slane %v8544_v20, 7 }
 0x218   : > { %v8494_v14 = vadd.f32 %v3907_v35, %v3676_v58  ;;  %v5161_v52 = vpack.c.b16 %v5149_v54, %v5148_v47  ;;  %v5048_v35 = vld [vmem:[#allocation3 + $0x24] sm:$0x8]  ;;  %v4782_v54 = vrot.slane %v4780_v22, 7  ;;  %v4787_v22 = vshrl.u32 %v4663_v17, 16 }
 0x219   : > { %v4293_v18 = vpop.f32.mrf.mxu2  ;;  %v8500_v49 = vpop.f32.mrf.mxu3  ;;  %v6471_v43 = vrot.slane %v5048_v35, 11 }
 0x21a   : > { %v8498_v29 = vadd.f32 %v4293_v18, %v3955_v46  ;;  %v5105_v46 = vrot.slane %v8505_v27, 7  ;;  %v4439_v18 = vrot.slane %v4437_v16, 4  ;;  %v8530_v63 = vor.u32 %v4782_v54, %v4779_v62 }
 0x21b   : > { %v5103_v36 = vsel %vm7367_vm10, %v6471_v43, %v5102_v13  ;;  %v4775_v16 = vrot.slane %v4773_v51, 4  ;;  %v8549_v43 = vld [vmem:[#allocation3 + $0x3c] sm:$0xf]  ;;  %v4789_v62 = vrot.slane %v4787_v22, 6  ;;  %v4445_v27 = vrot.slane %v4443_v37, 4 }
 0x21c   : > { %v4441_v32 = vsel %vm7383_vm14, %v4439_v18, %v4440_v57  ;;  %v5150_v11 = vunpack.c.l.b16 %v5103_v36  ;;  %v4790_v57 = vshll.u32 %v4663_v17, 16  ;;  %v8582_v22 = vld [vmem:[#allocation3 + $0x3c] sm:$0xf] }
 0x21d   : > { %5245 = vmatmul.bf16.gmra.mxu1 %v5161_v52  ;;  %v4764_v52 = vor.u32 %v4763_v60, %v4760_v59  ;;  %v4484_v35 = vunpack.c.l.b16 %v4441_v32 }
 0x21e   : > { %4582 = vmatmul.bf16.gmra.mxu3 %v4494_v38  ;;  %v5051_v38 = vld [vmem:[#allocation3 + $0x30] sm:$0xf]  ;;  %v4792_v54 = vrot.slane %v4790_v57, 7  ;;  %v4666_v57 = vld [vmem:[#allocation3 + $0x3c] sm:$0xf] }
 0x21f   : > { %v3912_v10 = vpop.f32.mrf.mxu1  ;;  %v4765_v34 = vrot.slane %v4764_v52, 4  ;;  %v5108_v42 = vrot.slane %v5051_v38, 7  ;;  %v4448_v52 = vrot.slane %v4446_v5, 4 }
 0x220   : > { %v3630_v44 = vpop.f32.mrf.mxu0 }
 0x221   : > { %v3677_v41 = vadd.f32 %v3630_v44, %v8467_v19  ;;  %v8513_v23 = vpop.f32.mrf.mxu2  ;;  %v8515_v30 = vpop.f32.mrf.mxu3  ;;  %v5106_v19 = vsel %vm7367_vm10, %v5104_v4, %v5105_v46  ;;  %v4664_v44 = vld [vmem:[#allocation3 + $0x34] sm:$0xf]  ;;  %v5110_v60 = vrot.slane %v5108_v42, 4 }
 0x222   : > { %v5151_v47 = vunpack.c.l.b16 %v5106_v19  ;;  %v4797_v4 = vshrl.u32 %v4664_v44, 16  ;;  %v4800_v6 = vshll.u32 %v4664_v44, 16  ;;  %v4785_v44 = vrot.slane %v8530_v63, 4 }
 0x223   : > { %v3957_v58 = vadd.f32 %v3910_v26, %v3677_v41  ;;  %v4444_v26 = vsel %vm7383_vm14, %v4442_v53, %v4443_v37  ;;  %v4449_v53 = vrot.slane %v8549_v43, 6  ;;  %v5112_v18 = vsel %vm7367_vm10, %v5110_v60, %v5111_v1 }
 0x224   : > { %v4485_v40 = vunpack.c.l.b16 %v4444_v26  ;;  %v5162_v9 = vpack.c.b16 %v5151_v47, %v5150_v11  ;;  %v4799_v47 = vrot.slane %v4797_v4, 6  ;;  %v4817_v60 = vshrl.u32 %v4666_v57, 16 }
 0x225   : > { %4965 = vmatmul.bf16.gmra.mxu0 %v4881_v15 }
 0x226   : > { %v4495_v25 = vpack.c.b16 %v4485_v40, %v4484_v35  ;;  %v4447_v40 = vsel %vm7383_vm14, %v4445_v27, %v4446_v5  ;;  %v5113_v27 = vrot.slane %v5111_v1, 4 }
 0x228   : > { %v3632_v56 = vpop.f32.mrf.mxu0 }
 0x229   : > { %v3678_v28 = vadd.f32 %v3632_v56, %v8480_v48  ;;  %v3915_v7 = vpop.f32.mrf.mxu1  ;;  %v8539_v13 = vpop.f32.mrf.mxu3  ;;  %v4784_v48 = vsel %vm7057_vm9, %v4775_v16, %v8530_v63  ;;  %v4802_v56 = vrot.slane %v4800_v6, 7  ;;  %v4388_v63 = vld [vmem:[#allocation3 + $0x44] sm:$0x3] }
 0x22a   : > { %v4298_v2 = vpop.f32.mrf.mxu2  ;;  %v4871_v41 = vunpack.c.l.b16 %v4784_v48  ;;  %v4665_v48 = vld [vmem:[#allocation3 + $0x38] sm:$0xf] }
 0x22b   : > { %v8535_v3 = vadd.f32 %v4298_v2, %v3957_v58  ;;  %v8537_v45 = vadd.f32 %v3912_v10, %v3678_v28  ;;  %v4774_v10 = vsel %vm7057_vm9, %v4765_v34, %v4773_v51  ;;  %v5107_v51 = vrot.slane %v5105_v46, 4 }
 0x22c   : > { %v4870_v58 = vunpack.c.l.b16 %v4774_v10  ;;  %v4793_v28 = vor.u32 %v4792_v54, %v4789_v62  ;;  %v4450_v46 = vsel %vm7383_vm14, %v4448_v52, %v4449_v53  ;;  %v8571_v11 = vor.u32 %v4802_v56, %v4799_v47 }
 0x22d   : > { %5250 = vmatmul.bf16.gmra.mxu1 %v5162_v9  ;;  %v5109_v32 = vsel %vm7367_vm10, %v5107_v51, %v5108_v42  ;;  %v4487_v38 = vunpack.c.l.b16 %v4450_v46  ;;  %v4486_v34 = vunpack.c.l.b16 %v4447_v40  ;;  %v4807_v4 = vshrl.u32 %v4665_v48, 16 }
 0x22e   : > { %4587 = vmatmul.bf16.gmra.mxu3 %v4495_v25  ;;  %v4882_v36 = vpack.c.b16 %v4871_v41, %v4870_v58  ;;  %v5152_v16 = vunpack.c.l.b16 %v5109_v32  ;;  %v4795_v17 = vrot.slane %v4793_v28, 4  ;;  %v4387_v25 = vld [vmem:[#allocation3 + $0x40] sm:$0xf]  ;;  %v4794_v41 = vsel %vm7057_vm9, %v4785_v44, %v4793_v28 }
 0x22f   : > { %v4496_v10 = vpack.c.b16 %v4487_v38, %v4486_v34  ;;  %v4810_v6 = vshll.u32 %v4665_v48, 16  ;;  %v4452_v5 = vrot.slane %v4387_v25, 6  ;;  %v4872_v62 = vunpack.c.l.b16 %v4794_v41  ;;  %v4667_v48 = vld [vmem:[#allocation3 + $0x40] sm:$0xf] }
 0x230   : > { %v4804_v21 = vsel %vm7057_vm9, %v4795_v17, %v8571_v11  ;;  %v4455_v52 = vrot.slane %v4388_v63, 6  ;;  %v4827_v41 = vshrl.u32 %v4667_v48, 16 }
 0x231   : > { %v3635_v15 = vpop.f32.mrf.mxu0  ;;  %v3917_v59 = vpop.f32.mrf.mxu1  ;;  %v4812_v47 = vrot.slane %v4810_v6, 7  ;;  %v4454_v56 = vrot.slane %v4452_v5, 4 }
 0x232   : > { %v3679_v19 = vadd.f32 %v3635_v15, %v8500_v49  ;;  %v8561_v49 = vpop.f32.mrf.mxu3  ;;  %v4873_v15 = vunpack.c.l.b16 %v4804_v21 }
 0x234   : > { %v8559_v26 = vadd.f32 %v3915_v7, %v3679_v19  ;;  %v5153_v7 = vunpack.c.l.b16 %v5112_v18  ;;  %v4820_v19 = vshll.u32 %v4666_v57, 16  ;;  %v4809_v18 = vrot.slane %v4807_v4, 6 }
 0x235   : > { %4970 = vmatmul.bf16.gmra.mxu0 %v4882_v36  ;;  %v4883_v28 = vpack.c.b16 %v4873_v15, %v4872_v62  ;;  %v4830_v4 = vshll.u32 %v4667_v48, 16  ;;  %v4668_v15 = vld [vmem:[#allocation3 + $0x44] sm:$0x7]  ;;  %v4829_v62 = vrot.slane %v4827_v41, 6 }
 0x236   : > { %v5163_v37 = vpack.c.b16 %v5153_v7, %v5152_v16  ;;  %v4819_v7 = vrot.slane %v4817_v60, 6  ;;  %v4822_v40 = vrot.slane %v4820_v19, 7  ;;  %v4813_v38 = vor.u32 %v4812_v47, %v4809_v18 }
 0x237   : > { %v5123_v19 = vrot.slane %v5056_v24, 7  ;;  %v4340_v24 = vadd.f32 %v8434_v31, %v8406_v61  ;;  %v4342_v61 = vadd.f32 %v8476_v55, %v8447_v33  ;;  %v4344_v33 = vadd.f32 %v8513_v23, %v8494_v14 }
 0x238   : > { %v4823_v1 = vor.u32 %v4822_v40, %v4819_v7  ;;  %v4815_v21 = vrot.slane %v4813_v38, 4 }
 0x239   : > { %v3637_v2 = vpop.f32.mrf.mxu0 }
 0x23a   : > { %v3680_v9 = vadd.f32 %v3637_v2, %v8515_v30  ;;  %v3920_v35 = vpop.f32.mrf.mxu1  ;;  %v5114_v30 = vrot.slane %v5053_v8, 7  ;;  %v5055_v8 = vld [vmem:[#allocation3 + $0x40] sm:$0xf]  ;;  %v4824_v57 = vsel %vm7057_vm9, %v4815_v21, %v4823_v1  ;;  %v4825_v48 = vrot.slane %v4823_v1, 4 }
 0x23b   : > { %v3297_v58 = vpop.f32.mrf.mxu3 }
 0x23c   : > { %v8576_v42 = vadd.f32 %v3917_v59, %v3680_v9  ;;  %v5117_v59 = vrot.slane %v8582_v22, 7  ;;  %v5116_v54 = vrot.slane %v5114_v30, 4  ;;  %v5115_v16 = vsel %vm7367_vm10, %v5113_v27, %v5114_v30 }
 0x23d   : > { %5255 = vmatmul.bf16.gmra.mxu1 %v5163_v37  ;;  %v4451_v9 = vrot.slane %v4449_v53, 4  ;;  %v5154_v34 = vunpack.c.l.b16 %v5115_v16  ;;  %v5120_v22 = vrot.slane %v5055_v8, 7  ;;  %v4805_v30 = vrot.slane %v8571_v11, 4 }
 0x23e   : > { %4592 = vmatmul.bf16.gmra.mxu3 %v4496_v10  ;;  %v5118_v46 = vsel %vm7367_vm10, %v5116_v54, %v5117_v59  ;;  %v4832_v11 = vrot.slane %v4830_v4, 7  ;;  %v4837_v54 = vshrl.u32 %v4668_v15, 16 }
 0x23f   : > { %v5155_v20 = vunpack.c.l.b16 %v5118_v46  ;;  %v4453_v17 = vsel %vm7383_vm14, %v4451_v9, %v4452_v5  ;;  %v4814_v63 = vsel %vm7057_vm9, %v4805_v30, %v4813_v38  ;;  %v5122_v60 = vrot.slane %v5120_v22, 4 }
 0x240   : > { %v4488_v53 = vunpack.c.l.b16 %v4453_v17  ;;  %v4874_v18 = vunpack.c.l.b16 %v4814_v63  ;;  %v4833_v46 = vor.u32 %v4832_v11, %v4829_v62  ;;  %v4839_v7 = vrot.slane %v4837_v54, 6 }
 0x241   : > { %v5164_v43 = vpack.c.b16 %v5155_v20, %v5154_v34  ;;  %v5124_v27 = vsel %vm7367_vm10, %v5122_v60, %v5123_v19 }
 0x242   : > { %v3640_v36 = vpop.f32.mrf.mxu0  ;;  %v3922_v51 = vpop.f32.mrf.mxu1  ;;  %v5157_v9 = vunpack.c.l.b16 %v5124_v27  ;;  %v4834_v0 = vsel %vm7057_vm9, %v4825_v48, %v4833_v46 }
 0x243   : > { %v3681_v32 = vadd.f32 %v3640_v36, %v8539_v13  ;;  %v4456_v13 = vsel %vm7383_vm14, %v4454_v56, %v4455_v52  ;;  %v3299_v37 = vpop.f32.mrf.mxu3  ;;  %v4840_v36 = vshll.u32 %v4668_v15, 16 }
 0x245   : > { %4975 = vmatmul.bf16.gmra.mxu0 %v4883_v28  ;;  %v8592_v2 = vadd.f32 %v3920_v35, %v3681_v32  ;;  %v4489_v35 = vunpack.c.l.b16 %v4456_v13  ;;  %v5119_v28 = vrot.slane %v5117_v59, 4  ;;  %v4842_v40 = vrot.slane %v4840_v36, 7 }
 0x246   : > { %v4835_v13 = vrot.slane %v4833_v46, 4 }
 0x247   : > { %v4497_v5 = vpack.c.b16 %v4489_v35, %v4488_v53  ;;  %v5121_v38 = vsel %vm7367_vm10, %v5119_v28, %v5120_v22  ;;  %v4843_v20 = vor.u32 %v4842_v40, %v4839_v7 }
 0x248   : > { %v5156_v17 = vunpack.c.l.b16 %v5121_v38 }
 0x24a   : > { %v3642_v25 = vpop.f32.mrf.mxu0  ;;  %v3925_v44 = vpop.f32.mrf.mxu1  ;;  %v5165_v35 = vpack.c.b16 %v5157_v9, %v5156_v17 }
 0x24b   : > { %v3682_v10 = vadd.f32 %v3642_v25, %v8561_v49  ;;  %v4875_v49 = vunpack.c.l.b16 %v4824_v57  ;;  %v4844_v25 = vsel %vm7057_vm9, %v4835_v13, %v4843_v20 }
 0x24d   : > { %v8606_v6 = vadd.f32 %v3922_v51, %v3682_v10  ;;  %5260 = vmatmul.bf16.gmra.mxu1 %v5164_v43  ;;  %v4884_v51 = vpack.c.b16 %v4875_v49, %v4874_v18  ;;  %v4876_v10 = vunpack.c.l.b16 %v4834_v0 }
 0x24e   : > { %4597 = vmatmul.bf16.gmra.mxu3 %v4497_v5 }
 0x251   : > { %v3302_v32 = vpop.f32.mrf.mxu3 }
 0x252   : > { %v3645_v47 = vpop.f32.mrf.mxu0  ;;  %v3927_v56 = vpop.f32.mrf.mxu1 }
 0x253   : > { %v3683_v52 = vadd.f32 %v3645_v47, %v3297_v58 }
 0x255   : > { %4980 = vmatmul.bf16.gmra.mxu0 %v4884_v51  ;;  %v8612_v16 = vadd.f32 %v3925_v44, %v3683_v52  ;;  %v4877_v44 = vunpack.c.l.b16 %v4844_v25 }
 0x257   : > { %v4885_v30 = vpack.c.b16 %v4877_v44, %v4876_v10 }
 0x259   : > { %v3304_v59 = vpop.f32.mrf.mxu3 }
 0x25a   : > { %v3647_v58 = vpop.f32.mrf.mxu0  ;;  %v3930_v8 = vpop.f32.mrf.mxu1 }
 0x25b   : > { %v3684_v34 = vadd.f32 %v3647_v58, %v3299_v37 }
 0x25d   : > { %v8618_v21 = vadd.f32 %v3927_v56, %v3684_v34  ;;  %5265 = vmatmul.bf16.gmra.mxu1 %v5165_v35 }
 0x261   : > { %v4563_v57 = vpop.f32.mrf.mxu3 }
 0x262   : > { %v3650_v43 = vpop.f32.mrf.mxu0  ;;  %v3932_v53 = vpop.f32.mrf.mxu1  ;;  %v4619_v37 = vadd.f32 %v4563_v57, %v8411_v12  ;;  %v6691_v12 = vld [vmem:[%s8933_s7 + $0x38] sm:$0xff] }
 0x263   : > { %v3685_v22 = vadd.f32 %v3650_v43, %v3302_v32  ;;  %5488 = vmatpush.bf16.msrb.mxu2 %v6691_v12 }
 0x265   : > { %4985 = vmatmul.bf16.gmra.mxu0 %v4885_v30  ;;  %v8623_v1 = vadd.f32 %v3930_v8, %v3685_v22  ;;  %v4300_v8 = vpop.f32.mrf.mxu2 }
 0x269   : > { %v4565_v50 = vpop.f32.mrf.mxu3 }
 0x26a   : > { %v3652_v41 = vpop.f32.mrf.mxu0  ;;  %v5231_v4 = vpop.f32.mrf.mxu1  ;;  %v4620_v15 = vadd.f32 %v4565_v50, %v4340_v24 }
 0x26b   : > { %v3686_v5 = vadd.f32 %v3652_v41, %v3304_v59 }
 0x26d   : > { %v8627_v63 = vadd.f32 %v3932_v53, %v3686_v5  ;;  %v4303_v10 = vpop.f32.mrf.mxu2 }
 0x271   : > { %v4568_v62 = vpop.f32.mrf.mxu3 }
 0x272   : > { %v4951_v49 = vpop.f32.mrf.mxu0  ;;  %v5233_v60 = vpop.f32.mrf.mxu1  ;;  %v4621_v11 = vadd.f32 %v4568_v62, %v8457_v39  ;;  %v6690_v39 = vld [vmem:[%s8933_s7 + $0x30] sm:$0xff]  ;;  %v6687_v62 = vld [vmem:[%s8933_s7 + $0x18] sm:$0xff] }
 0x273   : > { %v5007_v19 = vadd.f32 %v4951_v49, %v4619_v37  ;;  %5489 = vmatpush.bf16.msrb.mxu2 %v6690_v39  ;;  %v6689_v37 = vld [vmem:[%s8933_s7 + $0x28] sm:$0xff] }
 0x275   : > { %v8633_v54 = vadd.f32 %v5231_v4, %v5007_v19 }
 0x277   : > { %5490 = vmatpush.bf16.msrb.mxu2 %v6689_v37 }
 0x279   : > { %v4570_v47 = vpop.f32.mrf.mxu3 }
 0x27a   : > { %v4953_v31 = vpop.f32.mrf.mxu0  ;;  %v5236_v36 = vpop.f32.mrf.mxu1  ;;  %v4622_v56 = vadd.f32 %v4570_v47, %v4342_v61  ;;  %v6686_v47 = vld [vmem:[%s8933_s7 + $0x10] sm:$0xff] }
 0x27b   : > { %v5008_v18 = vadd.f32 %v4953_v31, %v4620_v15 }
 0x27d   : > { %v8637_v52 = vadd.f32 %v5233_v60, %v5008_v18 }
 0x281   : > { %v4573_v27 = vpop.f32.mrf.mxu3 }
 0x282   : > { %v4956_v51 = vpop.f32.mrf.mxu0  ;;  %v5238_v32 = vpop.f32.mrf.mxu1  ;;  %v4623_v46 = vadd.f32 %v4573_v27, %v8498_v29  ;;  %v4346_v29 = vadd.f32 %v4300_v8, %v8537_v45 }
 0x283   : > { %v5009_v28 = vadd.f32 %v4956_v51, %v4621_v11  ;;  %v4305_v45 = vpop.f32.mrf.mxu2 }
 0x285   : > { %v5289_v7 = vadd.f32 %v5236_v36, %v5009_v28  ;;  %v8664_v28 = vld [vmem:[%s8931_s5] ss:$0 sm:$0xff] }
 0x286   : > { %v5340_v39 = vmul.f32 %v8664_v28, %v8637_v52 }
 0x289   : > { %v4575_v9 = vpop.f32.mrf.mxu3 }
 0x28a   : > { %v4958_v55 = vpop.f32.mrf.mxu0  ;;  %v5241_v40 = vpop.f32.mrf.mxu1  ;;  %v4624_v13 = vadd.f32 %v4575_v9, %v4344_v33  ;;  %v8673_v33 = vld [vmem:[%s8932_s6] ss:$0 sm:$0xff] }
 0x28b   : > { %v5010_v38 = vadd.f32 %v4958_v55, %v4622_v56  ;;  %v4308_v49 = vpop.f32.mrf.mxu2  ;;  %v5341_v55 = vmul.f32 %v8664_v28, %v5289_v7  ;;  %v8677_v9 = vadd.f32 %v8673_v33, %v5340_v39 }
 0x28d   : > { %v5290_v20 = vadd.f32 %v5238_v32, %v5010_v38  ;;  %v8684_v52 = vadd.f32 %v8673_v33, %v5341_v55 }
 0x291   : > { %v4578_v59 = vpop.f32.mrf.mxu3 }
 0x292   : > { %v4961_v17 = vpop.f32.mrf.mxu0  ;;  %v5243_v58 = vpop.f32.mrf.mxu1  ;;  %v4625_v35 = vadd.f32 %v4578_v59, %v8535_v3  ;;  %v6688_v3 = vld [vmem:[%s8933_s7 + $0x20] sm:$0xff] }
 0x293   : > { %v5011_v34 = vadd.f32 %v4961_v17, %v4623_v46  ;;  %5491 = vmatpush.bf16.msrb.mxu2 %v6688_v3  ;;  %v4310_v31 = vpop.f32.mrf.mxu2  ;;  %v5339_v46 = vmul.f32 %v8664_v28, %v8633_v54 }
 0x295   : > { %v5291_v48 = vadd.f32 %v5241_v40, %v5011_v34  ;;  %v8681_v17 = vadd.f32 %v8673_v33, %v5339_v46  ;;  %v4348_v34 = vadd.f32 %v4305_v45, %v8576_v42 }
 0x297   : > { %5492 = vmatpush.bf16.msrb.mxu2 %v6687_v62  ;;  %v5343_v54 = vmul.f32 %v8664_v28, %v5291_v48  ;;  %v5375_v7 = vadd.f32 %v8677_v9, %v8681_v17 }
 0x299   : > { %v4580_v14 = vpop.f32.mrf.mxu3  ;;  %v8698_v48 = vadd.f32 %v8673_v33, %v5343_v54  ;;  %v6685_v54 = vld [vmem:[%s8933_s7 + $0x8] sm:$0xff] }
 0x29a   : > { %v4963_v25 = vpop.f32.mrf.mxu0  ;;  %v5246_v0 = vpop.f32.mrf.mxu1  ;;  %v4626_v23 = vadd.f32 %v4580_v14, %v4346_v29  ;;  %v4349_v29 = vadd.f32 %v4308_v49, %v8592_v2 }
 0x29b   : > { %v5012_v44 = vadd.f32 %v4963_v25, %v4624_v13  ;;  %5493 = vmatpush.bf16.msrb.mxu2 %v6686_v47  ;;  %v4313_v51 = vpop.f32.mrf.mxu2  ;;  %v5342_v13 = vmul.f32 %v8664_v28, %v5290_v20 }
 0x29d   : > { %v5292_v43 = vadd.f32 %v5243_v58, %v5012_v44  ;;  %v8691_v59 = vadd.f32 %v8673_v33, %v5342_v13  ;;  %v4350_v44 = vadd.f32 %v4310_v31, %v8606_v6 }
 0x29f   : > { %v5344_v20 = vmul.f32 %v8664_v28, %v5292_v43  ;;  %5494 = vmatpush.bf16.msrb.mxu2 %v6685_v54 }
 0x2a1   : > { %v4583_v57 = vpop.f32.mrf.mxu3  ;;  %v8704_v43 = vadd.f32 %v8673_v33, %v5344_v20 }
 0x2a2   : > { %v4966_v53 = vpop.f32.mrf.mxu0  ;;  %v5248_v22 = vpop.f32.mrf.mxu1 }
 0x2a3   : > { %v5013_v30 = vadd.f32 %v4966_v53, %v4625_v35  ;;  %v4315_v38 = vpop.f32.mrf.mxu2  ;;  %v4347_v35 = vadd.f32 %v4303_v10, %v8559_v26  ;;  %v4351_v10 = vadd.f32 %v4313_v51, %v8612_v16 }
 0x2a5   : > { %v5293_v24 = vadd.f32 %v5246_v0, %v5013_v30  ;;  %v5376_v0 = vadd.f32 %v5375_v7, %v8684_v52  ;;  %v4627_v14 = vadd.f32 %v4583_v57, %v4347_v35  ;;  %v6684_v35 = vld [vmem:[%s8933_s7] sm:$0xff] }
 0x2a6   : > { %5495 = vmatpush.bf16.msrb.mxu2 %v6684_v35 }
 0x2a7   : > { %v5345_v42 = vmul.f32 %v8664_v28, %v5293_v24 }
 0x2a9   : > { %v4585_v50 = vpop.f32.mrf.mxu3  ;;  %v8710_v6 = vadd.f32 %v8673_v33, %v5345_v42 }
 0x2aa   : > { %v4968_v41 = vpop.f32.mrf.mxu0  ;;  %v8653_v4 = vpop.f32.mrf.mxu1  ;;  %v4628_v25 = vadd.f32 %v4585_v50, %v4348_v34 }
 0x2ab   : > { %v5014_v5 = vadd.f32 %v4968_v41, %v4626_v23  ;;  %v4318_v45 = vpop.f32.mrf.mxu2  ;;  %v4352_v41 = vadd.f32 %v4315_v38, %v8618_v21 }
 0x2ad   : > { %v5294_v15 = vadd.f32 %v5248_v22, %v5014_v5  ;;  %v5377_v22 = vadd.f32 %v5376_v0, %v8691_v59 }
 0x2af   : > { %v5346_v26 = vmul.f32 %v8664_v28, %v5294_v15  ;;  %v5378_v24 = vadd.f32 %v5377_v22, %v8698_v48 }
 0x2b1   : > { %v4588_v12 = vpop.f32.mrf.mxu3  ;;  %v5379_v15 = vadd.f32 %v5378_v24, %v8704_v43  ;;  %v8715_v62 = vadd.f32 %v8673_v33, %v5346_v26 }
 0x2b2   : > { %v4971_v60 = vpop.f32.mrf.mxu0  ;;  %v5253_v19 = vpop.f32.mrf.mxu1  ;;  %v4629_v23 = vadd.f32 %v4588_v12, %v4349_v29 }
 0x2b3   : > { %v5015_v30 = vadd.f32 %v4971_v60, %v4627_v14 }
 0x2b5   : > { %v5295_v60 = vadd.f32 %v8653_v4, %v5015_v30  ;;  %v5503_v30 = vld [vmem:[%s8935_s9] sm:$0xf] }
 0x2b9   : > { %v4590_v36 = vpop.f32.mrf.mxu3 }
 0x2ba   : > { %v4973_v11 = vpop.f32.mrf.mxu0  ;;  %v5256_v61 = vpop.f32.mrf.mxu1  ;;  %v4630_v37 = vadd.f32 %v4590_v36, %v4350_v44  ;;  %v5380_v36 = vadd.f32 %v5379_v15, %v8710_v6 }
 0x2bb   : > { %v5016_v53 = vadd.f32 %v4973_v11, %v4628_v25 }
 0x2bc   : > { %v5381_v51 = vadd.f32 %v5380_v36, %v8715_v62 }
 0x2bd   : > { %v5296_v5 = vadd.f32 %v5253_v19, %v5016_v53 }
 0x2bf   : > { %v5348_v21 = vmul.f32 %v8664_v28, %v5296_v5  ;;  %v6694_v5 = vld [vmem:[%s8937_s11 + $0x10] sm:$0xff] }
 0x2c1   : > { %v4593_v32 = vpop.f32.mrf.mxu3  ;;  %v8725_v38 = vadd.f32 %v8673_v33, %v5348_v21 }
 0x2c2   : > { %v4976_v18 = vpop.f32.mrf.mxu0  ;;  %v5258_v56 = vpop.f32.mrf.mxu1  ;;  %v4631_v50 = vadd.f32 %v4593_v32, %v4351_v10  ;;  %v6832_v32 = vmov 64.0  }
 0x2c3   : > { %v5017_v3 = vadd.f32 %v4976_v18, %v4629_v23  ;;  %v4353_v18 = vadd.f32 %v4318_v45, %v8623_v1  ;;  %6760 = vrcp.f32 %v6832_v32 }
 0x2c5   : > { %v5297_v12 = vadd.f32 %v5256_v61, %v5017_v3 }
 0x2c7   : > { %v5349_v39 = vmul.f32 %v8664_v28, %v5297_v12 }
 0x2c9   : > { %v4595_v58 = vpop.f32.mrf.mxu3  ;;  %v6761_v29 = vpop.eup %6760 }
 0x2ca   : > { %v4978_v27 = vpop.f32.mrf.mxu0  ;;  %v5261_v40 = vpop.f32.mrf.mxu1  ;;  %v4632_v11 = vadd.f32 %v4595_v58, %v4352_v41  ;;  %v5402_v10 = vmul.f32 64.0, %v6761_v29  ;;  %vm5406_vm9 = vweird.f32 %v6761_v29 }
 0x2cb   : > { %v5018_v49 = vadd.f32 %v4978_v27, %v4630_v37  ;;  %v5347_v27 = vmul.f32 %v8664_v28, %v5295_v60  ;;  %v4320_v58 = vpop.f32.mrf.mxu2  ;;  %v6695_v37 = vld [vmem:[%s8937_s11 + $0x18] sm:$0xff] }
 0x2cc   : > { %v4354_v0 = vadd.f32 %v4320_v58, %v8627_v63  ;;  %5688 = vmatpush.bf16.msra.mxu2 %v6695_v37  ;;  %v5403_v60 = vsub.f32 1.0, %v5402_v10 }
 0x2cd   : > { %v5298_v19 = vadd.f32 %v5258_v56, %v5018_v49  ;;  %v8732_v34 = vadd.f32 %v8673_v33, %v5347_v27 }
 0x2cf   : > { %v5350_v1 = vmul.f32 %v8664_v28, %v5298_v19  ;;  %v5388_v42 = vadd.f32 %v8725_v38, %v8732_v34  ;;  %v5404_v19 = vmul.f32 %v6761_v29, %v5403_v60  ;;  %v5562_v60 = vld [vmem:[%s7013_s24 + $0x30] sm:$0xff] }
 0x2d0   : > { %5689 = vmatpush.bf16.msra.mxu2 %v6694_v5 }
 0x2d1   : > { %v4598_v16 = vpop.f32.mrf.mxu3  ;;  %v8745_v44 = vadd.f32 %v8673_v33, %v5350_v1  ;;  %v5405_v27 = vadd.f32 %v6761_v29, %v5404_v19 }
 0x2d2   : > { %v4981_v8 = vpop.f32.mrf.mxu0  ;;  %v5263_v2 = vpop.f32.mrf.mxu1  ;;  %v4633_v61 = vadd.f32 %v4598_v16, %v4353_v18 }
 0x2d3   : > { %v5019_v31 = vadd.f32 %v4981_v8, %v4631_v50  ;;  %v5382_v8 = vrot.slane %v5381_v51, 4 }
 0x2d5   : > { %v5299_v4 = vadd.f32 %v5261_v40, %v5019_v31  ;;  %v8735_v40 = vadd.f32 %v8673_v33, %v5349_v39  ;;  %v5383_v23 = vadd.f32 %v5382_v8, %v5381_v51  ;;  %v6693_v31 = vld [vmem:[%s8937_s11 + $0x8] sm:$0xff]  ;;  %v6692_v51 = vld [vmem:[%s8937_s11] sm:$0xff] }
 0x2d6   : > { %5690 = vmatpush.bf16.msra.mxu2 %v6693_v31 }
 0x2d7   : > { %v5351_v7 = vmul.f32 %v8664_v28, %v5299_v4  ;;  %v5389_v53 = vadd.f32 %v5388_v42, %v8735_v40  ;;  %v5384_v50 = vrot.slane %v5383_v23, 2 }
 0x2d9   : > { %v4600_v25 = vpop.f32.mrf.mxu3  ;;  %v8750_v22 = vadd.f32 %v8673_v33, %v5351_v7  ;;  %v5390_v3 = vadd.f32 %v5389_v53, %v8745_v44  ;;  %v5385_v36 = vadd.f32 %v5384_v50, %v5383_v23 }
 0x2da   : > { %v4983_v57 = vpop.f32.mrf.mxu0  ;;  %v5266_v46 = vpop.f32.mrf.mxu1  ;;  %v4634_v26 = vadd.f32 %v4600_v25, %v4354_v0  ;;  %5691 = vmatpush.bf16.msra.mxu2 %v6692_v51  ;;  %v5556_v25 = vld [vmem:[%s7013_s24] sm:$0xff]  ;;  %v5557_v0 = vld [vmem:[%s7013_s24 + $0x8] sm:$0xff] }
 0x2db   : > { %v5020_v47 = vadd.f32 %v4983_v57, %v4632_v11  ;;  %v5514_v57 = vsel %vm5512_vm4, %v5503_v30, 0  ;;  %v5391_v49 = vadd.f32 %v5390_v3, %v8750_v22  ;;  %v5573_v42 = vpack.c.bf16 %v5557_v0, %v5557_v0  ;;  %v5565_v51 = vld [vmem:[%s7013_s24 + $0x48] sm:$0xff]  ;;  %v5570_v0 = vld [vmem:[%s7013_s24 + $0x70] sm:$0xff] }
 0x2dc   : > { %5523 = vmatpush.bf16.msra.mxu3 %v5514_v57  ;;  %v5561_v57 = vld [vmem:[%s7013_s24 + $0x28] sm:$0xff] }
 0x2dd   : > { %v5300_v13 = vadd.f32 %v5263_v2, %v5020_v47  ;;  %v5613_v23 = vunpack.c.l.b16 %v5573_v42  ;;  %v5577_v5 = vpack.c.bf16 %v5561_v57, %v5561_v57  ;;  %v5586_v42 = vpack.c.bf16 %v5570_v0, %v5570_v0 }
 0x2df   : > { %v5352_v14 = vmul.f32 %v8664_v28, %v5300_v13 }
 0x2e1   : > { %v8761_v45 = vadd.f32 %v8673_v33, %v5352_v14 }
 0x2e2   : > { %v4986_v55 = vpop.f32.mrf.mxu0  ;;  %v5268_v41 = vpop.f32.mrf.mxu1 }
 0x2e3   : > { %v5021_v56 = vadd.f32 %v4986_v55, %v4633_v61  ;;  %v5392_v12 = vadd.f32 %v5391_v49, %v8761_v45  ;;  %v5617_v49 = vunpack.c.l.b16 %v5577_v5 }
 0x2e5   : > { %v5301_v20 = vadd.f32 %v5266_v46, %v5021_v56 }
 0x2e7   : > { %v5353_v2 = vmul.f32 %v8664_v28, %v5301_v20 }
 0x2e9   : > { %v8768_v15 = vadd.f32 %v8673_v33, %v5353_v2  ;;  %v5559_v2 = vld [vmem:[%s7013_s24 + $0x18] sm:$0xff] }
 0x2ea   : > { %v4988_v63 = vpop.f32.mrf.mxu0 }
 0x2eb   : > { %v5022_v24 = vadd.f32 %v4988_v63, %v4634_v26  ;;  %v5393_v18 = vadd.f32 %v5392_v12, %v8768_v15  ;;  %v5558_v26 = vld [vmem:[%s7013_s24 + $0x10] sm:$0xff]  ;;  %v5575_v63 = vpack.c.bf16 %v5559_v2, %v5559_v2  ;;  %v5563_v12 = vld [vmem:[%s7013_s24 + $0x38] sm:$0xff]  ;;  %v6756_v2 = vld [vmem:[%s8934_s8] ss:$0 sm:$0xff] }
 0x2ec   : > { %v5574_v10 = vpack.c.bf16 %v5558_v26, %v5558_v26  ;;  %v5579_v31 = vpack.c.bf16 %v5563_v12, %v5563_v12 }
 0x2ed   : > { %v5302_v16 = vadd.f32 %v5268_v41, %v5022_v24  ;;  %v5615_v37 = vunpack.c.l.b16 %v5575_v63  ;;  %v5560_v24 = vld [vmem:[%s7013_s24 + $0x20] sm:$0xff] }
 0x2ee   : > { %v5614_v30 = vunpack.c.l.b16 %v5574_v10  ;;  %v5576_v41 = vpack.c.bf16 %v5560_v24, %v5560_v24 }
 0x2ef   : > { %v5354_v11 = vmul.f32 %v8664_v28, %v5302_v16  ;;  %v5386_v28 = vrot.slane %v5385_v36, 1 }
 0x2f0   : > { %v5629_v3 = vpack.c.b16 %v5615_v37, %v5614_v30  ;;  %v5616_v50 = vunpack.c.l.b16 %v5576_v41 }
 0x2f1   : > { %v8777_v21 = vadd.f32 %v8673_v33, %v5354_v11  ;;  %v5387_v4 = vadd.f32 %v5386_v28, %v5385_v36  ;;  %v5407_v33 = vsel %vm5406_vm9, %v6761_v29, %v5405_v27  ;;  %v5572_v29 = vpack.c.bf16 %v5556_v25, %v5556_v25 }
 0x2f2   : > { %v5630_v16 = vpack.c.b16 %v5617_v49, %v5616_v50  ;;  %v5578_v11 = vpack.c.bf16 %v5562_v60, %v5562_v60 }
 0x2f3   : > { %v5394_v47 = vadd.f32 %v5393_v18, %v8777_v21  ;;  %v5408_v55 = vmul.f32 %v5407_v33, %v5387_v4  ;;  %v5612_v14 = vunpack.c.l.b16 %v5572_v29  ;;  %v5619_v18 = vunpack.c.l.b16 %v5579_v31  ;;  %v5571_v29 = vld [vmem:[%s7013_s24 + $0x78] sm:$0xff] }
 0x2f4   : > { %v5618_v36 = vunpack.c.l.b16 %v5578_v11 }
 0x2f5   : > { %v5395_v32 = vrot.slane %v5394_v47, 4  ;;  %v5410_v56 = vpack.c.bf16 %v5408_v55, %v5408_v55  ;;  %v5628_v53 = vpack.c.b16 %v5613_v23, %v5612_v14  ;;  %v5587_v14 = vpack.c.bf16 %v5571_v29, %v5571_v29 }
 0x2f6   : > { %v5631_v19 = vpack.c.b16 %v5619_v18, %v5618_v36  ;;  %v5626_v23 = vunpack.c.l.b16 %v5586_v42  ;;  %v6759_v18 = vld [vmem:[%s8936_s10] ss:$0 sm:$0xff] }
 0x2f7   : > { %v5396_v39 = vadd.f32 %v5395_v32, %v5394_v47  ;;  %v5434_v8 = vunpack.c.l.b16 %v5410_v56  ;;  %v5564_v47 = vld [vmem:[%s7013_s24 + $0x40] sm:$0xff]  ;;  %v5581_v32 = vpack.c.bf16 %v5565_v51, %v5565_v51 }
 0x2f8   : > { %v5580_v28 = vpack.c.bf16 %v5564_v47, %v5564_v47 }
 0x2f9   : > { %v5397_v61 = vrot.slane %v5396_v39, 2 }
 0x2fa   : > { %v5620_v27 = vunpack.c.l.b16 %v5580_v28 }
 0x2fb   : > { %v5398_v46 = vadd.f32 %v5397_v61, %v5396_v39  ;;  %v5621_v39 = vunpack.c.l.b16 %v5581_v32  ;;  %v5566_v61 = vld [vmem:[%s7013_s24 + $0x50] sm:$0xff] }
 0x2fd   : > { %v5399_v1 = vrot.slane %v5398_v46, 1  ;;  %v5632_v4 = vpack.c.b16 %v5621_v39, %v5620_v27 }
 0x2ff   : > { %v5400_v13 = vadd.f32 %v5399_v1, %v5398_v46  ;;  %v5582_v46 = vpack.c.bf16 %v5566_v61, %v5566_v61 }
 0x301   : > { %v5409_v54 = vmul.f32 %v5407_v33, %v5400_v13  ;;  %v5567_v33 = vld [vmem:[%s7013_s24 + $0x58] sm:$0xff]  ;;  %v5622_v1 = vunpack.c.l.b16 %v5582_v46 }
 0x302   : > { %v5583_v55 = vpack.c.bf16 %v5567_v33, %v5567_v33 }
 0x303   : > { %v5411_v58 = vpack.c.bf16 %v5409_v54, %v5409_v54  ;;  %v5568_v54 = vld [vmem:[%s7013_s24 + $0x60] sm:$0xff] }
 0x304   : > { %v5623_v13 = vunpack.c.l.b16 %v5583_v55  ;;  %v8822_v55 = vld [vmem:[%s8939_s13] ss:$0 sm:$0xff] }
 0x305   : > { %v5435_v7 = vunpack.c.l.b16 %v5411_v58  ;;  %v5569_v58 = vld [vmem:[%s7013_s24 + $0x68] sm:$0xff]  ;;  %s5834_s24 = scalar_lea.hbm %s8940_s14, %s6697_s20 }
 0x306   : > { %v5633_v56 = vpack.c.b16 %v5623_v13, %v5622_v1  ;;  %s5837_s19 = sshll.u32 %s5834_s24, 4  ;;  %s5838_s19 = int_to_ptr.hbm [resolvable:$true] %s5837_s19 }
 0x307   : > { %v5437_v20 = vsel %vm5436_vm0, %v5435_v7, %v5434_v8  ;;  %v5584_v8 = vpack.c.bf16 %v5568_v54, %v5568_v54  ;;  %v5585_v7 = vpack.c.bf16 %v5569_v58, %v5569_v58  ;;  %s6782_s18 = sshra.s32 %s5838_s19, 4  ;;  %s6783_s18 = int_to_ptr.hbm [resolvable:$true] %s6782_s18 }
 0x308   : > { %v5438_v35 = vpack.c.b16 %v5437_v20, %v5437_v20  ;;  %s6784_s25 = scalar_lea.hbm %s6783_s18, 128  ;;  %p6789_p0 = scmp.lt.s32.totalorder %s6783_s18, %s8940_s14 }
 0x309   : > { %v5624_v20 = vunpack.c.l.b16 %v5584_v8  ;;  %p6785_p11 = scmp.ne.s32.totalorder %s6783_s18, %s6784_s25  ;;  %p6790_p1 = scmp.lt.s32.totalorder %s6788_s17, %s6784_s25 }
 0x30a   : > { %5496 = vmatmul.bf16.vlgmr.msrb.gmra.mxu2 %v5438_v35  ;;  %v5625_v35 = vunpack.c.l.b16 %v5585_v7 }
 0x30b   : > { %p6786_p12 = pnand %p6785_p11, %p6948_p5  ;;  %p6791_p2 = por %p6790_p1, %p6789_p0 }
 0x30c   : > { %v5634_v25 = vpack.c.b16 %v5625_v35, %v5624_v20 }
 0x30d   : > { %p6787_p13 = pneg %p6786_p12 }
 0x30f   : > { %p6792_p3 = pnand %p6791_p2, %p6787_p13 }
 0x31a   : > { %6569 = vmatmul.msk.bf16.vlgmr.msra.gmra.mxu2 %vm834_vm11, %v5628_v53  ;;  %v5627_v53 = vunpack.c.l.b16 %v5587_v14 }
 0x31c   : > { %v5635_v26 = vpack.c.b16 %v5627_v53, %v5626_v23 }
 0x32a   : > { %6570 = vmatmul.msk.bf16.gmra.mxu2 %vm834_vm11, %v5629_v3 }
 0x33a   : > { %6571 = vmatmul.msk.bf16.gmra.mxu2 %vm834_vm11, %v5630_v16 }
 0x34a   : > { %6572 = vmatmul.msk.bf16.gmra.mxu2 %vm834_vm11, %v5631_v19 }
 0x35a   : > { %6573 = vmatmul.msk.bf16.gmra.mxu2 %vm834_vm11, %v5632_v4  ;;  %v8816_v4 = vld [vmem:[%s8938_s12] ss:$0 sm:$0xff] }
 0x36a   : > { %6574 = vmatmul.msk.bf16.gmra.mxu2 %vm834_vm11, %v5633_v56 }
 0x37a   : > { %6575 = vmatmul.msk.bf16.gmra.mxu2 %vm834_vm11, %v5634_v25 }
 0x38a   : > { %6576 = vmatmul.msk.bf16.gmra.mxu2 %vm834_vm11, %v5635_v26 }
 0x38d   : > { %v5497_v10 = vpop.f32.mrf.mxu2 }
 0x38e   : > { %v5498_v63 = vadd.f32 %v6756_v2, %v5497_v10 }
 0x390   : > { %v5501_v30 = vmax.f32 %v5498_v63, 0.0 }
 0x392   : > { %v5502_v37 = vpack.c.bf16 %v5501_v30, %v5501_v30 }
 0x394   : > { %6552 = vmatmul.msk.bf16.vlgmr.msra.gmra.mxu3 %vm5508_vm1, %v5502_v37 }
 0x395   : > { %v5499_v3 = vpop.f32.mrf.mxu2 }
 0x39d   : > { %v5693_v24 = vpop.f32.mrf.mxu2 }
 0x39e   : > { %v5737_v46 = vmul.f32 %v8816_v4, %v5693_v24 }
 0x3a0   : > { %v5757_v7 = vadd.f32 %v8822_v55, %v5737_v46 }
 0x3a5   : > { %v5695_v57 = vpop.f32.mrf.mxu2 }
 0x3a6   : > { %v5738_v1 = vmul.f32 %v8816_v4, %v5695_v57 }
 0x3a8   : > { %v5758_v20 = vadd.f32 %v8822_v55, %v5738_v1 }
 0x3ad   : > { %v5698_v41 = vpop.f32.mrf.mxu2 }
 0x3ae   : > { %v5739_v13 = vmul.f32 %v8816_v4, %v5698_v41 }
 0x3b0   : > { %v5759_v25 = vadd.f32 %v8822_v55, %v5739_v13 }
 0x3b5   : > { %v5700_v5 = vpop.f32.mrf.mxu2 }
 0x3b6   : > { %v5740_v56 = vmul.f32 %v8816_v4, %v5700_v5 }
 0x3b8   : > { %v5760_v0 = vadd.f32 %v8822_v55, %v5740_v56 }
 0x3bd   : > { %v5703_v50 = vpop.f32.mrf.mxu2 }
 0x3be   : > { %v5741_v54 = vmul.f32 %v8816_v4, %v5703_v50 }
 0x3c0   : > { %v5761_v10 = vadd.f32 %v8822_v55, %v5741_v54 }
 0x3c5   : > { %v5705_v49 = vpop.f32.mrf.mxu2 }
 0x3c6   : > { %v5742_v58 = vmul.f32 %v8816_v4, %v5705_v49 }
 0x3c8   : > { %v5762_v63 = vadd.f32 %v8822_v55, %v5742_v58 }
 0x3cd   : > { %v5708_v16 = vpop.f32.mrf.mxu2 }
 0x3ce   : > { %v5743_v8 = vmul.f32 %v8816_v4, %v5708_v16 }
 0x3d0   : > { %v5763_v30 = vadd.f32 %v8822_v55, %v5743_v8 }
 0x3d5   : > { %v5710_v60 = vpop.f32.mrf.mxu2 }
 0x3d6   : > { %v5744_v29 = vmul.f32 %v8816_v4, %v5710_v60 }
 0x3d8   : > { %v5764_v5 = vadd.f32 %v8822_v55, %v5744_v29 }
 0x3dd   : > { %v5713_v12 = vpop.f32.mrf.mxu2 }
 0x3de   : > { %v5745_v42 = vmul.f32 %v8816_v4, %v5713_v12 }
 0x3e0   : > { %v5765_v60 = vadd.f32 %v8822_v55, %v5745_v42 }
 0x3e5   : > { %v5715_v11 = vpop.f32.mrf.mxu2 }
 0x3e6   : > { %v5746_v23 = vmul.f32 %v8816_v4, %v5715_v11 }
 0x3e8   : > { %v5766_v12 = vadd.f32 %v8822_v55, %v5746_v23 }
 0x3ed   : > { %v5718_v31 = vpop.f32.mrf.mxu2 }
 0x3ee   : > { %v5747_v53 = vmul.f32 %v8816_v4, %v5718_v31 }
 0x3f0   : > { %v5767_v11 = vadd.f32 %v8822_v55, %v5747_v53 }
 0x3f5   : > { %v5720_v36 = vpop.f32.mrf.mxu2 }
 0x3f6   : > { %v5748_v37 = vmul.f32 %v8816_v4, %v5720_v36 }
 0x3fd   : > { %v5723_v51 = vpop.f32.mrf.mxu2 }
 0x405   : > { %v5725_v61 = vpop.f32.mrf.mxu2 }
 0x40d   : > { %v5728_v14 = vpop.f32.mrf.mxu2 }
 0x415   : > { %v5730_v13 = vpop.f32.mrf.mxu2 }
 0x417   : > { %v5525_v19 = vpop.f32.mrf.mxu3 }
 0x418   : > { %v5526_v47 = vadd.f32 %v6759_v18, %v5525_v19  ;;  %v5749_v19 = vmul.f32 %v8816_v4, %v5723_v51 }
 0x41a   : > { %v5529_v28 = vsub.f32 0.0, %v5526_v47 }
 0x41c   : > { %v5530_v32 = vmul.f32 1.442695, %v5529_v28 }
 0x41e   : > { %6762 = vpow2.f32 %v5530_v32 }
 0x41f   : > { %v5527_v27 = vpop.f32.mrf.mxu3 }
 0x424   : > { %v6763_v39 = vpop.eup %6762 }
 0x425   : > { %v5532_v33 = vadd.f32 1.0, %v6763_v39 }
 0x427   : > { %6764 = vrcp.f32 %v5532_v33 }
 0x42d   : > { %v6765_v35 = vpop.eup %6764 }
 0x42e   : > { %v5535_v26 = vrot.slane %v6765_v35, 1  ;;  %v5536_v2 = vperm.slane %v6765_v35, 0 }
 0x430   : > { %v5537_v3 = vperm.slane %v5535_v26, 0  ;;  %v5540_v24 = vmul.f32 %v5536_v2, %v8681_v17  ;;  %v5541_v57 = vmul.f32 %v5536_v2, %v8677_v9  ;;  %v5542_v41 = vmul.f32 %v5536_v2, %v8684_v52 }
 0x431   : > { %v5543_v50 = vmul.f32 %v5536_v2, %v8691_v59  ;;  %v5544_v49 = vmul.f32 %v5536_v2, %v8698_v48  ;;  %v5545_v16 = vmul.f32 %v5536_v2, %v8704_v43  ;;  %v5546_v9 = vmul.f32 %v5536_v2, %v8710_v6 }
 0x432   : > { %v5768_v17 = vadd.f32 %v8822_v55, %v5748_v37  ;;  %v5547_v52 = vmul.f32 %v5536_v2, %v8715_v62  ;;  %v5773_v31 = vadd.f32 %v5757_v7, %v5540_v24  ;;  %v5774_v59 = vadd.f32 %v5758_v20, %v5541_v57 }
 0x433   : > { %v5548_v48 = vmul.f32 %v5537_v3, %v8732_v34  ;;  %v5775_v36 = vadd.f32 %v5759_v25, %v5542_v41  ;;  %v5776_v43 = vadd.f32 %v5760_v0, %v5543_v50  ;;  %v5777_v18 = vadd.f32 %v5761_v10, %v5544_v49 }
 0x434   : > { %v5549_v47 = vmul.f32 %v5537_v3, %v8725_v38  ;;  %v5550_v28 = vmul.f32 %v5537_v3, %v8735_v40  ;;  %v5778_v32 = vadd.f32 %v5762_v63, %v5545_v16  ;;  %v5551_v6 = vmul.f32 %v5537_v3, %v8745_v44 }
 0x435   : > { %v5779_v27 = vadd.f32 %v5763_v30, %v5546_v9  ;;  %v5789_v39 = vmax.f32 %v5773_v31, 0.0  ;;  %v5750_v62 = vmul.f32 %v8816_v4, %v5725_v61  ;;  %v5780_v33 = vadd.f32 %v5764_v5, %v5547_v52 }
 0x436   : > { %v5790_v46 = vmax.f32 %v5774_v59, 0.0  ;;  %v5791_v1 = vmax.f32 %v5775_v36, 0.0  ;;  %v5792_v34 = vmax.f32 %v5776_v43, 0.0  ;;  %v5552_v56 = vmul.f32 %v5537_v3, %v8750_v22 }
 0x437   : > { %v5781_v54 = vadd.f32 %v5765_v60, %v5548_v48  ;;  %v5793_v51 = vmax.f32 %v5777_v18, 0.0  ;;  %5805 = vst [vmem:[%s8865_s28] sm:$0xff] %v5789_v39  ;;  %v5751_v38 = vmul.f32 %v8816_v4, %v5728_v14  ;;  %v5769_v40 = vadd.f32 %v8822_v55, %v5749_v19 }
 0x438   : > { %v5782_v44 = vadd.f32 %v5766_v12, %v5549_v47  ;;  %v5783_v61 = vadd.f32 %v5767_v11, %v5550_v28  ;;  %v5794_v58 = vmax.f32 %v5778_v32, 0.0  ;;  %5806 = vst [vmem:[%s8865_s28 + $0x8] sm:$0xff] %v5790_v46  ;;  %v5795_v22 = vmax.f32 %v5779_v27, 0.0 }
 0x439   : > { %5807 = vst [vmem:[%s8865_s28 + $0x10] sm:$0xff] %v5791_v1  ;;  %v5553_v8 = vmul.f32 %v5537_v3, %v8761_v45  ;;  %v5554_v7 = vmul.f32 %v5537_v3, %v8768_v15  ;;  %v5752_v20 = vmul.f32 %v8816_v4, %v5730_v13  ;;  %v5784_v35 = vadd.f32 %v5768_v17, %v5551_v6 }
 0x43a   : > { %v5796_v25 = vmax.f32 %v5780_v33, 0.0  ;;  %5808 = vst [vmem:[%s8865_s28 + $0x18] sm:$0xff] %v5792_v34  ;;  %v5770_v0 = vadd.f32 %v8822_v55, %v5750_v62  ;;  %v5555_v29 = vmul.f32 %v5537_v3, %v8777_v21  ;;  %v5785_v42 = vadd.f32 %v5769_v40, %v5552_v56 }
 0x43b   : > { %v5797_v14 = vmax.f32 %v5781_v54, 0.0  ;;  %5809 = vst [vmem:[%s8865_s28 + $0x20] sm:$0xff] %v5793_v51  ;;  %v5771_v45 = vadd.f32 %v8822_v55, %v5751_v38  ;;  %v5798_v15 = vmax.f32 %v5782_v44, 0.0  ;;  %v5772_v23 = vadd.f32 %v8822_v55, %v5752_v20 }
 0x43c   : > { %5810 = vst [vmem:[%s8865_s28 + $0x28] sm:$0xff] %v5794_v58  ;;  %v5786_v4 = vadd.f32 %v5770_v0, %v5553_v8  ;;  %v5799_v53 = vmax.f32 %v5783_v61, 0.0  ;;  %v5800_v26 = vmax.f32 %v5784_v35, 0.0  ;;  %v5801_v10 = vmax.f32 %v5785_v42, 0.0 }
 0x43d   : > { %5811 = vst [vmem:[%s8865_s28 + $0x30] sm:$0xff] %v5795_v22  ;;  %v5787_v21 = vadd.f32 %v5771_v45, %v5554_v7  ;;  %v5788_v2 = vadd.f32 %v5772_v23, %v5555_v29 }
 0x43e   : > { %5812 = vst [vmem:[%s8865_s28 + $0x38] sm:$0xff] %v5796_v25  ;;  %v5802_v55 = vmax.f32 %v5786_v4, 0.0 }
 0x43f   : > { %5813 = vst [vmem:[%s8865_s28 + $0x40] sm:$0xff] %v5797_v14  ;;  %v5803_v63 = vmax.f32 %v5787_v21, 0.0  ;;  %v5804_v30 = vmax.f32 %v5788_v2, 0.0 }
 0x440   : > { %5814 = vst [vmem:[%s8865_s28 + $0x48] sm:$0xff] %v5798_v15 }
 0x441   : > { %5815 = vst [vmem:[%s8865_s28 + $0x50] sm:$0xff] %v5799_v53 }
 0x442   : > { %5816 = vst [vmem:[%s8865_s28 + $0x58] sm:$0xff] %v5800_v26 }
 0x443   : > { %5817 = vst [vmem:[%s8865_s28 + $0x60] sm:$0xff] %v5801_v10 }
 0x444   : > { %5818 = vst [vmem:[%s8865_s28 + $0x68] sm:$0xff] %v5802_v55 }
 0x445   : > { %5819 = vst [vmem:[%s8865_s28 + $0x70] sm:$0xff] %v5803_v63 }
 0x446   : > { %5820 = vst [vmem:[%s8865_s28 + $0x78] sm:$0xff] %v5804_v30 }
 0x447   : > { %6795 = shalt.err (!%p6792_p3)
}
 0x448   : > { %s6833_s26 = smov 128   ;;  %s6834_s28 = smov 8  }
 0x449   : > { %6710 = dma.vmem_to_hbm [thread:$0]  (%p6948_p5), %s5836_s15, 2048, %s5838_s19, %s5822_s22, %s6833_s26, %s6833_s26, %s6834_s28  }
 0x44a PF: > { %p6716_p4 = scmp.ge.s32.totalorder %s6830_s16, 2  ;;  %s5852_s27 = sand.u32 1, %s6818_s29  }
 0x44b   : > { %s5853_s20 = scalar_lea.sflag [#allocation6], %s5852_s27 }
 0x44c   : > { %p6713_p7 = pnand %p6716_p4, %p6952_p6 }
 0x44e   : > { %p6714_p8 = pneg %p6713_p7 }
 0x450   : > { %6813 = dma.done.wait (%p6714_p8), %s5853_s20, 2048  }
 0x451   : > { %6815 = vsyncadd (%p6714_p8), %s5853_s20, 4294965248  ;;  %s8978_s16 = sld [smem:[#allocation9_spill]]  ;;  %s8981_s29 = smov %s6822_s30 }
 0x452   : > { %s8979_s18 = sld [smem:[#allocation8_spill]] }
 0x453   : > { %s8980_s15 = sld [smem:[#allocation10_spill]] }
 0x457   : > { %p24_p9 = scmp.ge.s32.totalorder %s8978_s16, 4  }
 0x458   : > { %s8982_s30 = smov %s8979_s18 }
 0x459   :  { %26 = sbr.rel (!%p24_p9) target bundleno = 5 (0x5), region = 123 }
 0x45e   :  { %5859 = vsyncpa [#allocation6], 1 }
 0x45f   :  { %5861 = vsyncpa [#allocation6 + $0x1], 1 }

</bundles_post_ra>
